<compile_context>
chip_gen: v7x
topology: tpu7x:2x2x1
jax: 0.10.0
libtpu: 0.0.40
codegen_flags: <defaults>
</compile_context>

<pallas_src>
import functools

import jax
import jax.numpy as jnp
import numpy as np
from jax.experimental import pallas as pl
from jax.experimental.pallas import tpu as pltpu

NUM_CLASSES = 10
_VMEM_LIMIT = 32 * 1024 * 1024

# Images per conv grid step: M = B*Ho matmul rows (~224 -> good MXU fill on
# v6e/v7x; halve for v5e).  These keep B*Ho a multiple of 8 so multi-block
# output tiles stay sublane-aligned, and with large n they give >= 2 grid
# steps so v7x can shard the ("parallel",) batch axis over its two TensorCores.
_CONV1_BLOCK_BATCH = 16   # Ho = 14 -> M = 224
_CONV2_BLOCK_BATCH = 32   # Ho = 7  -> M = 224


# ----------------------------- Pallas kernels ------------------------------ #

def _conv_relu_pool_kernel(xe_ref, xo_ref, w_ref, b_ref, o_ref, *, ho, bb):
    """Fused 5x5 'same' conv + bias + ReLU + 2x2 max-pool for B images.

    xe_ref: (B, Hp//2, Wp*Cin)  even rows of the zero-padded input (bf16).
    xo_ref: (B, Hp//2, Wp*Cin)  odd rows of the padded input (bf16).
    w_ref : (10, Wp*Cin, Wo*Cout) banded im2col weights (bf16); idx = pb*5+dy
                                  (pb = output-column parity, dy = kernel row).
    b_ref : (1, Wo*Cout)        bias tiled over pooled output columns (f32).
    o_ref : (B*Ho, Wo*Cout)     pooled output, rows ordered (image, pooled row).

    Output pixel (h, w) = (2r+pa, 2w'+pb); for each of the 4 pooling phases
    (pa, pb) the conv is 5 plain 2-D MXU matmuls (one per kernel row dy) with
    M = B*Ho rows against the banded matrices, then the 2x2 max-pool is an
    elementwise max of the 4 phase accumulators.
    """
    planes = (xe_ref, xo_ref)
    m = bb * ho
    wpc = xe_ref.shape[-1]
    # Only 6 distinct row slabs exist (s = pa + dy in 0..5): load + merge each
    # ONCE.  The merge (B, Ho, K) -> (B*Ho, K) is the only in-kernel relayout.
    slabs = []
    for s in range(6):
        sl = planes[s % 2][:, s // 2:s // 2 + ho, :]          # (B, Ho, Wp*Cin)
        slabs.append(sl.reshape(m, wpc))                       # (M, Wp*Cin)
    # TODO(synk): each banded RHS is still pushed twice (once per pa phase);
    # pltpu.matmul_push_rhs / a pa-stacked LHS would shave another ~25% of the
    # MXU sequencing, at the cost of explicit MXU driving or in-kernel concats.
    pooled = None
    for pa in range(2):                 # output-row parity (pool row phase)
        for pb in range(2):             # output-col parity (pool col phase)
            acc = None
            for dy in range(5):         # conv kernel row
                part = jnp.dot(slabs[pa + dy], w_ref[pb * 5 + dy],
                               preferred_element_type=jnp.float32)  # (M, Wo*Cout)
                acc = part if acc is None else acc + part
            pooled = acc if pooled is None else jnp.maximum(pooled, acc)
    # bias is identical for all 4 phases and ReLU is monotone -> add/ReLU once.
    o_ref[...] = jnp.maximum(pooled + b_ref[...], 0.0).astype(o_ref.dtype)


def _linear_kernel(x_ref, w_ref, b_ref, o_ref):
    """o = x @ w + b for one row tile; bf16 MXU inputs, f32 accumulate/epilogue."""
    x = x_ref[...].astype(jnp.bfloat16)
    o_ref[...] = (jnp.dot(x, w_ref[...], preferred_element_type=jnp.float32)
                  + b_ref[...])


# ------------------------------- wrappers ----------------------------------- #

def _resident_spec(block_shape, index_map):
    """BlockSpec for a grid-invariant operand; single-buffered when supported."""
    try:
        return pl.BlockSpec(block_shape, index_map, pipeline_mode=pl.Buffered(1))
    except TypeError:  # older Pallas without pipeline_mode kwarg
        return pl.BlockSpec(block_shape, index_map)


def conv_relu_pool(x_nhwc, w_packed, b_packed, cout, *, block_batch, out_dtype):
    """Conv2d(k=5, stride=1, pad=2) + ReLU + MaxPool2d(2), fused, B images/step."""
    n, h, w, cin = x_nhwc.shape
    assert h % 2 == 0 and w % 2 == 0, "2x2 max-pool requires even spatial dims"
    hp, wp, ho, wo = h + 4, w + 4, h // 2, w // 2
    if n <= block_batch:
        bb, n_pad = n, n                                      # single grid step
    else:
        bb = block_batch
        n_pad = ((n + bb - 1) // bb) * bb
    if n_pad != n:
        x_nhwc = jnp.pad(x_nhwc, ((0, n_pad - n), (0, 0), (0, 0), (0, 0)))
    # zero-pad (SAME for k=5), flatten (W, C) onto lanes (free reshape), split
    # padded rows by parity so row pooling needs no strided reads in-kernel,
    # cast to bf16 (MXU dtype, halves HBM traffic).
    # TODO(synk): emitting this padded/parity-split layout directly from the
    # previous conv kernel would drop one HBM round trip of inter-layer glue.
    xp = jnp.pad(x_nhwc, ((0, 0), (2, 2), (2, 2), (0, 0)))
    xp = xp.astype(jnp.bfloat16).reshape(n_pad, hp, wp * cin)
    xe, xo = xp[:, 0::2, :], xp[:, 1::2, :]                   # (n_pad, hp//2, wp*cin)
    out2d = pl.pallas_call(
        functools.partial(_conv_relu_pool_kernel, ho=ho, bb=bb),
        out_shape=jax.ShapeDtypeStruct((n_pad * ho, wo * cout), out_dtype),
        grid=(n_pad // bb,),
        in_specs=[
            pl.BlockSpec((bb, hp // 2, wp * cin), lambda i: (i, 0, 0)),
            pl.BlockSpec((bb, hp // 2, wp * cin), lambda i: (i, 0, 0)),
            # constant block index + single buffer -> weights stay resident
            _resident_spec((10, wp * cin, wo * cout), lambda i: (0, 0, 0)),
            _resident_spec((1, wo * cout), lambda i: (0, 0)),
        ],
        out_specs=pl.BlockSpec((bb * ho, wo * cout), lambda i: (i, 0)),
        compiler_params=pltpu.CompilerParams(
            dimension_semantics=("parallel",),
            vmem_limit_bytes=_VMEM_LIMIT),
    )(xe, xo, w_packed, b_packed)
    # rows are (image, pooled row) -> free reshape back to NHWC, drop batch pad.
    return out2d.reshape(n_pad, ho, wo, cout)[:n]


def linear(x, w_packed, b_packed):
    """Row-tiled FC: (M, K) @ (K, 128) + bias, output lane-dense (128 classes)."""
    m, k = x.shape
    k2, npad = w_packed.shape
    assert k == k2
    tm = m if m <= 512 else 512          # big row tiles amortize per-step overhead
    return pl.pallas_call(
        _linear_kernel,
        out_shape=jax.ShapeDtypeStruct((m, npad), jnp.float32),
        grid=(pl.cdiv(m, tm),),
        in_specs=[
            pl.BlockSpec((tm, k), lambda i: (i, 0)),
            _resident_spec((k, npad), lambda i: (0, 0)),
            _resident_spec((1, npad), lambda i: (0, 0)),
        ],
        out_specs=pl.BlockSpec((tm, npad), lambda i: (i, 0)),
        compiler_params=pltpu.CompilerParams(
            dimension_semantics=("parallel",),
            vmem_limit_bytes=_VMEM_LIMIT),
    )(x, w_packed, b_packed)


# ---------------------------- weight packing -------------------------------- #

def _pack_conv(w_oihw, width):
    """Fold im2col + the pooling column phase into banded weight matrices.

    Returns m of shape (10, (width+4)*Cin, (width//2)*Cout) with
      m[pb*5+dy, wp*Cin+ci, wo*Cout+co] = W[co, ci, dy, wp - (2*wo + pb)]
    whenever 0 <= wp - (2*wo + pb) <= 4, else 0.  Stored in bf16 for the MXU.
    """
    wnp = np.asarray(w_oihw, np.float32)
    cout, cin, kh, kw = wnp.shape
    wp_, wo_ = width + 4, width // 2
    wt = np.transpose(wnp, (2, 3, 1, 0))                       # (dy, dx, ci, co)
    m = np.zeros((2 * kh, wp_ * cin, wo_ * cout), np.float32)
    for pb in range(2):
        for dy in range(kh):
            for wo in range(wo_):
                for dx in range(kw):
                    wpix = 2 * wo + pb + dx
                    m[pb * kh + dy,
                      wpix * cin:(wpix + 1) * cin,
                      wo * cout:(wo + 1) * cout] = wt[dy, dx]
    return jnp.asarray(m, dtype=jnp.bfloat16)


def _pack_conv_bias(b, width):
    wo_ = width // 2
    return jnp.asarray(np.tile(np.asarray(b, np.float32), wo_).reshape(1, -1))


def pack_params(params):
    """One-time packing of PyTorch-layout params into kernel-friendly layouts."""
    wf = np.asarray(params["wf"], np.float32)                  # (10, 1568) NCHW order
    bf = np.asarray(params["bf"], np.float32)                  # (10,)
    # Reorder FC weight columns from PyTorch's NCHW flatten (c*49 + h*7 + w) to
    # the NHWC flatten (h*224 + w*32 + c) that conv2's output provides for free,
    # so the logits path needs no activation transpose.
    wf_nhwc = (wf.reshape(NUM_CLASSES, 32, 7, 7)
                 .transpose(0, 2, 3, 1).reshape(NUM_CLASSES, -1))
    kf = wf_nhwc.shape[1]
    wf_p = np.zeros((kf, 128), np.float32)                     # pad classes -> 128 lanes
    wf_p[:, :NUM_CLASSES] = wf_nhwc.T
    bf_p = np.zeros((1, 128), np.float32)
    bf_p[0, :NUM_CLASSES] = bf
    return {
        "w1": _pack_conv(params["w1"], 28),
        "b1": _pack_conv_bias(params["b1"], 28),
        "w2": _pack_conv(params["w2"], 14),
        "b2": _pack_conv_bias(params["b2"], 14),
        "wf": jnp.asarray(wf_p, dtype=jnp.bfloat16),
        "bf": jnp.asarray(bf_p),
    }


# ------------------------------ full forward -------------------------------- #

def cnn_forward(x_nchw, packed):
    n = x_nchw.shape[0]
    # Cin == 1, so NCHW -> NHWC is a pure (free) reshape.
    x = x_nchw.reshape(n, 28, 28, 1)
    x = conv_relu_pool(x, packed["w1"], packed["b1"], cout=16,
                       block_batch=_CONV1_BLOCK_BATCH,
                       out_dtype=jnp.bfloat16)                 # (n,14,14,16) bf16
    x = conv_relu_pool(x, packed["w2"], packed["b2"], cout=32,
                       block_batch=_CONV2_BLOCK_BATCH,
                       out_dtype=jnp.float32)                  # (n, 7, 7,32) f32
    # logits consume the free NHWC flatten (FC weight packed in that order):
    # no transpose on the logits critical path.
    logits = linear(x.reshape(n, -1), packed["wf"], packed["bf"])[:, :NUM_CLASSES]
    # PyTorch NCHW-order flattened features to match x.view(x.size(0), -1);
    # leaf output only, off the logits path.
    # TODO(synk): could be emitted by the conv2 kernel directly to save this glue.
    feat = jnp.transpose(x, (0, 3, 1, 2)).reshape(n, -1)       # (n, 1568)
    return logits, feat


def init_params(key):
    k1, k2, k3, k4, k5, k6 = jax.random.split(key, 6)
    return {
        "w1": 0.1 * jax.random.normal(k1, (16, 1, 5, 5), jnp.float32),
        "b1": 0.05 * jax.random.normal(k2, (16,), jnp.float32),
        "w2": 0.05 * jax.random.normal(k3, (32, 16, 5, 5), jnp.float32),
        "b2": 0.05 * jax.random.normal(k4, (32,), jnp.float32),
        "wf": 0.02 * jax.random.normal(k5, (10, 32 * 7 * 7), jnp.float32),
        "bf": 0.05 * jax.random.normal(k6, (10,), jnp.float32),
    }


# --------------------------- pure-JAX reference ------------------------------ #

def reference_forward(x_nchw, params):
    x = jnp.transpose(x_nchw, (0, 2, 3, 1))

    def conv(x, w, b):
        y = jax.lax.conv_general_dilated(
            x, jnp.transpose(w, (2, 3, 1, 0)), (1, 1), "SAME",
            dimension_numbers=("NHWC", "HWIO", "NHWC"),
            precision=jax.lax.Precision.HIGHEST)
        return jnp.maximum(y + b, 0.0)

    def pool(x):
        return jax.lax.reduce_window(x, -jnp.inf, jax.lax.max,
                                     (1, 2, 2, 1), (1, 2, 2, 1), "VALID")

    x = pool(conv(x, params["w1"], params["b1"]))
    x = pool(conv(x, params["w2"], params["b2"]))
    feat = jnp.transpose(x, (0, 3, 1, 2)).reshape(x.shape[0], -1)
    logits = feat @ params["wf"].T + params["bf"]
    return logits, feat


if __name__ == "__main__":
    x = jax.random.normal(jax.random.PRNGKey(0), (2, 1, 28, 28), jnp.float32)
    params = init_params(jax.random.PRNGKey(42))
    packed = pack_params(params)                  # one-time weight packing

    fwd = jax.jit(cnn_forward)
    logits, feat = fwd(x, packed)
    jax.block_until_ready((logits, feat))

    assert logits.shape == (2, 10) and feat.shape == (2, 32 * 7 * 7)

    ref_logits, ref_feat = reference_forward(x, params)
    np.testing.assert_allclose(np.asarray(feat), np.asarray(ref_feat),
                               rtol=2e-2, atol=2e-2)
    np.testing.assert_allclose(np.asarray(logits), np.asarray(ref_logits),
                               rtol=2e-2, atol=2e-2)

    print("KERNEL_OK")
</pallas_src>

<mosaic_0001>
module attributes {stable_mosaic.version = 11 : i64} {
  func.func @_conv_relu_pool_kernel(%arg0: i32, %arg1: memref<2x16x32xbf16, #tpu.memory_space<vmem>>, %arg2: memref<2x16x32xbf16, #tpu.memory_space<vmem>>, %arg3: memref<10x32x224xbf16, #tpu.memory_space<vmem>>, %arg4: memref<1x224xf32, #tpu.memory_space<vmem>>, %arg5: memref<28x224xbf16, #tpu.memory_space<vmem>>) attributes {dimension_semantics = [#tpu.dimension_semantics<parallel>], iteration_bounds = array<i64: 1>, scalar_prefetch = 0 : i64, scratch_operands = 0 : i64, tpu.core_type = #tpu.core_type<tc>, window_params = [{transform_indices = @transform_0, window_bounds = array<i64: 2, 16, 32>}, {transform_indices = @transform_1, window_bounds = array<i64: 2, 16, 32>}, {pipeline_mode = #tpu.pipeline_mode<synchronous>, transform_indices = @transform_2, window_bounds = array<i64: 10, 32, 224>}, {pipeline_mode = #tpu.pipeline_mode<synchronous>, transform_indices = @transform_3, window_bounds = array<i64: 1, 224>}, {transform_indices = @transform_4, window_bounds = array<i64: 28, 224>}]} {
    %c0 = arith.constant 0 : index
    %c0_0 = arith.constant 0 : index
    %c0_1 = arith.constant 0 : index
    %0 = vector.load %arg1[%c0, %c0_0, %c0_1] : memref<2x16x32xbf16, #tpu.memory_space<vmem>>, vector<2x14x32xbf16>
    %1 = vector.shape_cast %0 : vector<2x14x32xbf16> to vector<28x32xbf16>
    %c0_2 = arith.constant 0 : index
    %c0_3 = arith.constant 0 : index
    %c0_4 = arith.constant 0 : index
    %2 = vector.load %arg2[%c0_2, %c0_3, %c0_4] : memref<2x16x32xbf16, #tpu.memory_space<vmem>>, vector<2x14x32xbf16>
    %3 = vector.shape_cast %2 : vector<2x14x32xbf16> to vector<28x32xbf16>
    %c0_5 = arith.constant 0 : index
    %c1 = arith.constant 1 : index
    %c0_6 = arith.constant 0 : index
    %4 = vector.load %arg1[%c0_5, %c1, %c0_6] : memref<2x16x32xbf16, #tpu.memory_space<vmem>>, vector<2x14x32xbf16>
    %5 = vector.shape_cast %4 : vector<2x14x32xbf16> to vector<28x32xbf16>
    %c0_7 = arith.constant 0 : index
    %c1_8 = arith.constant 1 : index
    %c0_9 = arith.constant 0 : index
    %6 = vector.load %arg2[%c0_7, %c1_8, %c0_9] : memref<2x16x32xbf16, #tpu.memory_space<vmem>>, vector<2x14x32xbf16>
    %7 = vector.shape_cast %6 : vector<2x14x32xbf16> to vector<28x32xbf16>
    %c0_10 = arith.constant 0 : index
    %c2 = arith.constant 2 : index
    %c0_11 = arith.constant 0 : index
    %8 = vector.load %arg1[%c0_10, %c2, %c0_11] : memref<2x16x32xbf16, #tpu.memory_space<vmem>>, vector<2x14x32xbf16>
    %9 = vector.shape_cast %8 : vector<2x14x32xbf16> to vector<28x32xbf16>
    %c0_12 = arith.constant 0 : index
    %c2_13 = arith.constant 2 : index
    %c0_14 = arith.constant 0 : index
    %10 = vector.load %arg2[%c0_12, %c2_13, %c0_14] : memref<2x16x32xbf16, #tpu.memory_space<vmem>>, vector<2x14x32xbf16>
    %11 = vector.shape_cast %10 : vector<2x14x32xbf16> to vector<28x32xbf16>
    %c0_15 = arith.constant 0 : index
    %c0_16 = arith.constant 0 : index
    %c0_17 = arith.constant 0 : index
    %12 = vector.load %arg3[%c0_15, %c0_16, %c0_17] : memref<10x32x224xbf16, #tpu.memory_space<vmem>>, vector<1x32x224xbf16>
    %13 = vector.shape_cast %12 : vector<1x32x224xbf16> to vector<32x224xbf16>
    %cst = arith.constant dense<0.000000e+00> : vector<28x224xf32>
    %14 = tpu.matmul %1, %13, %cst {dimension_numbers = #tpu.dot_dimension_numbers<[1], [0], [0], [1], [0, 0, 1, 1], [], []>} : vector<28x32xbf16>, vector<32x224xbf16>, vector<28x224xf32> -> vector<28x224xf32>
    %c1_18 = arith.constant 1 : index
    %c0_19 = arith.constant 0 : index
    %c0_20 = arith.constant 0 : index
    %15 = vector.load %arg3[%c1_18, %c0_19, %c0_20] : memref<10x32x224xbf16, #tpu.memory_space<vmem>>, vector<1x32x224xbf16>
    %16 = vector.shape_cast %15 : vector<1x32x224xbf16> to vector<32x224xbf16>
    %cst_21 = arith.constant dense<0.000000e+00> : vector<28x224xf32>
    %17 = tpu.matmul %3, %16, %cst_21 {dimension_numbers = #tpu.dot_dimension_numbers<[1], [0], [0], [1], [0, 0, 1, 1], [], []>} : vector<28x32xbf16>, vector<32x224xbf16>, vector<28x224xf32> -> vector<28x224xf32>
    %18 = arith.addf %14, %17 : vector<28x224xf32>
    %c2_22 = arith.constant 2 : index
    %c0_23 = arith.constant 0 : index
    %c0_24 = arith.constant 0 : index
    %19 = vector.load %arg3[%c2_22, %c0_23, %c0_24] : memref<10x32x224xbf16, #tpu.memory_space<vmem>>, vector<1x32x224xbf16>
    %20 = vector.shape_cast %19 : vector<1x32x224xbf16> to vector<32x224xbf16>
    %cst_25 = arith.constant dense<0.000000e+00> : vector<28x224xf32>
    %21 = tpu.matmul %5, %20, %cst_25 {dimension_numbers = #tpu.dot_dimension_numbers<[1], [0], [0], [1], [0, 0, 1, 1], [], []>} : vector<28x32xbf16>, vector<32x224xbf16>, vector<28x224xf32> -> vector<28x224xf32>
    %22 = arith.addf %18, %21 : vector<28x224xf32>
    %c3 = arith.constant 3 : index
    %c0_26 = arith.constant 0 : index
    %c0_27 = arith.constant 0 : index
    %23 = vector.load %arg3[%c3, %c0_26, %c0_27] : memref<10x32x224xbf16, #tpu.memory_space<vmem>>, vector<1x32x224xbf16>
    %24 = vector.shape_cast %23 : vector<1x32x224xbf16> to vector<32x224xbf16>
    %cst_28 = arith.constant dense<0.000000e+00> : vector<28x224xf32>
    %25 = tpu.matmul %7, %24, %cst_28 {dimension_numbers = #tpu.dot_dimension_numbers<[1], [0], [0], [1], [0, 0, 1, 1], [], []>} : vector<28x32xbf16>, vector<32x224xbf16>, vector<28x224xf32> -> vector<28x224xf32>
    %26 = arith.addf %22, %25 : vector<28x224xf32>
    %c4 = arith.constant 4 : index
    %c0_29 = arith.constant 0 : index
    %c0_30 = arith.constant 0 : index
    %27 = vector.load %arg3[%c4, %c0_29, %c0_30] : memref<10x32x224xbf16, #tpu.memory_space<vmem>>, vector<1x32x224xbf16>
    %28 = vector.shape_cast %27 : vector<1x32x224xbf16> to vector<32x224xbf16>
    %cst_31 = arith.constant dense<0.000000e+00> : vector<28x224xf32>
    %29 = tpu.matmul %9, %28, %cst_31 {dimension_numbers = #tpu.dot_dimension_numbers<[1], [0], [0], [1], [0, 0, 1, 1], [], []>} : vector<28x32xbf16>, vector<32x224xbf16>, vector<28x224xf32> -> vector<28x224xf32>
    %30 = arith.addf %26, %29 : vector<28x224xf32>
    %c5 = arith.constant 5 : index
    %c0_32 = arith.constant 0 : index
    %c0_33 = arith.constant 0 : index
    %31 = vector.load %arg3[%c5, %c0_32, %c0_33] : memref<10x32x224xbf16, #tpu.memory_space<vmem>>, vector<1x32x224xbf16>
    %32 = vector.shape_cast %31 : vector<1x32x224xbf16> to vector<32x224xbf16>
    %cst_34 = arith.constant dense<0.000000e+00> : vector<28x224xf32>
    %33 = tpu.matmul %1, %32, %cst_34 {dimension_numbers = #tpu.dot_dimension_numbers<[1], [0], [0], [1], [0, 0, 1, 1], [], []>} : vector<28x32xbf16>, vector<32x224xbf16>, vector<28x224xf32> -> vector<28x224xf32>
    %c6 = arith.constant 6 : index
    %c0_35 = arith.constant 0 : index
    %c0_36 = arith.constant 0 : index
    %34 = vector.load %arg3[%c6, %c0_35, %c0_36] : memref<10x32x224xbf16, #tpu.memory_space<vmem>>, vector<1x32x224xbf16>
    %35 = vector.shape_cast %34 : vector<1x32x224xbf16> to vector<32x224xbf16>
    %cst_37 = arith.constant dense<0.000000e+00> : vector<28x224xf32>
    %36 = tpu.matmul %3, %35, %cst_37 {dimension_numbers = #tpu.dot_dimension_numbers<[1], [0], [0], [1], [0, 0, 1, 1], [], []>} : vector<28x32xbf16>, vector<32x224xbf16>, vector<28x224xf32> -> vector<28x224xf32>
    %37 = arith.addf %33, %36 : vector<28x224xf32>
    %c7 = arith.constant 7 : index
    %c0_38 = arith.constant 0 : index
    %c0_39 = arith.constant 0 : index
    %38 = vector.load %arg3[%c7, %c0_38, %c0_39] : memref<10x32x224xbf16, #tpu.memory_space<vmem>>, vector<1x32x224xbf16>
    %39 = vector.shape_cast %38 : vector<1x32x224xbf16> to vector<32x224xbf16>
    %cst_40 = arith.constant dense<0.000000e+00> : vector<28x224xf32>
    %40 = tpu.matmul %5, %39, %cst_40 {dimension_numbers = #tpu.dot_dimension_numbers<[1], [0], [0], [1], [0, 0, 1, 1], [], []>} : vector<28x32xbf16>, vector<32x224xbf16>, vector<28x224xf32> -> vector<28x224xf32>
    %41 = arith.addf %37, %40 : vector<28x224xf32>
    %c8 = arith.constant 8 : index
    %c0_41 = arith.constant 0 : index
    %c0_42 = arith.constant 0 : index
    %42 = vector.load %arg3[%c8, %c0_41, %c0_42] : memref<10x32x224xbf16, #tpu.memory_space<vmem>>, vector<1x32x224xbf16>
    %43 = vector.shape_cast %42 : vector<1x32x224xbf16> to vector<32x224xbf16>
    %cst_43 = arith.constant dense<0.000000e+00> : vector<28x224xf32>
    %44 = tpu.matmul %7, %43, %cst_43 {dimension_numbers = #tpu.dot_dimension_numbers<[1], [0], [0], [1], [0, 0, 1, 1], [], []>} : vector<28x32xbf16>, vector<32x224xbf16>, vector<28x224xf32> -> vector<28x224xf32>
    %45 = arith.addf %41, %44 : vector<28x224xf32>
    %c9 = arith.constant 9 : index
    %c0_44 = arith.constant 0 : index
    %c0_45 = arith.constant 0 : index
    %46 = vector.load %arg3[%c9, %c0_44, %c0_45] : memref<10x32x224xbf16, #tpu.memory_space<vmem>>, vector<1x32x224xbf16>
    %47 = vector.shape_cast %46 : vector<1x32x224xbf16> to vector<32x224xbf16>
    %cst_46 = arith.constant dense<0.000000e+00> : vector<28x224xf32>
    %48 = tpu.matmul %9, %47, %cst_46 {dimension_numbers = #tpu.dot_dimension_numbers<[1], [0], [0], [1], [0, 0, 1, 1], [], []>} : vector<28x32xbf16>, vector<32x224xbf16>, vector<28x224xf32> -> vector<28x224xf32>
    %49 = arith.addf %45, %48 : vector<28x224xf32>
    %50 = arith.maximumf %30, %49 : vector<28x224xf32>
    %c0_47 = arith.constant 0 : index
    %c0_48 = arith.constant 0 : index
    %c0_49 = arith.constant 0 : index
    %51 = vector.load %arg3[%c0_47, %c0_48, %c0_49] : memref<10x32x224xbf16, #tpu.memory_space<vmem>>, vector<1x32x224xbf16>
    %52 = vector.shape_cast %51 : vector<1x32x224xbf16> to vector<32x224xbf16>
    %cst_50 = arith.constant dense<0.000000e+00> : vector<28x224xf32>
    %53 = tpu.matmul %3, %52, %cst_50 {dimension_numbers = #tpu.dot_dimension_numbers<[1], [0], [0], [1], [0, 0, 1, 1], [], []>} : vector<28x32xbf16>, vector<32x224xbf16>, vector<28x224xf32> -> vector<28x224xf32>
    %c1_51 = arith.constant 1 : index
    %c0_52 = arith.constant 0 : index
    %c0_53 = arith.constant 0 : index
    %54 = vector.load %arg3[%c1_51, %c0_52, %c0_53] : memref<10x32x224xbf16, #tpu.memory_space<vmem>>, vector<1x32x224xbf16>
    %55 = vector.shape_cast %54 : vector<1x32x224xbf16> to vector<32x224xbf16>
    %cst_54 = arith.constant dense<0.000000e+00> : vector<28x224xf32>
    %56 = tpu.matmul %5, %55, %cst_54 {dimension_numbers = #tpu.dot_dimension_numbers<[1], [0], [0], [1], [0, 0, 1, 1], [], []>} : vector<28x32xbf16>, vector<32x224xbf16>, vector<28x224xf32> -> vector<28x224xf32>
    %57 = arith.addf %53, %56 : vector<28x224xf32>
    %c2_55 = arith.constant 2 : index
    %c0_56 = arith.constant 0 : index
    %c0_57 = arith.constant 0 : index
    %58 = vector.load %arg3[%c2_55, %c0_56, %c0_57] : memref<10x32x224xbf16, #tpu.memory_space<vmem>>, vector<1x32x224xbf16>
    %59 = vector.shape_cast %58 : vector<1x32x224xbf16> to vector<32x224xbf16>
    %cst_58 = arith.constant dense<0.000000e+00> : vector<28x224xf32>
    %60 = tpu.matmul %7, %59, %cst_58 {dimension_numbers = #tpu.dot_dimension_numbers<[1], [0], [0], [1], [0, 0, 1, 1], [], []>} : vector<28x32xbf16>, vector<32x224xbf16>, vector<28x224xf32> -> vector<28x224xf32>
    %61 = arith.addf %57, %60 : vector<28x224xf32>
    %c3_59 = arith.constant 3 : index
    %c0_60 = arith.constant 0 : index
    %c0_61 = arith.constant 0 : index
    %62 = vector.load %arg3[%c3_59, %c0_60, %c0_61] : memref<10x32x224xbf16, #tpu.memory_space<vmem>>, vector<1x32x224xbf16>
    %63 = vector.shape_cast %62 : vector<1x32x224xbf16> to vector<32x224xbf16>
    %cst_62 = arith.constant dense<0.000000e+00> : vector<28x224xf32>
    %64 = tpu.matmul %9, %63, %cst_62 {dimension_numbers = #tpu.dot_dimension_numbers<[1], [0], [0], [1], [0, 0, 1, 1], [], []>} : vector<28x32xbf16>, vector<32x224xbf16>, vector<28x224xf32> -> vector<28x224xf32>
    %65 = arith.addf %61, %64 : vector<28x224xf32>
    %c4_63 = arith.constant 4 : index
    %c0_64 = arith.constant 0 : index
    %c0_65 = arith.constant 0 : index
    %66 = vector.load %arg3[%c4_63, %c0_64, %c0_65] : memref<10x32x224xbf16, #tpu.memory_space<vmem>>, vector<1x32x224xbf16>
    %67 = vector.shape_cast %66 : vector<1x32x224xbf16> to vector<32x224xbf16>
    %cst_66 = arith.constant dense<0.000000e+00> : vector<28x224xf32>
    %68 = tpu.matmul %11, %67, %cst_66 {dimension_numbers = #tpu.dot_dimension_numbers<[1], [0], [0], [1], [0, 0, 1, 1], [], []>} : vector<28x32xbf16>, vector<32x224xbf16>, vector<28x224xf32> -> vector<28x224xf32>
    %69 = arith.addf %65, %68 : vector<28x224xf32>
    %70 = arith.maximumf %50, %69 : vector<28x224xf32>
    %c5_67 = arith.constant 5 : index
    %c0_68 = arith.constant 0 : index
    %c0_69 = arith.constant 0 : index
    %71 = vector.load %arg3[%c5_67, %c0_68, %c0_69] : memref<10x32x224xbf16, #tpu.memory_space<vmem>>, vector<1x32x224xbf16>
    %72 = vector.shape_cast %71 : vector<1x32x224xbf16> to vector<32x224xbf16>
    %cst_70 = arith.constant dense<0.000000e+00> : vector<28x224xf32>
    %73 = tpu.matmul %3, %72, %cst_70 {dimension_numbers = #tpu.dot_dimension_numbers<[1], [0], [0], [1], [0, 0, 1, 1], [], []>} : vector<28x32xbf16>, vector<32x224xbf16>, vector<28x224xf32> -> vector<28x224xf32>
    %c6_71 = arith.constant 6 : index
    %c0_72 = arith.constant 0 : index
    %c0_73 = arith.constant 0 : index
    %74 = vector.load %arg3[%c6_71, %c0_72, %c0_73] : memref<10x32x224xbf16, #tpu.memory_space<vmem>>, vector<1x32x224xbf16>
    %75 = vector.shape_cast %74 : vector<1x32x224xbf16> to vector<32x224xbf16>
    %cst_74 = arith.constant dense<0.000000e+00> : vector<28x224xf32>
    %76 = tpu.matmul %5, %75, %cst_74 {dimension_numbers = #tpu.dot_dimension_numbers<[1], [0], [0], [1], [0, 0, 1, 1], [], []>} : vector<28x32xbf16>, vector<32x224xbf16>, vector<28x224xf32> -> vector<28x224xf32>
    %77 = arith.addf %73, %76 : vector<28x224xf32>
    %c7_75 = arith.constant 7 : index
    %c0_76 = arith.constant 0 : index
    %c0_77 = arith.constant 0 : index
    %78 = vector.load %arg3[%c7_75, %c0_76, %c0_77] : memref<10x32x224xbf16, #tpu.memory_space<vmem>>, vector<1x32x224xbf16>
    %79 = vector.shape_cast %78 : vector<1x32x224xbf16> to vector<32x224xbf16>
    %cst_78 = arith.constant dense<0.000000e+00> : vector<28x224xf32>
    %80 = tpu.matmul %7, %79, %cst_78 {dimension_numbers = #tpu.dot_dimension_numbers<[1], [0], [0], [1], [0, 0, 1, 1], [], []>} : vector<28x32xbf16>, vector<32x224xbf16>, vector<28x224xf32> -> vector<28x224xf32>
    %81 = arith.addf %77, %80 : vector<28x224xf32>
    %c8_79 = arith.constant 8 : index
    %c0_80 = arith.constant 0 : index
    %c0_81 = arith.constant 0 : index
    %82 = vector.load %arg3[%c8_79, %c0_80, %c0_81] : memref<10x32x224xbf16, #tpu.memory_space<vmem>>, vector<1x32x224xbf16>
    %83 = vector.shape_cast %82 : vector<1x32x224xbf16> to vector<32x224xbf16>
    %cst_82 = arith.constant dense<0.000000e+00> : vector<28x224xf32>
    %84 = tpu.matmul %9, %83, %cst_82 {dimension_numbers = #tpu.dot_dimension_numbers<[1], [0], [0], [1], [0, 0, 1, 1], [], []>} : vector<28x32xbf16>, vector<32x224xbf16>, vector<28x224xf32> -> vector<28x224xf32>
    %85 = arith.addf %81, %84 : vector<28x224xf32>
    %c9_83 = arith.constant 9 : index
    %c0_84 = arith.constant 0 : index
    %c0_85 = arith.constant 0 : index
    %86 = vector.load %arg3[%c9_83, %c0_84, %c0_85] : memref<10x32x224xbf16, #tpu.memory_space<vmem>>, vector<1x32x224xbf16>
    %87 = vector.shape_cast %86 : vector<1x32x224xbf16> to vector<32x224xbf16>
    %cst_86 = arith.constant dense<0.000000e+00> : vector<28x224xf32>
    %88 = tpu.matmul %11, %87, %cst_86 {dimension_numbers = #tpu.dot_dimension_numbers<[1], [0], [0], [1], [0, 0, 1, 1], [], []>} : vector<28x32xbf16>, vector<32x224xbf16>, vector<28x224xf32> -> vector<28x224xf32>
    %89 = arith.addf %85, %88 : vector<28x224xf32>
    %90 = arith.maximumf %70, %89 : vector<28x224xf32>
    %c0_87 = arith.constant 0 : index
    %c0_88 = arith.constant 0 : index
    %91 = vector.load %arg4[%c0_87, %c0_88] : memref<1x224xf32, #tpu.memory_space<vmem>>, vector<1x224xf32>
    %92 = vector.broadcast %91 : vector<1x224xf32> to vector<28x224xf32>
    %93 = arith.addf %90, %92 : vector<28x224xf32>
    %cst_89 = arith.constant 0.000000e+00 : f32
    %94 = vector.broadcast %cst_89 : f32 to vector<28x224xf32>
    %95 = arith.maximumf %93, %94 : vector<28x224xf32>
    %96 = arith.truncf %95 : vector<28x224xf32> to vector<28x224xbf16>
    %c0_90 = arith.constant 0 : index
    %c0_91 = arith.constant 0 : index
    %97 = vector.load %arg5[%c0_90, %c0_91] : memref<28x224xbf16, #tpu.memory_space<vmem>>, vector<28x224xbf16>
    tpu.vector_store %arg5[%c0_90, %c0_91], %96 {strides = array<i32>} : memref<28x224xbf16, #tpu.memory_space<vmem>>, vector<28x224xbf16>,
    return
  }
  func.func @transform_0(%arg0: i32) -> (i32, i32, i32) {
    %c0_i32 = arith.constant 0 : i32
    %c0_i32_0 = arith.constant 0 : i32
    %c0_i32_1 = arith.constant 0 : i32
    return %arg0, %c0_i32, %c0_i32_0 : i32, i32, i32
  }
  func.func @transform_1(%arg0: i32) -> (i32, i32, i32) {
    %c0_i32 = arith.constant 0 : i32
    %c0_i32_0 = arith.constant 0 : i32
    %c0_i32_1 = arith.constant 0 : i32
    return %arg0, %c0_i32, %c0_i32_0 : i32, i32, i32
  }
  func.func @transform_2(%arg0: i32) -> (i32, i32, i32) {
    %c0_i32 = arith.constant 0 : i32
    %c0_i32_0 = arith.constant 0 : i32
    %c0_i32_1 = arith.constant 0 : i32
    %c0_i32_2 = arith.constant 0 : i32
    return %c0_i32, %c0_i32_0, %c0_i32_1 : i32, i32, i32
  }
  func.func @transform_3(%arg0: i32) -> (i32, i32) {
    %c0_i32 = arith.constant 0 : i32
    %c0_i32_0 = arith.constant 0 : i32
    %c0_i32_1 = arith.constant 0 : i32
    return %c0_i32, %c0_i32_0 : i32, i32
  }
  func.func @transform_4(%arg0: i32) -> (i32, i32) {
    %c0_i32 = arith.constant 0 : i32
    %c0_i32_0 = arith.constant 0 : i32
    return %arg0, %c0_i32 : i32, i32
  }
}

module attributes {stable_mosaic.version = 11 : i64} {
  func.func @_conv_relu_pool_kernel(%arg0: i32, %arg1: memref<2x9x288xbf16, #tpu.memory_space<vmem>>, %arg2: memref<2x9x288xbf16, #tpu.memory_space<vmem>>, %arg3: memref<10x288x224xbf16, #tpu.memory_space<vmem>>, %arg4: memref<1x224xf32, #tpu.memory_space<vmem>>, %arg5: memref<14x224xf32, #tpu.memory_space<vmem>>) attributes {dimension_semantics = [#tpu.dimension_semantics<parallel>], iteration_bounds = array<i64: 1>, scalar_prefetch = 0 : i64, scratch_operands = 0 : i64, tpu.core_type = #tpu.core_type<tc>, window_params = [{transform_indices = @transform_0, window_bounds = array<i64: 2, 9, 288>}, {transform_indices = @transform_1, window_bounds = array<i64: 2, 9, 288>}, {pipeline_mode = #tpu.pipeline_mode<synchronous>, transform_indices = @transform_2, window_bounds = array<i64: 10, 288, 224>}, {pipeline_mode = #tpu.pipeline_mode<synchronous>, transform_indices = @transform_3, window_bounds = array<i64: 1, 224>}, {transform_indices = @transform_4, window_bounds = array<i64: 14, 224>}]} {
    %c0 = arith.constant 0 : index
    %c0_0 = arith.constant 0 : index
    %c0_1 = arith.constant 0 : index
    %0 = vector.load %arg1[%c0, %c0_0, %c0_1] : memref<2x9x288xbf16, #tpu.memory_space<vmem>>, vector<2x7x288xbf16>
    %1 = vector.shape_cast %0 : vector<2x7x288xbf16> to vector<14x288xbf16>
    %c0_2 = arith.constant 0 : index
    %c0_3 = arith.constant 0 : index
    %c0_4 = arith.constant 0 : index
    %2 = vector.load %arg2[%c0_2, %c0_3, %c0_4] : memref<2x9x288xbf16, #tpu.memory_space<vmem>>, vector<2x7x288xbf16>
    %3 = vector.shape_cast %2 : vector<2x7x288xbf16> to vector<14x288xbf16>
    %c0_5 = arith.constant 0 : index
    %c1 = arith.constant 1 : index
    %c0_6 = arith.constant 0 : index
    %4 = vector.load %arg1[%c0_5, %c1, %c0_6] : memref<2x9x288xbf16, #tpu.memory_space<vmem>>, vector<2x7x288xbf16>
    %5 = vector.shape_cast %4 : vector<2x7x288xbf16> to vector<14x288xbf16>
    %c0_7 = arith.constant 0 : index
    %c1_8 = arith.constant 1 : index
    %c0_9 = arith.constant 0 : index
    %6 = vector.load %arg2[%c0_7, %c1_8, %c0_9] : memref<2x9x288xbf16, #tpu.memory_space<vmem>>, vector<2x7x288xbf16>
    %7 = vector.shape_cast %6 : vector<2x7x288xbf16> to vector<14x288xbf16>
    %c0_10 = arith.constant 0 : index
    %c2 = arith.constant 2 : index
    %c0_11 = arith.constant 0 : index
    %8 = vector.load %arg1[%c0_10, %c2, %c0_11] : memref<2x9x288xbf16, #tpu.memory_space<vmem>>, vector<2x7x288xbf16>
    %9 = vector.shape_cast %8 : vector<2x7x288xbf16> to vector<14x288xbf16>
    %c0_12 = arith.constant 0 : index
    %c2_13 = arith.constant 2 : index
    %c0_14 = arith.constant 0 : index
    %10 = vector.load %arg2[%c0_12, %c2_13, %c0_14] : memref<2x9x288xbf16, #tpu.memory_space<vmem>>, vector<2x7x288xbf16>
    %11 = vector.shape_cast %10 : vector<2x7x288xbf16> to vector<14x288xbf16>
    %c0_15 = arith.constant 0 : index
    %c0_16 = arith.constant 0 : index
    %c0_17 = arith.constant 0 : index
    %12 = vector.load %arg3[%c0_15, %c0_16, %c0_17] : memref<10x288x224xbf16, #tpu.memory_space<vmem>>, vector<1x288x224xbf16>
    %13 = vector.shape_cast %12 : vector<1x288x224xbf16> to vector<288x224xbf16>
    %cst = arith.constant dense<0.000000e+00> : vector<14x224xf32>
    %14 = tpu.matmul %1, %13, %cst {dimension_numbers = #tpu.dot_dimension_numbers<[1], [0], [0], [1], [0, 0, 1, 1], [], []>} : vector<14x288xbf16>, vector<288x224xbf16>, vector<14x224xf32> -> vector<14x224xf32>
    %c1_18 = arith.constant 1 : index
    %c0_19 = arith.constant 0 : index
    %c0_20 = arith.constant 0 : index
    %15 = vector.load %arg3[%c1_18, %c0_19, %c0_20] : memref<10x288x224xbf16, #tpu.memory_space<vmem>>, vector<1x288x224xbf16>
    %16 = vector.shape_cast %15 : vector<1x288x224xbf16> to vector<288x224xbf16>
    %cst_21 = arith.constant dense<0.000000e+00> : vector<14x224xf32>
    %17 = tpu.matmul %3, %16, %cst_21 {dimension_numbers = #tpu.dot_dimension_numbers<[1], [0], [0], [1], [0, 0, 1, 1], [], []>} : vector<14x288xbf16>, vector<288x224xbf16>, vector<14x224xf32> -> vector<14x224xf32>
    %18 = arith.addf %14, %17 : vector<14x224xf32>
    %c2_22 = arith.constant 2 : index
    %c0_23 = arith.constant 0 : index
    %c0_24 = arith.constant 0 : index
    %19 = vector.load %arg3[%c2_22, %c0_23, %c0_24] : memref<10x288x224xbf16, #tpu.memory_space<vmem>>, vector<1x288x224xbf16>
    %20 = vector.shape_cast %19 : vector<1x288x224xbf16> to vector<288x224xbf16>
    %cst_25 = arith.constant dense<0.000000e+00> : vector<14x224xf32>
    %21 = tpu.matmul %5, %20, %cst_25 {dimension_numbers = #tpu.dot_dimension_numbers<[1], [0], [0], [1], [0, 0, 1, 1], [], []>} : vector<14x288xbf16>, vector<288x224xbf16>, vector<14x224xf32> -> vector<14x224xf32>
    %22 = arith.addf %18, %21 : vector<14x224xf32>
    %c3 = arith.constant 3 : index
    %c0_26 = arith.constant 0 : index
    %c0_27 = arith.constant 0 : index
    %23 = vector.load %arg3[%c3, %c0_26, %c0_27] : memref<10x288x224xbf16, #tpu.memory_space<vmem>>, vector<1x288x224xbf16>
    %24 = vector.shape_cast %23 : vector<1x288x224xbf16> to vector<288x224xbf16>
    %cst_28 = arith.constant dense<0.000000e+00> : vector<14x224xf32>
    %25 = tpu.matmul %7, %24, %cst_28 {dimension_numbers = #tpu.dot_dimension_numbers<[1], [0], [0], [1], [0, 0, 1, 1], [], []>} : vector<14x288xbf16>, vector<288x224xbf16>, vector<14x224xf32> -> vector<14x224xf32>
    %26 = arith.addf %22, %25 : vector<14x224xf32>
    %c4 = arith.constant 4 : index
    %c0_29 = arith.constant 0 : index
    %c0_30 = arith.constant 0 : index
    %27 = vector.load %arg3[%c4, %c0_29, %c0_30] : memref<10x288x224xbf16, #tpu.memory_space<vmem>>, vector<1x288x224xbf16>
    %28 = vector.shape_cast %27 : vector<1x288x224xbf16> to vector<288x224xbf16>
    %cst_31 = arith.constant dense<0.000000e+00> : vector<14x224xf32>
    %29 = tpu.matmul %9, %28, %cst_31 {dimension_numbers = #tpu.dot_dimension_numbers<[1], [0], [0], [1], [0, 0, 1, 1], [], []>} : vector<14x288xbf16>, vector<288x224xbf16>, vector<14x224xf32> -> vector<14x224xf32>
    %30 = arith.addf %26, %29 : vector<14x224xf32>
    %c5 = arith.constant 5 : index
    %c0_32 = arith.constant 0 : index
    %c0_33 = arith.constant 0 : index
    %31 = vector.load %arg3[%c5, %c0_32, %c0_33] : memref<10x288x224xbf16, #tpu.memory_space<vmem>>, vector<1x288x224xbf16>
    %32 = vector.shape_cast %31 : vector<1x288x224xbf16> to vector<288x224xbf16>
    %cst_34 = arith.constant dense<0.000000e+00> : vector<14x224xf32>
    %33 = tpu.matmul %1, %32, %cst_34 {dimension_numbers = #tpu.dot_dimension_numbers<[1], [0], [0], [1], [0, 0, 1, 1], [], []>} : vector<14x288xbf16>, vector<288x224xbf16>, vector<14x224xf32> -> vector<14x224xf32>
    %c6 = arith.constant 6 : index
    %c0_35 = arith.constant 0 : index
    %c0_36 = arith.constant 0 : index
    %34 = vector.load %arg3[%c6, %c0_35, %c0_36] : memref<10x288x224xbf16, #tpu.memory_space<vmem>>, vector<1x288x224xbf16>
    %35 = vector.shape_cast %34 : vector<1x288x224xbf16> to vector<288x224xbf16>
    %cst_37 = arith.constant dense<0.000000e+00> : vector<14x224xf32>
    %36 = tpu.matmul %3, %35, %cst_37 {dimension_numbers = #tpu.dot_dimension_numbers<[1], [0], [0], [1], [0, 0, 1, 1], [], []>} : vector<14x288xbf16>, vector<288x224xbf16>, vector<14x224xf32> -> vector<14x224xf32>
    %37 = arith.addf %33, %36 : vector<14x224xf32>
    %c7 = arith.constant 7 : index
    %c0_38 = arith.constant 0 : index
    %c0_39 = arith.constant 0 : index
    %38 = vector.load %arg3[%c7, %c0_38, %c0_39] : memref<10x288x224xbf16, #tpu.memory_space<vmem>>, vector<1x288x224xbf16>
    %39 = vector.shape_cast %38 : vector<1x288x224xbf16> to vector<288x224xbf16>
    %cst_40 = arith.constant dense<0.000000e+00> : vector<14x224xf32>
    %40 = tpu.matmul %5, %39, %cst_40 {dimension_numbers = #tpu.dot_dimension_numbers<[1], [0], [0], [1], [0, 0, 1, 1], [], []>} : vector<14x288xbf16>, vector<288x224xbf16>, vector<14x224xf32> -> vector<14x224xf32>
    %41 = arith.addf %37, %40 : vector<14x224xf32>
    %c8 = arith.constant 8 : index
    %c0_41 = arith.constant 0 : index
    %c0_42 = arith.constant 0 : index
    %42 = vector.load %arg3[%c8, %c0_41, %c0_42] : memref<10x288x224xbf16, #tpu.memory_space<vmem>>, vector<1x288x224xbf16>
    %43 = vector.shape_cast %42 : vector<1x288x224xbf16> to vector<288x224xbf16>
    %cst_43 = arith.constant dense<0.000000e+00> : vector<14x224xf32>
    %44 = tpu.matmul %7, %43, %cst_43 {dimension_numbers = #tpu.dot_dimension_numbers<[1], [0], [0], [1], [0, 0, 1, 1], [], []>} : vector<14x288xbf16>, vector<288x224xbf16>, vector<14x224xf32> -> vector<14x224xf32>
    %45 = arith.addf %41, %44 : vector<14x224xf32>
    %c9 = arith.constant 9 : index
    %c0_44 = arith.constant 0 : index
    %c0_45 = arith.constant 0 : index
    %46 = vector.load %arg3[%c9, %c0_44, %c0_45] : memref<10x288x224xbf16, #tpu.memory_space<vmem>>, vector<1x288x224xbf16>
    %47 = vector.shape_cast %46 : vector<1x288x224xbf16> to vector<288x224xbf16>
    %cst_46 = arith.constant dense<0.000000e+00> : vector<14x224xf32>
    %48 = tpu.matmul %9, %47, %cst_46 {dimension_numbers = #tpu.dot_dimension_numbers<[1], [0], [0], [1], [0, 0, 1, 1], [], []>} : vector<14x288xbf16>, vector<288x224xbf16>, vector<14x224xf32> -> vector<14x224xf32>
    %49 = arith.addf %45, %48 : vector<14x224xf32>
    %50 = arith.maximumf %30, %49 : vector<14x224xf32>
    %c0_47 = arith.constant 0 : index
    %c0_48 = arith.constant 0 : index
    %c0_49 = arith.constant 0 : index
    %51 = vector.load %arg3[%c0_47, %c0_48, %c0_49] : memref<10x288x224xbf16, #tpu.memory_space<vmem>>, vector<1x288x224xbf16>
    %52 = vector.shape_cast %51 : vector<1x288x224xbf16> to vector<288x224xbf16>
    %cst_50 = arith.constant dense<0.000000e+00> : vector<14x224xf32>
    %53 = tpu.matmul %3, %52, %cst_50 {dimension_numbers = #tpu.dot_dimension_numbers<[1], [0], [0], [1], [0, 0, 1, 1], [], []>} : vector<14x288xbf16>, vector<288x224xbf16>, vector<14x224xf32> -> vector<14x224xf32>
    %c1_51 = arith.constant 1 : index
    %c0_52 = arith.constant 0 : index
    %c0_53 = arith.constant 0 : index
    %54 = vector.load %arg3[%c1_51, %c0_52, %c0_53] : memref<10x288x224xbf16, #tpu.memory_space<vmem>>, vector<1x288x224xbf16>
    %55 = vector.shape_cast %54 : vector<1x288x224xbf16> to vector<288x224xbf16>
    %cst_54 = arith.constant dense<0.000000e+00> : vector<14x224xf32>
    %56 = tpu.matmul %5, %55, %cst_54 {dimension_numbers = #tpu.dot_dimension_numbers<[1], [0], [0], [1], [0, 0, 1, 1], [], []>} : vector<14x288xbf16>, vector<288x224xbf16>, vector<14x224xf32> -> vector<14x224xf32>
    %57 = arith.addf %53, %56 : vector<14x224xf32>
    %c2_55 = arith.constant 2 : index
    %c0_56 = arith.constant 0 : index
    %c0_57 = arith.constant 0 : index
    %58 = vector.load %arg3[%c2_55, %c0_56, %c0_57] : memref<10x288x224xbf16, #tpu.memory_space<vmem>>, vector<1x288x224xbf16>
    %59 = vector.shape_cast %58 : vector<1x288x224xbf16> to vector<288x224xbf16>
    %cst_58 = arith.constant dense<0.000000e+00> : vector<14x224xf32>
    %60 = tpu.matmul %7, %59, %cst_58 {dimension_numbers = #tpu.dot_dimension_numbers<[1], [0], [0], [1], [0, 0, 1, 1], [], []>} : vector<14x288xbf16>, vector<288x224xbf16>, vector<14x224xf32> -> vector<14x224xf32>
    %61 = arith.addf %57, %60 : vector<14x224xf32>
    %c3_59 = arith.constant 3 : index
    %c0_60 = arith.constant 0 : index
    %c0_61 = arith.constant 0 : index
    %62 = vector.load %arg3[%c3_59, %c0_60, %c0_61] : memref<10x288x224xbf16, #tpu.memory_space<vmem>>, vector<1x288x224xbf16>
    %63 = vector.shape_cast %62 : vector<1x288x224xbf16> to vector<288x224xbf16>
    %cst_62 = arith.constant dense<0.000000e+00> : vector<14x224xf32>
    %64 = tpu.matmul %9, %63, %cst_62 {dimension_numbers = #tpu.dot_dimension_numbers<[1], [0], [0], [1], [0, 0, 1, 1], [], []>} : vector<14x288xbf16>, vector<288x224xbf16>, vector<14x224xf32> -> vector<14x224xf32>
    %65 = arith.addf %61, %64 : vector<14x224xf32>
    %c4_63 = arith.constant 4 : index
    %c0_64 = arith.constant 0 : index
    %c0_65 = arith.constant 0 : index
    %66 = vector.load %arg3[%c4_63, %c0_64, %c0_65] : memref<10x288x224xbf16, #tpu.memory_space<vmem>>, vector<1x288x224xbf16>
    %67 = vector.shape_cast %66 : vector<1x288x224xbf16> to vector<288x224xbf16>
    %cst_66 = arith.constant dense<0.000000e+00> : vector<14x224xf32>
    %68 = tpu.matmul %11, %67, %cst_66 {dimension_numbers = #tpu.dot_dimension_numbers<[1], [0], [0], [1], [0, 0, 1, 1], [], []>} : vector<14x288xbf16>, vector<288x224xbf16>, vector<14x224xf32> -> vector<14x224xf32>
    %69 = arith.addf %65, %68 : vector<14x224xf32>
    %70 = arith.maximumf %50, %69 : vector<14x224xf32>
    %c5_67 = arith.constant 5 : index
    %c0_68 = arith.constant 0 : index
    %c0_69 = arith.constant 0 : index
    %71 = vector.load %arg3[%c5_67, %c0_68, %c0_69] : memref<10x288x224xbf16, #tpu.memory_space<vmem>>, vector<1x288x224xbf16>
    %72 = vector.shape_cast %71 : vector<1x288x224xbf16> to vector<288x224xbf16>
    %cst_70 = arith.constant dense<0.000000e+00> : vector<14x224xf32>
    %73 = tpu.matmul %3, %72, %cst_70 {dimension_numbers = #tpu.dot_dimension_numbers<[1], [0], [0], [1], [0, 0, 1, 1], [], []>} : vector<14x288xbf16>, vector<288x224xbf16>, vector<14x224xf32> -> vector<14x224xf32>
    %c6_71 = arith.constant 6 : index
    %c0_72 = arith.constant 0 : index
    %c0_73 = arith.constant 0 : index
    %74 = vector.load %arg3[%c6_71, %c0_72, %c0_73] : memref<10x288x224xbf16, #tpu.memory_space<vmem>>, vector<1x288x224xbf16>
    %75 = vector.shape_cast %74 : vector<1x288x224xbf16> to vector<288x224xbf16>
    %cst_74 = arith.constant dense<0.000000e+00> : vector<14x224xf32>
    %76 = tpu.matmul %5, %75, %cst_74 {dimension_numbers = #tpu.dot_dimension_numbers<[1], [0], [0], [1], [0, 0, 1, 1], [], []>} : vector<14x288xbf16>, vector<288x224xbf16>, vector<14x224xf32> -> vector<14x224xf32>
    %77 = arith.addf %73, %76 : vector<14x224xf32>
    %c7_75 = arith.constant 7 : index
    %c0_76 = arith.constant 0 : index
    %c0_77 = arith.constant 0 : index
    %78 = vector.load %arg3[%c7_75, %c0_76, %c0_77] : memref<10x288x224xbf16, #tpu.memory_space<vmem>>, vector<1x288x224xbf16>
    %79 = vector.shape_cast %78 : vector<1x288x224xbf16> to vector<288x224xbf16>
    %cst_78 = arith.constant dense<0.000000e+00> : vector<14x224xf32>
    %80 = tpu.matmul %7, %79, %cst_78 {dimension_numbers = #tpu.dot_dimension_numbers<[1], [0], [0], [1], [0, 0, 1, 1], [], []>} : vector<14x288xbf16>, vector<288x224xbf16>, vector<14x224xf32> -> vector<14x224xf32>
    %81 = arith.addf %77, %80 : vector<14x224xf32>
    %c8_79 = arith.constant 8 : index
    %c0_80 = arith.constant 0 : index
    %c0_81 = arith.constant 0 : index
    %82 = vector.load %arg3[%c8_79, %c0_80, %c0_81] : memref<10x288x224xbf16, #tpu.memory_space<vmem>>, vector<1x288x224xbf16>
    %83 = vector.shape_cast %82 : vector<1x288x224xbf16> to vector<288x224xbf16>
    %cst_82 = arith.constant dense<0.000000e+00> : vector<14x224xf32>
    %84 = tpu.matmul %9, %83, %cst_82 {dimension_numbers = #tpu.dot_dimension_numbers<[1], [0], [0], [1], [0, 0, 1, 1], [], []>} : vector<14x288xbf16>, vector<288x224xbf16>, vector<14x224xf32> -> vector<14x224xf32>
    %85 = arith.addf %81, %84 : vector<14x224xf32>
    %c9_83 = arith.constant 9 : index
    %c0_84 = arith.constant 0 : index
    %c0_85 = arith.constant 0 : index
    %86 = vector.load %arg3[%c9_83, %c0_84, %c0_85] : memref<10x288x224xbf16, #tpu.memory_space<vmem>>, vector<1x288x224xbf16>
    %87 = vector.shape_cast %86 : vector<1x288x224xbf16> to vector<288x224xbf16>
    %cst_86 = arith.constant dense<0.000000e+00> : vector<14x224xf32>
    %88 = tpu.matmul %11, %87, %cst_86 {dimension_numbers = #tpu.dot_dimension_numbers<[1], [0], [0], [1], [0, 0, 1, 1], [], []>} : vector<14x288xbf16>, vector<288x224xbf16>, vector<14x224xf32> -> vector<14x224xf32>
    %89 = arith.addf %85, %88 : vector<14x224xf32>
    %90 = arith.maximumf %70, %89 : vector<14x224xf32>
    %c0_87 = arith.constant 0 : index
    %c0_88 = arith.constant 0 : index
    %91 = vector.load %arg4[%c0_87, %c0_88] : memref<1x224xf32, #tpu.memory_space<vmem>>, vector<1x224xf32>
    %92 = vector.broadcast %91 : vector<1x224xf32> to vector<14x224xf32>
    %93 = arith.addf %90, %92 : vector<14x224xf32>
    %cst_89 = arith.constant 0.000000e+00 : f32
    %94 = vector.broadcast %cst_89 : f32 to vector<14x224xf32>
    %95 = arith.maximumf %93, %94 : vector<14x224xf32>
    %c0_90 = arith.constant 0 : index
    %c0_91 = arith.constant 0 : index
    %96 = vector.load %arg5[%c0_90, %c0_91] : memref<14x224xf32, #tpu.memory_space<vmem>>, vector<14x224xf32>
    tpu.vector_store %arg5[%c0_90, %c0_91], %95 {strides = array<i32>} : memref<14x224xf32, #tpu.memory_space<vmem>>, vector<14x224xf32>,
    return
  }
  func.func @transform_0(%arg0: i32) -> (i32, i32, i32) {
    %c0_i32 = arith.constant 0 : i32
    %c0_i32_0 = arith.constant 0 : i32
    %c0_i32_1 = arith.constant 0 : i32
    return %arg0, %c0_i32, %c0_i32_0 : i32, i32, i32
  }
  func.func @transform_1(%arg0: i32) -> (i32, i32, i32) {
    %c0_i32 = arith.constant 0 : i32
    %c0_i32_0 = arith.constant 0 : i32
    %c0_i32_1 = arith.constant 0 : i32
    return %arg0, %c0_i32, %c0_i32_0 : i32, i32, i32
  }
  func.func @transform_2(%arg0: i32) -> (i32, i32, i32) {
    %c0_i32 = arith.constant 0 : i32
    %c0_i32_0 = arith.constant 0 : i32
    %c0_i32_1 = arith.constant 0 : i32
    %c0_i32_2 = arith.constant 0 : i32
    return %c0_i32, %c0_i32_0, %c0_i32_1 : i32, i32, i32
  }
  func.func @transform_3(%arg0: i32) -> (i32, i32) {
    %c0_i32 = arith.constant 0 : i32
    %c0_i32_0 = arith.constant 0 : i32
    %c0_i32_1 = arith.constant 0 : i32
    return %c0_i32, %c0_i32_0 : i32, i32
  }
  func.func @transform_4(%arg0: i32) -> (i32, i32) {
    %c0_i32 = arith.constant 0 : i32
    %c0_i32_0 = arith.constant 0 : i32
    return %arg0, %c0_i32 : i32, i32
  }
}

module attributes {stable_mosaic.version = 11 : i64} {
  func.func @_linear_kernel(%arg0: i32, %arg1: memref<2x1568xf32, #tpu.memory_space<vmem>>, %arg2: memref<1568x128xbf16, #tpu.memory_space<vmem>>, %arg3: memref<1x128xf32, #tpu.memory_space<vmem>>, %arg4: memref<2x128xf32, #tpu.memory_space<vmem>>) attributes {dimension_semantics = [#tpu.dimension_semantics<parallel>], iteration_bounds = array<i64: 1>, scalar_prefetch = 0 : i64, scratch_operands = 0 : i64, tpu.core_type = #tpu.core_type<tc>, window_params = [{transform_indices = @transform_0, window_bounds = array<i64: 2, 1568>}, {pipeline_mode = #tpu.pipeline_mode<synchronous>, transform_indices = @transform_1, window_bounds = array<i64: 1568, 128>}, {pipeline_mode = #tpu.pipeline_mode<synchronous>, transform_indices = @transform_2, window_bounds = array<i64: 1, 128>}, {transform_indices = @transform_3, window_bounds = array<i64: 2, 128>}]} {
    %c0 = arith.constant 0 : index
    %c0_0 = arith.constant 0 : index
    %0 = vector.load %arg1[%c0, %c0_0] : memref<2x1568xf32, #tpu.memory_space<vmem>>, vector<2x1568xf32>
    %1 = arith.truncf %0 : vector<2x1568xf32> to vector<2x1568xbf16>
    %c0_1 = arith.constant 0 : index
    %c0_2 = arith.constant 0 : index
    %2 = vector.load %arg2[%c0_1, %c0_2] : memref<1568x128xbf16, #tpu.memory_space<vmem>>, vector<1568x128xbf16>
    %cst = arith.constant dense<0.000000e+00> : vector<2x128xf32>
    %3 = tpu.matmul %1, %2, %cst {dimension_numbers = #tpu.dot_dimension_numbers<[1], [0], [0], [1], [0, 0, 1, 1], [], []>} : vector<2x1568xbf16>, vector<1568x128xbf16>, vector<2x128xf32> -> vector<2x128xf32>
    %c0_3 = arith.constant 0 : index
    %c0_4 = arith.constant 0 : index
    %4 = vector.load %arg3[%c0_3, %c0_4] : memref<1x128xf32, #tpu.memory_space<vmem>>, vector<1x128xf32>
    %5 = vector.broadcast %4 : vector<1x128xf32> to vector<2x128xf32>
    %6 = arith.addf %3, %5 : vector<2x128xf32>
    %c0_5 = arith.constant 0 : index
    %c0_6 = arith.constant 0 : index
    %7 = vector.load %arg4[%c0_5, %c0_6] : memref<2x128xf32, #tpu.memory_space<vmem>>, vector<2x128xf32>
    tpu.vector_store %arg4[%c0_5, %c0_6], %6 {strides = array<i32>} : memref<2x128xf32, #tpu.memory_space<vmem>>, vector<2x128xf32>,
    return
  }
  func.func @transform_0(%arg0: i32) -> (i32, i32) {
    %c0_i32 = arith.constant 0 : i32
    %c0_i32_0 = arith.constant 0 : i32
    return %arg0, %c0_i32 : i32, i32
  }
  func.func @transform_1(%arg0: i32) -> (i32, i32) {
    %c0_i32 = arith.constant 0 : i32
    %c0_i32_0 = arith.constant 0 : i32
    %c0_i32_1 = arith.constant 0 : i32
    return %c0_i32, %c0_i32_0 : i32, i32
  }
  func.func @transform_2(%arg0: i32) -> (i32, i32) {
    %c0_i32 = arith.constant 0 : i32
    %c0_i32_0 = arith.constant 0 : i32
    %c0_i32_1 = arith.constant 0 : i32
    return %c0_i32, %c0_i32_0 : i32, i32
  }
  func.func @transform_3(%arg0: i32) -> (i32, i32) {
    %c0_i32 = arith.constant 0 : i32
    %c0_i32_0 = arith.constant 0 : i32
    return %arg0, %c0_i32 : i32, i32
  }
}

</mosaic_0001>

<bundles_post_ra>
// kernel: cnn_forward.5
= control target key start
LH: loop header
LB: loop body
LE: loop exit
PB: predicated region body
PF: predicated region fallthrough
CT: control target
= control target key end

     0   :  { %v28_v28 = vlaneseq  ;;  %v1571_v36 = vmov 1983009808   ;;  %s1924_s0 = inlined_call_operand.vmem [shape: f32[2,1568], index: 0, kind: input, shape index: {}]   ;;  %s1925_s1 = inlined_call_operand.vmem [shape: bf16[1568,128], index: 1, kind: input, shape index: {}]   ;;  %s1926_s2 = inlined_call_operand.vmem [shape: f32[1,128], index: 2, kind: input, shape index: {}]   ;;  %s1927_s3 = inlined_call_operand.hbm [shape: f32[2,128], index: 3, kind: output, shape index: {}]  }
   0x1   :  { %v1446_v0 = vld [vmem:[%s1925_s1 + $0x40] sm:$0xff]   ;;  %v1450_v4 = vld [vmem:[%s1925_s1 + $0x48] sm:$0xff]   ;;  %v1454_v8 = vld [vmem:[%s1925_s1 + $0x50] sm:$0xff]   ;;  %v26_v37 = vunpack.c.l.s4 %v1571_v36 }
   0x2   :  { %v1447_v1 = vld [vmem:[%s1925_s1] sm:$0xff]   ;;  %1299 = vmatprep.subr.bf16.mxu0 %v1446_v0  ;;  %v1451_v5 = vld [vmem:[%s1925_s1 + $0x8] sm:$0xff]   ;;  %v1455_v9 = vld [vmem:[%s1925_s1 + $0x10] sm:$0xff]   ;;  %v29_v33 = vshrl.u32 %v28_v28, 7 }
   0x3   :  { %v1448_v2 = vld [vmem:[%s1925_s1 + $0xc0] sm:$0xff]   ;;  %1300 = vmatpush3.bf16.msra.mxu0 %v1447_v1  ;;  %v1452_v6 = vld [vmem:[%s1925_s1 + $0xc8] sm:$0xff]   ;;  %v1456_v10 = vld [vmem:[%s1925_s1 + $0xd0] sm:$0xff]   ;;  %v27_v38 = vunpack.c.0.s8 %v26_v37 }
   0x4   :  { %v1449_v3 = vld [vmem:[%s1925_s1 + $0x80] sm:$0xff]   ;;  %1321 = vmatprep.subr.bf16.mxu1 %v1448_v2  ;;  %1301 = vmatprep.subr.bf16.mxu0 %v1450_v4  ;;  %v1453_v7 = vld [vmem:[%s1925_s1 + $0x88] sm:$0xff]   ;;  %v1457_v11 = vld [vmem:[%s1925_s1 + $0x90] sm:$0xff]  }
   0x5   :  { %1322 = vmatpush3.bf16.msra.mxu1 %v1449_v3  ;;  %v1458_v12 = vld [vmem:[%s1925_s1 + $0x58] sm:$0xff]   ;;  %v1462_v16 = vld [vmem:[%s1925_s1 + $0x60] sm:$0xff]   ;;  %v1466_v20 = vld [vmem:[%s1925_s1 + $0x68] sm:$0xff]   ;;  %v1700_v41 = vsub.s32 %v27_v38, %v29_v33 }
   0x6   :  { %1323 = vmatprep.subr.bf16.mxu1 %v1452_v6  ;;  %v1459_v13 = vld [vmem:[%s1925_s1 + $0x18] sm:$0xff]   ;;  %v1463_v17 = vld [vmem:[%s1925_s1 + $0x20] sm:$0xff]   ;;  %v1467_v21 = vld [vmem:[%s1925_s1 + $0x28] sm:$0xff]  }
   0x7   :  { %1302 = vmatpush3.bf16.msra.mxu0 %v1451_v5  ;;  %v1460_v14 = vld [vmem:[%s1925_s1 + $0xd8] sm:$0xff]   ;;  %v1464_v18 = vld [vmem:[%s1925_s1 + $0xe0] sm:$0xff]   ;;  %v1468_v22 = vld [vmem:[%s1925_s1 + $0xe8] sm:$0xff]  }
   0x8   :  { %1303 = vmatprep.subr.bf16.mxu0 %v1454_v8  ;;  %v1461_v15 = vld [vmem:[%s1925_s1 + $0x98] sm:$0xff]   ;;  %v1465_v19 = vld [vmem:[%s1925_s1 + $0xa0] sm:$0xff]   ;;  %v1469_v23 = vld [vmem:[%s1925_s1 + $0xa8] sm:$0xff]  }
   0x9   :  { %1324 = vmatpush3.bf16.msra.mxu1 %v1453_v7  ;;  %v1470_v24 = vld [vmem:[%s1925_s1 + $0x70] sm:$0xff]   ;;  %v1474_v29 = vld [vmem:[%s1925_s1 + $0x78] sm:$0xff]   ;;  %v16_v34 = vld [vmem:[%s1924_s0] sm:$0xff] }
   0xa   :  { %1325 = vmatprep.subr.bf16.mxu1 %v1456_v10  ;;  %v1471_v25 = vld [vmem:[%s1925_s1 + $0x30] sm:$0xff]   ;;  %v1475_v30 = vld [vmem:[%s1925_s1 + $0x38] sm:$0xff]   ;;  %v1478_v35 = vld [vmem:[%s1925_s1 + $0x140] sm:$0xff]   ;;  %v24_v39 = vcombine.high %v16_v34, %v16_v34  ;;  %v31_v42 = vrot.slane %v16_v34, %v1700_v41 }
   0xb   :  { %1304 = vmatpush3.bf16.msra.mxu0 %v1455_v9  ;;  %v1472_v26 = vld [vmem:[%s1925_s1 + $0xf0] sm:$0xff]   ;;  %v1476_v31 = vld [vmem:[%s1925_s1 + $0xf8] sm:$0xff]   ;;  %v1481_v40 = vld [vmem:[%s1925_s1 + $0x1c0] sm:$0xff]  }
   0xc   :  { %1305 = vmatprep.subr.bf16.mxu0 %v1458_v12  ;;  %v1473_v27 = vld [vmem:[%s1925_s1 + $0xb0] sm:$0xff]   ;;  %v1477_v32 = vld [vmem:[%s1925_s1 + $0xb8] sm:$0xff]   ;;  %v38_v43 = vrot.slane %v24_v39, %v1700_v41  ;;  %v39_v44 = vcombine.high %v31_v42, %v31_v42  ;;  %v1480_v46 = vld [vmem:[%s1925_s1 + $0x100] sm:$0xff]   ;;  %v95_v47 = vpack.c.bf16 %v31_v42, %v31_v42 }
   0xd   :  { %1326 = vmatpush3.bf16.msra.mxu1 %v1457_v11  ;;  %v1482_v49 = vld [vmem:[%s1925_s1 + $0x180] sm:$0xff]   ;;  %v1483_v52 = vld [vmem:[%s1925_s1 + $0x148] sm:$0xff]   ;;  %v1487_v56 = vld [vmem:[%s1925_s1 + $0x150] sm:$0xff]  }
   0xe   :  { %1327 = vmatprep.subr.bf16.mxu1 %v1460_v14  ;;  %v40_v45 = vcombine.high %v38_v43, %v38_v43  ;;  %v97_v48 = vpack.c.bf16 %v38_v43, %v38_v43  ;;  %v96_v50 = vpack.c.bf16 %v39_v44, %v39_v44  ;;  %v1485_v53 = vld [vmem:[%s1925_s1 + $0x1c8] sm:$0xff]   ;;  %v1489_v57 = vld [vmem:[%s1925_s1 + $0x1d0] sm:$0xff]   ;;  %v1491_v60 = vld [vmem:[%s1925_s1 + $0x158] sm:$0xff]  }
   0xf   :  { %1306 = vmatpush3.bf16.msra.mxu0 %v1459_v13  ;;  %v1484_v54 = vld [vmem:[%s1925_s1 + $0x108] sm:$0xff]   ;;  %v1488_v58 = vld [vmem:[%s1925_s1 + $0x110] sm:$0xff]   ;;  %v1493_v61 = vld [vmem:[%s1925_s1 + $0x1d8] sm:$0xff]  }
  0x10   :  { %1307 = vmatprep.subr.bf16.mxu0 %v1462_v16  ;;  %v98_v51 = vpack.c.bf16 %v40_v45, %v40_v45  ;;  %935 = vmatprep.mubr.bf16.mxu0 %v96_v50  ;;  %v1486_v55 = vld [vmem:[%s1925_s1 + $0x188] sm:$0xff]   ;;  %v1490_v59 = vld [vmem:[%s1925_s1 + $0x190] sm:$0xff]   ;;  %v1492_v62 = vld [vmem:[%s1925_s1 + $0x118] sm:$0xff]  }
  0x11   :  { %1328 = vmatpush3.bf16.msra.mxu1 %v1461_v15  ;;  %v1494_v63 = vld [vmem:[%s1925_s1 + $0x198] sm:$0xff]   ;;  %v1495_v0 = vld [vmem:[%s1925_s1 + $0x160] sm:$0xff]   ;;  %v1499_v4 = vld [vmem:[%s1925_s1 + $0x168] sm:$0xff]  }
  0x12   :  { %1329 = vmatprep.subr.bf16.mxu1 %v1464_v18  ;;  %975 = vmatprep.mubr.bf16.mxu1 %v98_v51  ;;  %v1497_v1 = vld [vmem:[%s1925_s1 + $0x1e0] sm:$0xff]   ;;  %v1501_v5 = vld [vmem:[%s1925_s1 + $0x1e8] sm:$0xff]   ;;  %v1503_v8 = vld [vmem:[%s1925_s1 + $0x170] sm:$0xff]  }
  0x13   :  { %1308 = vmatpush3.bf16.msra.mxu0 %v1463_v17  ;;  %v1496_v2 = vld [vmem:[%s1925_s1 + $0x120] sm:$0xff]   ;;  %v1500_v6 = vld [vmem:[%s1925_s1 + $0x128] sm:$0xff]   ;;  %v1505_v9 = vld [vmem:[%s1925_s1 + $0x1f0] sm:$0xff]  }
  0x14   :  { %1309 = vmatprep.subr.bf16.mxu0 %v1466_v20  ;;  %v1498_v3 = vld [vmem:[%s1925_s1 + $0x1a0] sm:$0xff]   ;;  %v1502_v7 = vld [vmem:[%s1925_s1 + $0x1a8] sm:$0xff]   ;;  %v1504_v11 = vld [vmem:[%s1925_s1 + $0x130] sm:$0xff]  }
  0x15   :  { %1330 = vmatpush3.bf16.msra.mxu1 %v1465_v19  ;;  %v17_v10 = vld [vmem:[%s1924_s0 + $0x8] sm:$0xff]  ;;  %v1506_v14 = vld [vmem:[%s1925_s1 + $0x1b0] sm:$0xff]   ;;  %v1507_v15 = vld [vmem:[%s1925_s1 + $0x178] sm:$0xff]  }
  0x16   :  { %1331 = vmatprep.subr.bf16.mxu1 %v1468_v22  ;;  %v48_v12 = vrot.slane %v17_v10, %v1700_v41  ;;  %v41_v13 = vcombine.high %v17_v10, %v17_v10  ;;  %v1509_v18 = vld [vmem:[%s1925_s1 + $0x1f8] sm:$0xff]   ;;  %v1519_v33 = vld [vmem:[%s1925_s1 + $0x288] sm:$0xff]   ;;  %v1520_v34 = vld [vmem:[%s1925_s1 + $0x250] sm:$0xff]  }
  0x17   :  { %1310 = vmatpush3.bf16.msra.mxu0 %v1467_v21  ;;  %v1508_v19 = vld [vmem:[%s1925_s1 + $0x138] sm:$0xff]   ;;  %v1521_v36 = vld [vmem:[%s1925_s1 + $0x210] sm:$0xff]   ;;  %v1528_v43 = vld [vmem:[%s1925_s1 + $0x260] sm:$0xff]  }
  0x18   :  { %1311 = vmatprep.subr.bf16.mxu0 %v1470_v24  ;;  %v56_v16 = vcombine.high %v48_v12, %v48_v12  ;;  %v55_v17 = vrot.slane %v41_v13, %v1700_v41  ;;  %v1510_v22 = vld [vmem:[%s1925_s1 + $0x1b8] sm:$0xff]   ;;  %v1523_v37 = vld [vmem:[%s1925_s1 + $0x290] sm:$0xff]   ;;  %v1530_v44 = vld [vmem:[%s1925_s1 + $0x2e0] sm:$0xff]  }
  0x19   :  { %1332 = vmatpush3.bf16.msra.mxu1 %v1469_v23  ;;  %v1511_v23 = vld [vmem:[%s1925_s1 + $0x240] sm:$0xff]   ;;  %v1524_v38 = vld [vmem:[%s1925_s1 + $0x258] sm:$0xff]   ;;  %v1535_v50 = vld [vmem:[%s1925_s1 + $0x2a8] sm:$0xff]  }
  0x1a   :  { %1333 = vmatprep.subr.bf16.mxu1 %v1472_v26  ;;  %v100_v20 = vpack.c.bf16 %v56_v16, %v56_v16  ;;  %v57_v21 = vcombine.high %v55_v17, %v55_v17  ;;  %v1513_v26 = vld [vmem:[%s1925_s1 + $0x200] sm:$0xff]   ;;  %v101_v28 = vpack.c.bf16 %v55_v17, %v55_v17  ;;  %v1526_v39 = vld [vmem:[%s1925_s1 + $0x2d8] sm:$0xff]   ;;  %v1536_v51 = vld [vmem:[%s1925_s1 + $0x270] sm:$0xff]  }
  0x1b   :  { %1312 = vmatpush3.bf16.msra.mxu0 %v1471_v25  ;;  %v1514_v25 = vld [vmem:[%s1925_s1 + $0x2c0] sm:$0xff]   ;;  %v1527_v42 = vld [vmem:[%s1925_s1 + $0x298] sm:$0xff]  }
  0x1c   :  { %1313 = vmatprep.subr.bf16.mxu0 %v1474_v29  ;;  %v102_v24 = vpack.c.bf16 %v57_v21, %v57_v21  ;;  %v1515_v29 = vld [vmem:[%s1925_s1 + $0x280] sm:$0xff]  }
  0x1d   :  { %1334 = vmatpush3.bf16.msra.mxu1 %v1473_v27  ;;  %v99_v27 = vpack.c.bf16 %v48_v12, %v48_v12  ;;  %v1529_v45 = vld [vmem:[%s1925_s1 + $0x220] sm:$0xff]  }
  0x1e   :  { %1335 = vmatprep.subr.bf16.mxu1 %v1476_v31  ;;  %v1518_v31 = vld [vmem:[%s1925_s1 + $0x2c8] sm:$0xff]  }
  0x1f   :  { %1314 = vmatpush3.bf16.msra.mxu0 %v1475_v30  ;;  %v1516_v30 = vld [vmem:[%s1925_s1 + $0x248] sm:$0xff]  }
  0x20   :  { %1343 = vmatprep.subr.bf16.mxu0 %v1478_v35  ;;  %v1522_v35 = vld [vmem:[%s1925_s1 + $0x2d0] sm:$0xff]  }
  0x21   :  { %1336 = vmatpush3.bf16.msra.mxu1 %v1477_v32  ;;  %v1517_v32 = vld [vmem:[%s1925_s1 + $0x208] sm:$0xff]  }
  0x22   :  { %1365 = vmatprep.subr.bf16.mxu1 %v1481_v40  ;;  %936 = vmatmul.mubr.bf16.vlgmr.msra.gmra.mrb[0].mxu0 %v95_v47  ;;  %v1525_v40 = vld [vmem:[%s1925_s1 + $0x218] sm:$0xff]   ;;  %v1532_v47 = vld [vmem:[%s1925_s1 + $0x268] sm:$0xff]  }
  0x23   :  { %1344 = vmatpush3.bf16.msra.mxu0 %v1480_v46  ;;  %1015 = vmatprep.mubr.bf16.mxu0 %v100_v20  ;;  %v1531_v46 = vld [vmem:[%s1925_s1 + $0x2a0] sm:$0xff]  }
  0x24   :  { %976 = vmatmul.mubr.bf16.vlgmr.msra.gmra.mrb[0].mxu1 %v97_v48  ;;  %1345 = vmatprep.subr.bf16.mxu0 %v1483_v52  ;;  %v1534_v48 = vld [vmem:[%s1925_s1 + $0x2e8] sm:$0xff]   ;;  %v1538_v52 = vld [vmem:[%s1925_s1 + $0x2f0] sm:$0xff]  }
  0x25   :  { %1366 = vmatpush3.bf16.msra.mxu1 %v1482_v49  ;;  %1055 = vmatprep.mubr.bf16.mxu1 %v102_v24  ;;  %v1533_v49 = vld [vmem:[%s1925_s1 + $0x228] sm:$0xff]  }
  0x26   :  { %1367 = vmatprep.subr.bf16.mxu1 %v1485_v53  ;;  %v18_v53 = vld [vmem:[%s1924_s0 + $0x10] sm:$0xff] }
  0x27   :  { %1346 = vmatpush3.bf16.msra.mxu0 %v1484_v54  ;;  %v65_v54 = vrot.slane %v18_v53, %v1700_v41 }
  0x28   :  { %1347 = vmatprep.subr.bf16.mxu0 %v1487_v56  ;;  %v1537_v56 = vld [vmem:[%s1925_s1 + $0x230] sm:$0xff]  }
  0x29   :  { %1368 = vmatpush3.bf16.msra.mxu1 %v1486_v55  ;;  %v58_v55 = vcombine.high %v18_v53, %v18_v53 }
  0x2a   :  { %1369 = vmatprep.subr.bf16.mxu1 %v1489_v57  ;;  %v1539_v57 = vld [vmem:[%s1925_s1 + $0x2b0] sm:$0xff]  }
  0x2b   :  { %1348 = vmatpush3.bf16.msra.mxu0 %v1488_v58  ;;  %v73_v58 = vcombine.high %v65_v54, %v65_v54 }
  0x2c   :  { %1349 = vmatprep.subr.bf16.mxu0 %v1491_v60 }
  0x2d   :  { %1370 = vmatpush3.bf16.msra.mxu1 %v1490_v59  ;;  %v72_v59 = vrot.slane %v58_v55, %v1700_v41 }
  0x2e   :  { %1371 = vmatprep.subr.bf16.mxu1 %v1493_v61 }
  0x2f   :  { %1350 = vmatpush3.bf16.msra.mxu0 %v1492_v62 }
  0x30   :  { %1351 = vmatprep.subr.bf16.mxu0 %v1495_v0 }
  0x31   :  { %1372 = vmatpush3.bf16.msra.mxu1 %v1494_v63 }
  0x32   :  { %1373 = vmatprep.subr.bf16.mxu1 %v1497_v1 }
  0x33   :  { %1352 = vmatpush3.bf16.msra.mxu0 %v1496_v2 }
  0x34   :  { %1353 = vmatprep.subr.bf16.mxu0 %v1499_v4 }
  0x35   :  { %1374 = vmatpush3.bf16.msra.mxu1 %v1498_v3 }
  0x36   :  { %1375 = vmatprep.subr.bf16.mxu1 %v1501_v5 }
  0x37   :  { %1354 = vmatpush3.bf16.msra.mxu0 %v1500_v6 }
  0x38   :  { %1355 = vmatprep.subr.bf16.mxu0 %v1503_v8 }
  0x39   :  { %1376 = vmatpush3.bf16.msra.mxu1 %v1502_v7 }
  0x3a   :  { %1377 = vmatprep.subr.bf16.mxu1 %v1505_v9 }
  0x3b   :  { %1356 = vmatpush3.bf16.msra.mxu0 %v1504_v11 }
  0x3c   :  { %1357 = vmatprep.subr.bf16.mxu0 %v1507_v15 }
  0x3d   :  { %1378 = vmatpush3.bf16.msra.mxu1 %v1506_v14 }
  0x3e   :  { %1379 = vmatprep.subr.bf16.mxu1 %v1509_v18 }
  0x3f   :  { %1358 = vmatpush3.bf16.msra.mxu0 %v1508_v19 }
  0x40   :  { %1387 = vmatprep.subr.bf16.mxu0 %v1511_v23 }
  0x41   :  { %1380 = vmatpush3.bf16.msra.mxu1 %v1510_v22 }
  0x42   :  { %1409 = vmatprep.subr.bf16.mxu1 %v1514_v25  ;;  %1016 = vmatmul.mubr.bf16.vlgmr.msra.gmra.mrb[4].mxu0 %v99_v27 }
  0x43   :  { %1388 = vmatpush3.bf16.msra.mxu0 %v1513_v26 }
  0x44   :  { %1056 = vmatmul.mubr.bf16.vlgmr.msra.gmra.mrb[4].mxu1 %v101_v28  ;;  %1389 = vmatprep.subr.bf16.mxu0 %v1516_v30 }
  0x45   :  { %1410 = vmatpush3.bf16.msra.mxu1 %v1515_v29 }
  0x46   :  { %1411 = vmatprep.subr.bf16.mxu1 %v1518_v31 }
  0x47   :  { %1390 = vmatpush3.bf16.msra.mxu0 %v1517_v32 }
  0x48   :  { %1391 = vmatprep.subr.bf16.mxu0 %v1520_v34 }
  0x49   :  { %1412 = vmatpush3.bf16.msra.mxu1 %v1519_v33 }
  0x4a   :  { %1413 = vmatprep.subr.bf16.mxu1 %v1522_v35 }
  0x4b   :  { %1392 = vmatpush3.bf16.msra.mxu0 %v1521_v36 }
  0x4c   :  { %1393 = vmatprep.subr.bf16.mxu0 %v1524_v38 }
  0x4d   :  { %1414 = vmatpush3.bf16.msra.mxu1 %v1523_v37 }
  0x4e   :  { %1415 = vmatprep.subr.bf16.mxu1 %v1526_v39 }
  0x4f   :  { %1394 = vmatpush3.bf16.msra.mxu0 %v1525_v40 }
  0x50   :  { %1395 = vmatprep.subr.bf16.mxu0 %v1528_v43 }
  0x51   :  { %1416 = vmatpush3.bf16.msra.mxu1 %v1527_v42 }
  0x52   :  { %1417 = vmatprep.subr.bf16.mxu1 %v1530_v44 }
  0x53   :  { %1396 = vmatpush3.bf16.msra.mxu0 %v1529_v45 }
  0x54   :  { %1397 = vmatprep.subr.bf16.mxu0 %v1532_v47 }
  0x55   :  { %1418 = vmatpush3.bf16.msra.mxu1 %v1531_v46 }
  0x56   :  { %1419 = vmatprep.subr.bf16.mxu1 %v1534_v48 }
  0x57   :  { %1398 = vmatpush3.bf16.msra.mxu0 %v1533_v49 }
  0x59   :  { %1420 = vmatpush3.bf16.msra.mxu1 %v1535_v50 }
  0x5a   :  { %8 = vsyncpa [#allocation3], 0  ;;  %1399 = vmatprep.subr.bf16.mxu0 %v1536_v51  ;;  %1421 = vmatprep.subr.bf16.mxu1 %v1538_v52  ;;  %v1540_v60 = vld [vmem:[%s1925_s1 + $0x278] sm:$0xff]   ;;  %v104_v62 = vpack.c.bf16 %v73_v58, %v73_v58  ;;  %v74_v63 = vcombine.high %v72_v59, %v72_v59  ;;  %v103_v2 = vpack.c.bf16 %v65_v54, %v65_v54  ;;  %v1545_v4 = vld [vmem:[%s1925_s1 + $0x300] sm:$0xff]   ;;  %v1572_v5 = vmov 0.0  }
  0x5b   :  { %v1542_v61 = vld [vmem:[%s1925_s1 + $0x2f8] sm:$0xff]   ;;  %1400 = vmatpush3.bf16.msra.mxu0 %v1537_v56  ;;  %v105_v3 = vpack.c.bf16 %v72_v59, %v72_v59  ;;  %v1546_v6 = vld [vmem:[%s1925_s1 + $0x308] sm:$0xff]   ;;  %vm1573_vm0 = vmmov 0   ;;  %vm899_vm1 = vcmask 261120   ;;  %v1199_v11 = vld [vmem:[%s1926_s2] ss:$0 sm:$0xff] }
  0x5c   :  { %v1541_v0 = vld [vmem:[%s1925_s1 + $0x238] sm:$0xff]   ;;  %v106_v1 = vpack.c.bf16 %v74_v63, %v74_v63  ;;  %1401 = vmatprep.subr.bf16.mxu0 %v1540_v60  ;;  %1095 = vmatprep.mubr.bf16.mxu0 %v104_v62 }
  0x5d   :  { %1422 = vmatpush3.bf16.msra.mxu1 %v1539_v57  ;;  %v1543_v41 = vld [vmem:[%s1925_s1 + $0x2b8] sm:$0xff]  }
  0x5e   :  { %1423 = vmatprep.subr.bf16.mxu1 %v1542_v61  ;;  %1135 = vmatprep.mubr.bf16.mxu1 %v106_v1  ;;  %v1198_v7 = vld.sshfl [vmem:[%s1924_s0 + $0x18] sm:$0x3 pattern:$0x76325410]  ;;  %s1574_s0 = smov [#allocation2]  }
  0x5f   :  { %1402 = vmatpush3.bf16.msra.mxu0 %v1541_v0  ;;  %v107_v8 = vpack.c.bf16 %v1198_v7, %v1198_v7  ;;  %s1190_s1 = sshll.u32 %s1574_s0, 4  ;;  %s1191_s1 = int_to_ptr.vmem [resolvable:$true] %s1190_s1 }
  0x60   :  { %1434 = vmatprep.subr.bf16.mxu0 %v1572_v5  ;;  %s1547_s2 = scalar_lea.vmem %s1191_s1, 32  ;;  %p1552_p1 = scmp.lt.s32.totalorder %s1191_s1, %s1191_s1 }
  0x61   :  { %1424 = vmatpush3.bf16.msra.mxu1 %v1543_v41  ;;  %p1548_p0 = scmp.ne.s32.totalorder %s1191_s1, %s1547_s2  ;;  %p1553_p2 = scmp.lt.s32.totalorder %s1547_s2, %s1547_s2 }
  0x62   :  { %1096 = vmatmul.mubr.bf16.vlgmr.msra.gmra.mrb[8].mxu0 %v103_v2 }
  0x63   :  { %1435 = vmatpush3.bf16.msra.mxu0 %v1545_v4  ;;  %1438 = vmatprep.mubr.msk.bf16.mxu0 %vm1573_vm0, %v1572_v5  ;;  %p1554_p3 = por %p1553_p2, %p1552_p1 }
  0x64   :  { %1136 = vmatmul.mubr.bf16.vlgmr.msra.gmra.mrb[8].mxu1 %v105_v3  ;;  %1436 = vmatprep.subr.bf16.mxu0 %v1572_v5 }
  0x65   :  { %p1555_p4 = pnand %p1554_p3, %p1548_p0 }
  0x67   :  { %1437 = vmatpush3.bf16.msra.mxu0 %v1546_v6 }
  0x6a   :  { %1439 = vmatmul.mubr.msk.bf16.vlgmr.msra.gmra.mrb[12].mxu0 %vm899_vm1, %v107_v8 }
  0xf5   :  { %v1315_v9 = vpop.f32.mrb[0].mxu0 }
  0xf6   :  { %v1316_v12 = vpop.f32.mrb[1].mxu0 }
  0xf7   :  { %v1337_v10 = vpop.f32.mrb[0].mxu1  ;;  %v1317_v14 = vadd.f32 %v1316_v12, %v1315_v9  ;;  %v1318_v15 = vpop.f32.mrb[2].mxu0 }
  0xf8   :  { %v1338_v13 = vpop.f32.mrb[1].mxu1  ;;  %v1319_v18 = vpop.f32.mrb[3].mxu0 }
  0xf9   :  { %v1339_v16 = vadd.f32 %v1338_v13, %v1337_v10  ;;  %v1340_v17 = vpop.f32.mrb[2].mxu1  ;;  %v938_v20 = vadd.f32 %v1317_v14, %v1199_v11 }
  0xfa   :  { %v1341_v19 = vpop.f32.mrb[3].mxu1 }
  0xfb   :  { %v978_v21 = vadd.f32 %v1339_v16, %v938_v20 }
 0x115   :  { %v1359_v22 = vpop.f32.mrb[4].mxu0 }
 0x116   :  { %v1360_v24 = vpop.f32.mrb[5].mxu0 }
 0x117   :  { %v1381_v23 = vpop.f32.mrb[4].mxu1  ;;  %v1361_v26 = vadd.f32 %v1360_v24, %v1359_v22  ;;  %v1362_v27 = vpop.f32.mrb[6].mxu0 }
 0x118   :  { %v1382_v25 = vpop.f32.mrb[5].mxu1  ;;  %v1363_v30 = vpop.f32.mrb[7].mxu0 }
 0x119   :  { %v1383_v28 = vadd.f32 %v1382_v25, %v1381_v23  ;;  %v1384_v29 = vpop.f32.mrb[6].mxu1  ;;  %v1018_v32 = vadd.f32 %v1361_v26, %v978_v21 }
 0x11a   :  { %v1385_v31 = vpop.f32.mrb[7].mxu1 }
 0x11b   :  { %v1058_v33 = vadd.f32 %v1383_v28, %v1018_v32 }
 0x135   :  { %v1403_v34 = vpop.f32.mrb[8].mxu0 }
 0x136   :  { %v1404_v36 = vpop.f32.mrb[9].mxu0 }
 0x137   :  { %v1425_v35 = vpop.f32.mrb[8].mxu1  ;;  %v1405_v38 = vadd.f32 %v1404_v36, %v1403_v34  ;;  %v1406_v39 = vpop.f32.mrb[10].mxu0 }
 0x138   :  { %v1426_v37 = vpop.f32.mrb[9].mxu1  ;;  %v1407_v43 = vpop.f32.mrb[11].mxu0 }
 0x139   :  { %v1427_v40 = vadd.f32 %v1426_v37, %v1425_v35  ;;  %v1428_v42 = vpop.f32.mrb[10].mxu1  ;;  %v1098_v45 = vadd.f32 %v1405_v38, %v1058_v33 }
 0x13a   :  { %v1429_v44 = vpop.f32.mrb[11].mxu1 }
 0x13b   :  { %v1138_v46 = vadd.f32 %v1427_v40, %v1098_v45 }
 0x13d   :  { %v1177_v47 = vpop.f32.mrb[12].mxu0 }
 0x13e   :  { %v1178_v48 = vadd.f32 %v1177_v47, %v1138_v46  ;;  %v1440_v49 = vpop.f32.mrb[13].mxu0 }
 0x13f   :  { %v1180_v50 = vpop.f32.mrb[14].mxu0 }
 0x140   :  { %1183 = vst [vmem:[#allocation2] sm:$0x3] %v1178_v48  ;;  %v1441_v51 = vpop.f32.mrb[15].mxu0 }
 0x141   :  { %1558 = shalt.err (!%p1555_p4)
}
 0x142   :  { %s1559_s4 = scalar_lea.hbm %s1927_s3, 32 }
 0x143   :  { %p1560_p5 = scmp.ne.s32.totalorder %s1927_s3, %s1559_s4  ;;  %p1563_p6 = scmp.lt.u32.totalorder %s1559_s4, %s1927_s3 }
 0x145   :  { %p1565_p7 = pnand %p1563_p6, %p1560_p5 }
 0x147   :  { %1568 = shalt.err (!%p1565_p7)
}
 0x148   :  { %1193 = dma.vmem_to_hbm [thread:$0]  %s1191_s1, 32, %s1927_s3, [#allocation3]  }
 0x149   :  { %1569 = dma.done.wait [#allocation3], 32  }
 0x14a   :  { %1570 = vsyncadd [#allocation3], 4294967264 }
 0x14b   :  { %1197 = vsyncpa [#allocation3], 1 }

// kernel: cnn_forward.3
= control target key start
LH: loop header
LB: loop body
LE: loop exit
PB: predicated region body
PF: predicated region fallthrough
CT: control target
= control target key end

     0   :  { %9 = vsyncpa [#allocation3], 0  ;;  %s3935_s0 = inlined_call_operand.vmem [shape: bf16[2,16,32], index: 0, kind: input, shape index: {}]   ;;  %s3936_s1 = inlined_call_operand.vmem [shape: bf16[2,16,32], index: 1, kind: input, shape index: {}]   ;;  %s3937_s2 = inlined_call_operand.hbm [shape: bf16[10,32,224], index: 2, kind: input, shape index: {}]   ;;  %s3938_s3 = inlined_call_operand.hbm [shape: f32[1,224], index: 3, kind: input, shape index: {}]   ;;  %s3939_s4 = inlined_call_operand.vmem [shape: bf16[28,224], index: 4, kind: output, shape index: {}]  }
   0x1   :  { %10 = vsyncpa [#allocation5], 0  ;;  %s3147_s15 = smov [#allocation2]   ;;  %s3099_s19 = scalar_lea.hbm %s3937_s2, 5120 }
   0x2   :  { %s20_s16 = sshll.u32 %s3147_s15, 4  ;;  %p3100_p0 = scmp.ne.s32.totalorder %s3937_s2, %s3099_s19  ;;  %s21_s16 = int_to_ptr.vmem [resolvable:$true] %s20_s16 }
   0x3   :  { %p3103_p1 = scmp.lt.u32.totalorder %s3099_s19, %s3937_s2 }
   0x5   :  { %p3105_p2 = pnand %p3103_p1, %p3100_p0 }
   0x7   :  { %3108 = shalt.err (!%p3105_p2)
}
   0x8   :  { %s3109_s24 = scalar_lea.vmem %s21_s16, 5120  ;;  %p3114_p4 = scmp.lt.s32.totalorder %s21_s16, %s21_s16 }
   0x9   :  { %p3110_p3 = scmp.ne.s32.totalorder %s21_s16, %s3109_s24  ;;  %p3115_p5 = scmp.lt.s32.totalorder %s3109_s24, %s3109_s24 }
   0xb   :  { %p3116_p6 = por %p3115_p5, %p3114_p4 }
   0xd   :  { %p3117_p7 = pnand %p3116_p6, %p3110_p3 }
   0xf   :  { %3120 = shalt.err (!%p3117_p7)
}
  0x10   :  { %s3148_s25 = smov 128   ;;  %s3149_s26 = smov 8  }
  0x11   :  { %26 = dma.hbm_to_vmem [thread:$0]  %s3937_s2, 5120, %s21_s16, [#allocation3], %s3148_s25, %s3148_s25, %s3149_s26  }
  0x12   :  { %s3150_s29 = smov [#allocation4]   ;;  %s3121_s7 = scalar_lea.hbm %s3938_s3, 32 }
  0x13   :  { %s33_s30 = sshll.u32 %s3150_s29, 4  ;;  %p3122_p8 = scmp.ne.s32.totalorder %s3938_s3, %s3121_s7  ;;  %s34_s30 = int_to_ptr.vmem [resolvable:$true] %s33_s30 }
  0x14   :  { %p3125_p9 = scmp.lt.u32.totalorder %s3121_s7, %s3938_s3 }
  0x16   :  { %p3127_p10 = pnand %p3125_p9, %p3122_p8 }
  0x18   :  { %3130 = shalt.err (!%p3127_p10)
}
  0x19   :  { %s3131_s12 = scalar_lea.vmem %s34_s30, 32  ;;  %p3136_p12 = scmp.lt.s32.totalorder %s34_s30, %s34_s30 }
  0x1a   :  { %p3132_p11 = scmp.ne.s32.totalorder %s34_s30, %s3131_s12  ;;  %p3137_p13 = scmp.lt.s32.totalorder %s3131_s12, %s3131_s12 }
  0x1c   :  { %p3138_p0 = por %p3137_p13, %p3136_p12 }
  0x1e   :  { %p3139_p1 = pnand %p3138_p0, %p3132_p11 }
  0x20   :  { %3142 = shalt.err (!%p3139_p1)
}
  0x21   :  { %36 = dma.hbm_to_vmem [thread:$0]  %s3938_s3, 32, %s34_s30, [#allocation5]  }
  0x22   :  { %3143 = dma.done.wait [#allocation3], 5120  }
  0x23   :  { %3144 = vsyncadd [#allocation3], 4294962176 }
  0x24   :  { %3145 = dma.done.wait [#allocation5], 32  }
  0x25   :  { %3146 = vsyncadd [#allocation5], 4294967264  ;;  %v3940_v0 = vmov 0   ;;  %v3152_v1 = vmov 1966171168   ;;  %v63_v3 = vlaneseq  ;;  %vm817_vm8 = vcmask 261120  }
  0x26   :  { %856 = vmatprep.mubr.bf16.mxu0 %v3940_v0  ;;  %1650 = vmatprep.mubr.bf16.mxu1 %v3940_v0  ;;  %v61_v2 = vunpack.c.l.s4 %v3152_v1  ;;  %vm300_vm0 = vsmask.f32 256  ;;  %v3204_v4 = vld [vmem:[#allocation2 + $0x24] ss:$8 sps:$4 sm:$0xff]   ;;  %vm301_vm1 = vsmask.f32 1284 }
  0x27   :  { %v3206_v5 = vld [vmem:[#allocation2 + $0x20] ss:$8 sps:$4 sm:$0xff]   ;;  %v3208_v7 = vshrl.u32 %v63_v3, 7  ;;  %824 = vmatprep.subr.bf16.mxu0 %v3204_v4  ;;  %v3211_v8 = vld [vmem:[#allocation2 + $0xc4] ss:$8 sps:$4 sm:$0xff]   ;;  %vm302_vm3 = vmor %vm300_vm0, %vm301_vm1  ;;  %vm2751_vm0 = vcmask 1043456  }
  0x28   :  { %v62_v6 = vunpack.c.0.s8 %v61_v2  ;;  %v3213_v9 = vld [vmem:[#allocation2 + $0xc0] ss:$8 sps:$4 sm:$0xff]   ;;  %825 = vmatpush1.bf16.msra.mxu0 %v3206_v5  ;;  %v3216_v10 = vld [vmem:[#allocation2 + $0x34] ss:$8 sps:$4 sm:$0xff]   ;;  %v3218_v11 = vld [vmem:[#allocation2 + $0x30] ss:$8 sps:$4 sm:$0xff]   ;;  %1618 = vmatprep.subr.bf16.mxu1 %v3211_v8 }
  0x29   :  { %3957 = vst [vmem:[#allocation8_spill] sm:$0xff] %v3208_v7  ;;  %v3221_v12 = vld [vmem:[#allocation2 + $0xd4] ss:$8 sps:$4 sm:$0xff]   ;;  %1619 = vmatpush1.bf16.msra.mxu1 %v3213_v9  ;;  %826 = vmatprep.subr.bf16.mxu0 %v3216_v10  ;;  %v3225_v13 = vld [vmem:[#allocation2 + $0xd0] ss:$8 sps:$4 sm:$0xff]   ;;  %vm2752_vm1 = vcmask 785412  }
  0x2a   :  { %v3228_v14 = vsub.s32 %v62_v6, %v3208_v7  ;;  %vm303_vm2 = vsmask.f32 2312  ;;  %1620 = vmatprep.subr.bf16.mxu1 %v3221_v12  ;;  %v3231_v15 = vld [vmem:[#allocation2 + $0x4] ss:$8 sps:$4 sm:$0xff]   ;;  %vm305_vm4 = vsmask.f32 3340 }
  0x2b   :  { %v2771_v16 = vld.sshfl [vmem:[%s3936_s1] sm:$0x33 pattern:$0x75316420]  ;;  %vm307_vm5 = vsmask.f32 4368  ;;  %vm3254_vm6 = vmor %vm302_vm3, %vm303_vm2 }
  0x2c   :  { %827 = vmatpush1.bf16.msra.mxu0 %v3218_v11  ;;  %v2772_v17 = vld.sshfl [vmem:[%s3936_s1 + $0x4] sm:$0x13 pattern:$0x75316420]  ;;  %v161_v18 = vcombine.high %v2771_v16, %v2771_v16  ;;  %v3244_v19 = vrot.slane %v2771_v16, %v3228_v14  ;;  %v3251_v23 = vld [vmem:[#allocation2 + $0xa4] ss:$8 sps:$4 sm:$0xff]   ;;  %vm3284_vm9 = vmor %vm3254_vm6, %vm305_vm4 }
  0x2d   :  { %992 = vmatprep.subr.bf16.mxu0 %v3231_v15  ;;  %1621 = vmatpush1.bf16.msra.mxu1 %v3225_v13  ;;  %v2773_v20 = vld.sshfl [vmem:[%s3936_s1 + $0x8] sm:$0x33 pattern:$0x75316420]  ;;  %v185_v21 = vcombine.high %v2772_v17, %v2772_v17  ;;  %v192_v22 = vrot.slane %v2772_v17, %v3228_v14  ;;  %vm309_vm7 = vsmask.f32 5396  ;;  %vm3314_vm11 = vmor %vm3284_vm9, %vm307_vm5 }
  0x2e   :  { %v3259_v25 = vrot.slane %v161_v18, %v3228_v14  ;;  %v208_v26 = vcombine.high %v2773_v20, %v2773_v20  ;;  %v3262_v27 = vrot.slane %v2773_v20, %v3228_v14  ;;  %v3266_v28 = vcombine.high %v3244_v19, %v3244_v19  ;;  %1691 = vmatprep.subr.bf16.mxu1 %v3251_v23  ;;  %v2774_v31 = vld.sshfl [vmem:[%s3936_s1 + $0xc] sm:$0x13 pattern:$0x75316420]  ;;  %vm3334_vm13 = vmor %vm3314_vm11, %vm309_vm7  ;;  %v3338_v3 = vld [vmem:[#allocation2] ss:$8 sps:$4 sm:$0xff]  }
  0x2f   :  { %v199_v29 = vrot.slane %v185_v21, %v3228_v14  ;;  %v200_v30 = vcombine.high %v192_v22, %v192_v22  ;;  %vm311_vm10 = vsmask.f32 6424  ;;  %v232_v40 = vcombine.high %v2774_v31, %v2774_v31  ;;  %v2767_v45 = vld.sshfl [vmem:[%s3935_s0] sm:$0x33 pattern:$0x75316420]  ;;  %vm3913_vm2 = vmor %vm2752_vm1, %vm2751_vm0 }
  0x30   :  { %v708_v33 = vcombine.low %v3244_v19, %v3259_v25  ;;  %v2811_v34 = vcombine.high %v3244_v19, %v3259_v25  ;;  %v3279_v35 = vrot.slane %v208_v26, %v3228_v14  ;;  %v3291_v39 = vcombine.high %v3262_v27, %v3262_v27  ;;  %v2768_v50 = vld.sshfl [vmem:[%s3935_s0 + $0x4] sm:$0x13 pattern:$0x75316420]  ;;  %v3346_v20 = vld [vmem:[#allocation2 + $0xa0] ss:$8 sps:$4 sm:$0xff]   ;;  %vm3378_vm14 = vmor %vm3334_vm13, %vm311_vm10 }
  0x31   :  { %v710_v37 = vcombine.low %v192_v22, %v199_v29  ;;  %v711_v38 = vcombine.low %v200_v30, %v3262_v27  ;;  %v239_v44 = vrot.slane %v2774_v31, %v3228_v14  ;;  %v246_v48 = vrot.slane %v232_v40, %v3228_v14  ;;  %v2769_v55 = vld.sshfl [vmem:[%s3935_s0 + $0x8] sm:$0x33 pattern:$0x75316420]  ;;  %v3355_v30 = vld [vmem:[#allocation2 + $0x14] ss:$8 sps:$4 sm:$0xff]  }
  0x32   :  { %v718_v41 = vrot.slane %v708_v33, %v3228_v14  ;;  %v725_v42 = vrot.slane %v2811_v34, %v3228_v14  ;;  %v3297_v43 = vcombine.high %v3279_v35, %v3279_v35  ;;  %v757_v49 = vcombine.low %v3279_v35, %v3291_v39  ;;  %v3357_v31 = vld [vmem:[#allocation2 + $0xb4] ss:$8 sps:$4 sm:$0xff]   ;;  %v3389_v51 = vld [vmem:[#allocation2 + $0xb0] ss:$8 sps:$4 sm:$0xff]  }
  0x33   :  { %v732_v46 = vrot.slane %v710_v37, %v3228_v14  ;;  %v739_v47 = vrot.slane %v711_v38, %v3228_v14  ;;  %v247_v53 = vcombine.high %v239_v44, %v239_v44  ;;  %v59_v56 = vcombine.high %v2767_v45, %v2767_v45  ;;  %v3496_v7 = vld [vmem:[#allocation2 + $0xf4] ss:$8 sps:$4 sm:$0xff]  }
  0x34   :  { %v740_v52 = vcombine.low %v718_v41, %v725_v42  ;;  %v758_v54 = vcombine.low %v3297_v43, %v239_v44  ;;  %vm313_vm12 = vsmask.f32 7452  ;;  %v766_v58 = vrot.slane %v757_v49, %v3228_v14  ;;  %v2770_v42 = vld.sshfl [vmem:[%s3935_s0 + $0xc] sm:$0x13 pattern:$0x75316420] }
  0x35   :  { %v741_v57 = vcombine.low %v732_v46, %v739_v47  ;;  %v3324_v59 = vrot.slane %v2767_v45, %v3228_v14  ;;  %v83_v60 = vcombine.high %v2768_v50, %v2768_v50  ;;  %v759_v62 = vcombine.low %v246_v48, %v247_v53  ;;  %v3385_v49 = vld [vmem:[#allocation2 + $0x10] ss:$8 sps:$4 sm:$0xff]   ;;  %vm3426_vm15 = vmor %vm3378_vm14, %vm313_vm12  ;;  %3972 = vst [vmem:[#allocation11_spill] sm:$0xff] %v3496_v7 }
  0x36   :  { %v748_v61 = vrot.slane %v740_v52, %v3228_v14  ;;  %v773_v63 = vrot.slane %v758_v54, %v3228_v14  ;;  %v3329_v1 = vrot.slane %v59_v56, %v3228_v14  ;;  %v90_v16 = vrot.slane %v2768_v50, %v3228_v14 }
  0x37   :  { %v755_v6 = vrot.slane %v741_v57, %v3228_v14  ;;  %v97_v17 = vrot.slane %v83_v60, %v3228_v14  ;;  %v3344_v18 = vrot.slane %v2769_v55, %v3228_v14  ;;  %v780_v21 = vrot.slane %v759_v62, %v3228_v14  ;;  %v3401_v57 = vld [vmem:[#allocation2 + $0xe4] ss:$8 sps:$4 sm:$0xff]  }
  0x38   :  { %v781_v22 = vcombine.low %v766_v58, %v773_v63  ;;  %v877_v24 = vcombine.low %v3324_v59, %v3329_v1  ;;  %v2818_v26 = vcombine.high %v3324_v59, %v3329_v1  ;;  %v98_v33 = vcombine.high %v90_v16, %v90_v16 }
  0x39   :  { %v3353_v29 = vcombine.low %v748_v61, %v755_v6  ;;  %v879_v34 = vcombine.low %v90_v16, %v97_v17  ;;  %v106_v36 = vcombine.high %v2769_v55, %v2769_v55  ;;  %v795_v38 = vrot.slane %v780_v21, %v3228_v14  ;;  %v3398_v55 = vld [vmem:[#allocation2 + $0x44] ss:$8 sps:$4 sm:$0xff]   ;;  %v2775_v6 = vld.sshfl [vmem:[%s3935_s0 + $0x4] sm:$0x33 pattern:$0x75316420] }
  0x3a   :  { %v788_v37 = vrot.slane %v781_v22, %v3228_v14  ;;  %v887_v40 = vrot.slane %v877_v24, %v3228_v14  ;;  %v894_v41 = vrot.slane %v2818_v26, %v3228_v14  ;;  %v880_v44 = vcombine.low %v98_v33, %v3344_v18  ;;  %v3712_v26 = vld [vmem:[#allocation2 + $0x120] ss:$8 sps:$4 sm:$0xff]  }
  0x3b   :  { %2816 = vmatmul.mubr.msk.bf16.vlgmr.msra.gmra.mrb[0].mxu0 %vm817_vm8, %v3353_v29  ;;  %2849 = vmatmul.mubr.msk.bf16.vlgmr.msra.gmra.mrb[0].mxu1 %vm817_vm8, %v3353_v29  ;;  %v901_v45 = vrot.slane %v879_v34, %v3228_v14  ;;  %v3373_v46 = vrot.slane %v106_v36, %v3228_v14  ;;  %v316_v48 = vshrl.u32 %v3324_v59, 16  ;;  %v3393_v53 = vcombine.high %v3344_v18, %v3344_v18 }
  0x3c   :  { %993 = vmatpush1.bf16.msra.mxu0 %v3338_v3  ;;  %1692 = vmatpush1.bf16.msra.mxu1 %v3346_v20  ;;  %v3387_v50 = vcombine.low %v788_v37, %v795_v38  ;;  %v909_v52 = vcombine.low %v887_v40, %v894_v41  ;;  %v321_v54 = vshll.u32 %v3329_v1, 16  ;;  %v908_v56 = vrot.slane %v880_v44, %v3228_v14 }
  0x3d   :  { %866 = vmatprep.mubr.bf16.mxu0 %v3940_v0  ;;  %994 = vmatprep.subr.bf16.mxu0 %v3355_v30  ;;  %v3405_v58 = vcombine.high %v3373_v46, %v3373_v46  ;;  %v130_v60 = vcombine.high %v2770_v42, %v2770_v42  ;;  %v324_v61 = vshrl.u32 %v3329_v1, 16  ;;  %v137_v63 = vrot.slane %v2770_v42, %v3228_v14 }
  0x3e   :  { %3968 = vst [vmem:[#allocation9_spill] sm:$0xff] %v3387_v50  ;;  %1660 = vmatprep.mubr.bf16.mxu1 %v3940_v0  ;;  %1693 = vmatprep.subr.bf16.mxu1 %v3357_v31  ;;  %v917_v62 = vrot.slane %v909_v52, %v3228_v14  ;;  %v926_v2 = vcombine.low %v3373_v46, %v3393_v53  ;;  %v373_v16 = vshrl.u32 %v3344_v18, 16  ;;  %vm2757_vm3 = vcmask 1041408  }
  0x3f   :  { %v910_v17 = vcombine.low %v901_v45, %v908_v56  ;;  %v144_v21 = vrot.slane %v130_v60, %v3228_v14  ;;  %v74_v22 = vcombine.high %v3324_v59, %v3324_v59  ;;  %v75_v24 = vcombine.high %v3329_v1, %v3329_v1 }
  0x40   :  { %995 = vmatpush1.bf16.msra.mxu0 %v3385_v49  ;;  %1694 = vmatpush1.bf16.msra.mxu1 %v3389_v51  ;;  %v145_v18 = vcombine.high %v137_v63, %v137_v63  ;;  %v927_v33 = vcombine.low %v3405_v58, %v137_v63  ;;  %v935_v34 = vrot.slane %v926_v2, %v3228_v14  ;;  %v378_v59 = vshll.u32 %v3373_v46, 16 }
  0x41   :  { %1165 = vmatprep.subr.bf16.mxu0 %v3398_v55  ;;  %v924_v1 = vrot.slane %v910_v17, %v3228_v14  ;;  %1769 = vmatprep.subr.bf16.mxu1 %v3401_v57  ;;  %v259_v36 = vcombine.high %v2775_v6, %v2775_v6  ;;  %v3439_v37 = vrot.slane %v2775_v6, %v3228_v14  ;;  %v329_v38 = vshll.u32 %v74_v22, 16 }
  0x42   :  { %v928_v40 = vcombine.low %v144_v21, %v145_v18  ;;  %v942_v41 = vrot.slane %v927_v33, %v3228_v14  ;;  %v323_v42 = vsel %vm3426_vm15, %v316_v48, %v321_v54  ;;  %v332_v44 = vshrl.u32 %v74_v22, 16 }
  0x43   :  { %2817 = vmatmul.mubr.msk.bf16.gmra.mrb[4].mxu0 %vm817_vm8, %v3387_v50  ;;  %2850 = vmatmul.mubr.msk.bf16.gmra.mrb[4].mxu1 %vm817_vm8, %v3387_v50  ;;  %v925_v45 = vcombine.low %v917_v62, %v924_v1  ;;  %v3449_v47 = vrot.slane %v259_v36, %v3228_v14  ;;  %v3453_v52 = vcombine.high %v3439_v37, %v3439_v37  ;;  %v337_v56 = vshll.u32 %v75_v24, 16 }
  0x44   :  { %1024 = vmatprep.mubr.bf16.mxu0 %v3940_v0  ;;  %1723 = vmatprep.mubr.bf16.mxu1 %v3940_v0  ;;  %v949_v48 = vrot.slane %v928_v40, %v3228_v14  ;;  %v950_v54 = vcombine.low %v935_v34, %v942_v41  ;;  %v331_v60 = vsel %vm3426_vm15, %v324_v61, %v329_v38  ;;  %v340_v63 = vshrl.u32 %v75_v24, 16  ;;  %v2776_v24 = vld.sshfl [vmem:[%s3935_s0 + $0xc] sm:$0x33 pattern:$0x75316420] }
  0x45   :  { %v3462_v62 = vcombine.high %v3449_v47, %v3449_v47  ;;  %v339_v2 = vsel %vm3426_vm15, %v332_v44, %v337_v56  ;;  %v345_v6 = vshll.u32 %v3439_v37, 16  ;;  %v348_v17 = vshrl.u32 %v3439_v37, 16  ;;  %v3480_v38 = vld [vmem:[#allocation2 + $0x40] ss:$8 sps:$4 sm:$0xff]  }
  0x46   :  { %v957_v21 = vrot.slane %v950_v54, %v3228_v14  ;;  %v964_v22 = vrot.slane %v949_v48, %v3228_v14  ;;  %v353_v18 = vshll.u32 %v3449_v47, 16  ;;  %v356_v61 = vshrl.u32 %v3449_v47, 16  ;;  %v3482_v40 = vld [vmem:[#allocation2 + $0xe0] ss:$8 sps:$4 sm:$0xff]   ;;  %v3490_v54 = vld [vmem:[#allocation2 + $0x54] ss:$8 sps:$4 sm:$0xff]  }
  0x47   :  { %v347_v33 = vsel %vm3426_vm15, %v340_v63, %v345_v6  ;;  %v361_v34 = vshll.u32 %v3453_v52, 16  ;;  %v364_v1 = vshrl.u32 %v3453_v52, 16  ;;  %v369_v36 = vshll.u32 %v3462_v62, 16  ;;  %3971 = vst [vmem:[#allocation10_spill] sm:$0xff] %v3490_v54 }
  0x48   :  { %v3484_v41 = vcombine.low %v957_v21, %v964_v22  ;;  %v355_v44 = vsel %vm3426_vm15, %v348_v17, %v353_v18  ;;  %v380_v56 = vsel %vm3426_vm15, %v373_v16, %v378_v59  ;;  %v1050_v48 = vcombine.low %v323_v42, %v331_v60 }
  0x49   :  { %v363_v63 = vsel %vm3426_vm15, %v356_v61, %v361_v34  ;;  %v371_v6 = vsel %vm3426_vm15, %v364_v1, %v369_v36  ;;  %v1051_v32 = vcombine.low %v339_v2, %v347_v33  ;;  %v283_v0 = vcombine.high %v2776_v24, %v2776_v24  ;;  %v3512_v2 = vld [vmem:[#allocation2 + $0x50] ss:$8 sps:$4 sm:$0xff]   ;;  %v3523_v33 = vld [vmem:[#allocation2 + $0x64] ss:$8 sps:$4 sm:$0xff]  }
  0x4a   :  { %v1052_v21 = vcombine.low %v355_v44, %v363_v63  ;;  %v1053_v22 = vcombine.low %v371_v6, %v380_v56  ;;  %v1060_v17 = vrot.slane %v1050_v48, %v3228_v14  ;;  %v3500_v18 = vrot.slane %v2776_v24, %v3228_v14  ;;  %3973 = vst [vmem:[#allocation12_spill] sm:$0xff] %v3512_v2  ;;  %v3514_v61 = vld [vmem:[#allocation2 + $0xf0] ss:$8 sps:$4 sm:$0xff]   ;;  %v3525_v1 = vld [vmem:[#allocation2 + $0x104] ss:$8 sps:$4 sm:$0xff]  }
  0x4b   :  { %2823 = vmatmul.mubr.msk.bf16.vlgmr.msra.gmra.mrb[0].mxu0 %vm817_vm8, %v925_v45  ;;  %2855 = vmatmul.mubr.msk.bf16.vlgmr.msra.gmra.mrb[0].mxu1 %vm817_vm8, %v925_v45  ;;  %v1067_v16 = vrot.slane %v1051_v32, %v3228_v14  ;;  %v3506_v59 = vrot.slane %v283_v0, %v3228_v14  ;;  %v381_v42 = vshrl.u32 %v3373_v46, 16  ;;  %v386_v60 = vshll.u32 %v3393_v53, 16  ;;  %3974 = vst [vmem:[#allocation13_spill] sm:$0xff] %v3514_v61 }
  0x4c   :  { %1166 = vmatpush1.bf16.msra.mxu0 %v3480_v38  ;;  %1770 = vmatpush1.bf16.msra.mxu1 %v3482_v40  ;;  %v1074_v24 = vrot.slane %v1052_v21, %v3228_v14  ;;  %v1081_v45 = vrot.slane %v1053_v22, %v3228_v14  ;;  %v298_v0 = vcombine.high %v3500_v18, %v3500_v18  ;;  %v389_v32 = vshrl.u32 %v3393_v53, 16 }
  0x4d   :  { %v3975_v46 = vmov 0   ;;  %1167 = vmatprep.subr.bf16.mxu0 %v3490_v54  ;;  %3976 = vst [vmem:[#allocation14_spill] sm:$0xff] %v3523_v33  ;;  %v1082_v34 = vcombine.low %v1060_v17, %v1067_v16  ;;  %3977 = vst [vmem:[#allocation15_spill] sm:$0xff] %v3525_v1  ;;  %v299_v36 = vcombine.high %v3506_v59, %v3506_v59  ;;  %v388_v44 = vsel %vm3426_vm15, %v381_v42, %v386_v60 }
  0x4e   :  { %1034 = vmatprep.mubr.bf16.mxu0 %v3975_v46  ;;  %v394_v56 = vshll.u32 %v3405_v58, 16  ;;  %1733 = vmatprep.mubr.bf16.mxu1 %v3975_v46  ;;  %v1083_v53 = vcombine.low %v1074_v24, %v1081_v45  ;;  %v397_v48 = vshrl.u32 %v3405_v58, 16  ;;  %v402_v63 = vshll.u32 %v3500_v18, 16 }
  0x4f   :  { %1771 = vmatprep.subr.bf16.mxu1 %v3496_v7  ;;  %v405_v6 = vshrl.u32 %v3500_v18, 16  ;;  %v1090_v21 = vrot.slane %v1082_v34, %v3228_v14  ;;  %v410_v17 = vshll.u32 %v3506_v59, 16  ;;  %v413_v16 = vshrl.u32 %v3506_v59, 16 }
  0x50   :  { %v396_v22 = vsel %vm3426_vm15, %v389_v32, %v394_v56  ;;  %v2791_v42 = vld.sshfl [vmem:[%s3936_s1 + $0x4] sm:$0x33 pattern:$0x75316420]  ;;  %1168 = vmatpush1.bf16.msra.mxu0 %v3512_v2  ;;  %1772 = vmatpush1.bf16.msra.mxu1 %v3514_v61  ;;  %v1097_v58 = vrot.slane %v1083_v53, %v3228_v14  ;;  %v404_v60 = vsel %vm3426_vm15, %v397_v48, %v402_v63  ;;  %v418_v24 = vshll.u32 %v298_v0, 16 }
  0x51   :  { %v421_v45 = vshrl.u32 %v298_v0, 16  ;;  %1346 = vmatprep.subr.bf16.mxu0 %v3523_v33  ;;  %1855 = vmatprep.subr.bf16.mxu1 %v3525_v1  ;;  %v412_v32 = vsel %vm3426_vm15, %v405_v6, %v410_v17  ;;  %v426_v34 = vshll.u32 %v299_v36, 16  ;;  %v1099_v56 = vcombine.low %v388_v44, %v396_v22 }
  0x52   :  { %v177_v50 = vcombine.high %v3259_v25, %v3259_v25  ;;  %v3556_v61 = vcombine.low %v1090_v21, %v1097_v58  ;;  %v420_v53 = vsel %vm3426_vm15, %v413_v16, %v418_v24  ;;  %v1100_v48 = vcombine.low %v404_v60, %v412_v32 }
  0x53   :  { %v440_v63 = vcombine.high %v2791_v42, %v2791_v42  ;;  %2824 = vmatmul.mubr.msk.bf16.gmra.mrb[4].mxu0 %vm817_vm8, %v3484_v41  ;;  %2856 = vmatmul.mubr.msk.bf16.gmra.mrb[4].mxu1 %vm817_vm8, %v3484_v41  ;;  %v428_v0 = vsel %vm3426_vm15, %v421_v45, %v426_v34  ;;  %v1108_v36 = vrot.slane %v1099_v56, %v3228_v14  ;;  %v482_v6 = vshrl.u32 %v3244_v19, 16  ;;  %v3592_v34 = vld [vmem:[#allocation2 + $0x60] ss:$8 sps:$4 sm:$0xff]  }
  0x54   :  { %v3568_v44 = vrot.slane %v2791_v42, %v3228_v14  ;;  %1197 = vmatprep.mubr.bf16.mxu0 %v3975_v46  ;;  %1801 = vmatprep.mubr.bf16.mxu1 %v3975_v46  ;;  %v1101_v21 = vcombine.low %v420_v53, %v428_v0  ;;  %v1115_v22 = vrot.slane %v1100_v48, %v3228_v14  ;;  %v487_v41 = vshll.u32 %v3259_v25, 16 }
  0x55   :  { %v3575_v17 = vrot.slane %v440_v63, %v3228_v14  ;;  %v490_v42 = vshrl.u32 %v3259_v25, 16  ;;  %v495_v19 = vshll.u32 %v3266_v28, 16  ;;  %v498_v58 = vshrl.u32 %v3266_v28, 16  ;;  %v3597_v28 = vld [vmem:[#allocation2 + $0x100] ss:$8 sps:$4 sm:$0xff]  }
  0x56   :  { %v3580_v16 = vcombine.high %v3568_v44, %v3568_v44  ;;  %v1122_v60 = vrot.slane %v1101_v21, %v3228_v14  ;;  %v1123_v24 = vcombine.low %v1108_v36, %v1115_v22  ;;  %v489_v32 = vsel %vm3426_vm15, %v482_v6, %v487_v41  ;;  %v3599_v63 = vld [vmem:[#allocation2 + $0x74] ss:$8 sps:$4 sm:$0xff]  }
  0x57   :  { %v3588_v45 = vcombine.high %v3575_v17, %v3575_v17  ;;  %v497_v56 = vsel %vm3426_vm15, %v490_v42, %v495_v19  ;;  %v503_v25 = vshll.u32 %v177_v50, 16  ;;  %v506_v53 = vshrl.u32 %v177_v50, 16  ;;  %v2792_v19 = vld.sshfl [vmem:[%s3936_s1 + $0xc] sm:$0x33 pattern:$0x75316420] }
  0x58   :  { %v511_v48 = vshll.u32 %v3568_v44, 16  ;;  %v1130_v0 = vrot.slane %v1123_v24, %v3228_v14  ;;  %v1137_v36 = vrot.slane %v1122_v60, %v3228_v14  ;;  %v514_v21 = vshrl.u32 %v3568_v44, 16  ;;  %v3616_v60 = vld [vmem:[#allocation2 + $0x114] ss:$8 sps:$4 sm:$0xff]  }
  0x59   :  { %v519_v6 = vshll.u32 %v3575_v17, 16  ;;  %v505_v22 = vsel %vm3426_vm15, %v498_v58, %v503_v25  ;;  %v522_v41 = vshrl.u32 %v3575_v17, 16  ;;  %v527_v42 = vshll.u32 %v3580_v16, 16  ;;  %3978 = vst [vmem:[#allocation16_spill] sm:$0xff] %v3616_v60 }
  0x5a   :  { %v513_v50 = vsel %vm3426_vm15, %v506_v53, %v511_v48  ;;  %v3614_v24 = vcombine.low %v1130_v0, %v1137_v36  ;;  %v530_v58 = vshrl.u32 %v3580_v16, 16  ;;  %v535_v25 = vshll.u32 %v3588_v45, 16 }
  0x5b   :  { %v521_v1 = vsel %vm3426_vm15, %v514_v21, %v519_v6  ;;  %2829 = vmatmul.mubr.msk.bf16.vlgmr.msra.gmra.mrb[0].mxu0 %vm817_vm8, %v3556_v61  ;;  %2861 = vmatmul.mubr.msk.bf16.vlgmr.msra.gmra.mrb[0].mxu1 %vm817_vm8, %v3556_v61  ;;  %v529_v53 = vsel %vm3426_vm15, %v522_v41, %v527_v42  ;;  %v544_v48 = vshll.u32 %v3279_v35, 16  ;;  %v1231_v0 = vcombine.low %v489_v32, %v497_v56  ;;  %v3631_v21 = vld [vmem:[#allocation2 + $0x70] ss:$8 sps:$4 sm:$0xff]   ;;  %v3640_v32 = vld [vmem:[#allocation2 + $0x84] ss:$8 sps:$4 sm:$0xff]  }
  0x5c   :  { %v1232_v36 = vcombine.low %v505_v22, %v513_v50  ;;  %1347 = vmatpush1.bf16.msra.mxu0 %v3592_v34  ;;  %1856 = vmatpush1.bf16.msra.mxu1 %v3597_v28  ;;  %3979 = vst [vmem:[#allocation17_spill] sm:$0xff] %v3631_v21  ;;  %v3633_v6 = vld [vmem:[#allocation2 + $0x110] ss:$8 sps:$4 sm:$0xff]   ;;  %v537_v33 = vsel %vm3426_vm15, %v530_v58, %v535_v25  ;;  %v547_v54 = vshrl.u32 %v3279_v35, 16  ;;  %3981 = vst [vmem:[#allocation19_spill] sm:$0xff] %v3640_v32  ;;  %vm2758_vm4 = vcmask 783364  }
  0x5d   :  { %3980 = vst [vmem:[#allocation18_spill] sm:$0xff] %v3633_v6  ;;  %v1233_v2 = vcombine.low %v521_v1, %v529_v53  ;;  %v464_v7 = vcombine.high %v2792_v19, %v2792_v19  ;;  %1207 = vmatprep.mubr.bf16.mxu0 %v3975_v46  ;;  %1348 = vmatprep.subr.bf16.mxu0 %v3599_v63  ;;  %v3982_v56 = vshrl.u32 %v3262_v27, 16  ;;  %v3648_v42 = vld [vmem:[#allocation2 + $0x124] ss:$8 sps:$4 sm:$0xff]   ;;  %v552_v1 = vshll.u32 %v3291_v39, 16  ;;  %vm2759_vm5 = vmor %vm2758_vm4, %vm2757_vm3 }
  0x5e   :  { %v1241_v50 = vrot.slane %v1231_v0, %v3228_v14  ;;  %v1248_v41 = vrot.slane %v1232_v36, %v3228_v14  ;;  %3983 = vst [vmem:[#allocation20_spill] sm:$0xff] %v3648_v42  ;;  %1811 = vmatprep.mubr.bf16.mxu1 %v3975_v46  ;;  %1857 = vmatprep.subr.bf16.mxu1 %v3616_v60  ;;  %v555_v25 = vshrl.u32 %v3291_v39, 16  ;;  %v560_v36 = vshll.u32 %v3297_v43, 16 }
  0x5f   :  { %v546_v22 = vsel %vm3426_vm15, %v3982_v56, %v544_v48  ;;  %v1255_v58 = vrot.slane %v1233_v2, %v3228_v14  ;;  %v3655_v27 = vrot.slane %v2792_v19, %v3228_v14  ;;  %v3659_v48 = vrot.slane %v464_v7, %v3228_v14 }
  0x60   :  { %v1234_v35 = vcombine.low %v537_v33, %v546_v22  ;;  %v1263_v53 = vcombine.low %v1241_v50, %v1248_v41  ;;  %v554_v0 = vsel %vm3426_vm15, %v547_v54, %v552_v1  ;;  %1349 = vmatpush1.bf16.msra.mxu0 %v3631_v21  ;;  %1858 = vmatpush1.bf16.msra.mxu1 %v3633_v6  ;;  %v563_v39 = vshrl.u32 %v3297_v43, 16  ;;  %v2807_v43 = vld.sshfl [vmem:[%s3935_s0] sm:$0x32 pattern:$0x75316420] }
  0x61   :  { %v479_v33 = vcombine.high %v3655_v27, %v3655_v27  ;;  %v568_v19 = vshll.u32 %v3655_v27, 16  ;;  %1527 = vmatprep.subr.bf16.mxu0 %v3640_v32  ;;  %1941 = vmatprep.subr.bf16.mxu1 %v3648_v42  ;;  %v480_v54 = vcombine.high %v3659_v48, %v3659_v48  ;;  %v562_v56 = vsel %vm3426_vm15, %v555_v25, %v560_v36 }
  0x62   :  { %v1262_v2 = vrot.slane %v1234_v35, %v3228_v14  ;;  %v1271_v7 = vrot.slane %v1263_v53, %v3228_v14  ;;  %v571_v22 = vshrl.u32 %v3655_v27, 16  ;;  %v576_v1 = vshll.u32 %v3659_v48, 16 }
  0x63   :  { %v570_v41 = vsel %vm3426_vm15, %v563_v39, %v568_v19  ;;  %v579_v35 = vshrl.u32 %v3659_v48, 16  ;;  %2830 = vmatmul.mubr.msk.bf16.gmra.mrb[4].mxu0 %vm817_vm8, %v3614_v24  ;;  %2862 = vmatmul.mubr.msk.bf16.gmra.mrb[4].mxu1 %vm817_vm8, %v3614_v24  ;;  %v584_v25 = vshll.u32 %v479_v33, 16  ;;  %v587_v53 = vshrl.u32 %v479_v33, 16 }
  0x64   :  { %v1264_v50 = vcombine.low %v1255_v58, %v1262_v2  ;;  %v592_v36 = vshll.u32 %v480_v54, 16  ;;  %v1280_v42 = vcombine.low %v554_v0, %v562_v56  ;;  %1378 = vmatprep.mubr.bf16.mxu0 %v3975_v46  ;;  %1887 = vmatprep.mubr.bf16.mxu1 %v3975_v46  ;;  %v578_v2 = vsel %vm3426_vm15, %v571_v22, %v576_v1  ;;  %v2808_v39 = vld.sshfl [vmem:[%s3935_s0 + $0x8] sm:$0x32 pattern:$0x75316420] }
  0x65   :  { %v606_v19 = vcombine.high %v2807_v43, %v2807_v43  ;;  %v586_v32 = vsel %vm3426_vm15, %v579_v35, %v584_v25  ;;  %v1281_v33 = vcombine.low %v570_v41, %v578_v2  ;;  %v630_v21 = vcombine.high %v2808_v39, %v2808_v39  ;;  %v3710_v35 = vld [vmem:[#allocation2 + $0x80] ss:$8 sps:$4 sm:$0xff]   ;;  %v3715_v25 = vld [vmem:[#allocation2 + $0x94] ss:$8 sps:$4 sm:$0xff]   ;;  %v3727_v2 = vld [vmem:[#allocation2 + $0x90] ss:$8 sps:$4 sm:$0xff]  }
  0x66   :  { %v1278_v58 = vrot.slane %v1264_v50, %v3228_v14  ;;  %v594_v0 = vsel %vm3426_vm15, %v587_v53, %v592_v36  ;;  %v1289_v54 = vrot.slane %v1280_v42, %v3228_v14  ;;  %v613_v50 = vrot.slane %v2807_v43, %v3228_v14  ;;  %v3719_v36 = vld [vmem:[#allocation2 + $0x134] ss:$8 sps:$4 sm:$0xff]  }
  0x67   :  { %v1282_v56 = vcombine.low %v586_v32, %v594_v0  ;;  %v620_v6 = vrot.slane %v606_v19, %v3228_v14  ;;  %v1296_v1 = vrot.slane %v1281_v33, %v3228_v14  ;;  %v1414_v60 = vcombine.low %v3449_v47, %v3453_v52  ;;  %v2810_v33 = vld.sshfl [vmem:[%s3936_s1 + $0x8] sm:$0x32 pattern:$0x75316420] }
  0x68   :  { %v3705_v22 = vcombine.low %v1271_v7, %v1278_v58  ;;  %v621_v42 = vcombine.high %v613_v50, %v613_v50  ;;  %v644_v7 = vrot.slane %v630_v21, %v3228_v14  ;;  %v637_v53 = vrot.slane %v2808_v39, %v3228_v14 }
  0x69   :  { %v1303_v41 = vrot.slane %v1282_v56, %v3228_v14  ;;  %v622_v32 = vcombine.high %v620_v6, %v620_v6  ;;  %v1304_v43 = vcombine.low %v1289_v54, %v1296_v1  ;;  %v1436_v52 = vrot.slane %v1414_v60, %v3228_v14  ;;  %v3737_v60 = vld [vmem:[#allocation2 + $0x130] ss:$8 sps:$4 sm:$0xff]  }
  0x6a   :  { %v1412_v58 = vcombine.low %v620_v6, %v621_v42  ;;  %v1415_v39 = vcombine.low %v3462_v62, %v644_v7  ;;  %v2837_v54 = vcombine.high %v637_v53, %v644_v7  ;;  %v1462_v56 = vcombine.low %v3500_v18, %v3506_v59 }
  0x6b   :  { %v1413_v47 = vcombine.low %v622_v32, %v3439_v37  ;;  %2835 = vmatmul.mubr.msk.bf16.vlgmr.msra.gmra.mrb[0].mxu0 %vm817_vm8, %v3705_v22  ;;  %2867 = vmatmul.mubr.msk.bf16.vlgmr.msra.gmra.mrb[0].mxu1 %vm817_vm8, %v3705_v22  ;;  %v1311_v19 = vrot.slane %v1304_v43, %v3228_v14  ;;  %v1318_v21 = vrot.slane %v1303_v41, %v3228_v14  ;;  %v2809_v37 = vld.sshfl [vmem:[%s3936_s1] sm:$0x32 pattern:$0x75316420] }
  0x6c   :  { %1528 = vmatpush1.bf16.msra.mxu0 %v3710_v35  ;;  %1942 = vmatpush1.bf16.msra.mxu1 %v3712_v26  ;;  %v1422_v6 = vrot.slane %v1412_v58, %v3228_v14  ;;  %v1443_v62 = vrot.slane %v1415_v39, %v3228_v14  ;;  %v658_v1 = vcombine.high %v2809_v37, %v2809_v37 }
  0x6d   :  { %v1429_v0 = vrot.slane %v1413_v47, %v3228_v14  ;;  %1388 = vmatprep.mubr.bf16.mxu0 %v3975_v46  ;;  %1529 = vmatprep.subr.bf16.mxu0 %v3715_v25  ;;  %v3751_v41 = vcombine.low %v1311_v19, %v1318_v21  ;;  %v665_v32 = vrot.slane %v2809_v37, %v3228_v14 }
  0x6e   :  { %1897 = vmatprep.mubr.bf16.mxu1 %v3975_v46  ;;  %1943 = vmatprep.subr.bf16.mxu1 %v3719_v36  ;;  %v1445_v42 = vcombine.low %v1436_v52, %v1443_v62  ;;  %v682_v43 = vcombine.high %v2810_v33, %v2810_v33  ;;  %v2838_v7 = vcombine.high %v3500_v18, %v3506_v59 }
  0x6f   :  { %v1444_v50 = vcombine.low %v1422_v6, %v1429_v0  ;;  %v672_v53 = vrot.slane %v658_v1, %v3228_v14  ;;  %v2240_v58 = vcombine.low %v3575_v17, %v3580_v16  ;;  %v1470_v47 = vrot.slane %v2837_v54, %v3228_v14 }
  0x70   :  { %1530 = vmatpush1.bf16.msra.mxu0 %v3727_v2  ;;  %1944 = vmatpush1.bf16.msra.mxu1 %v3737_v60  ;;  %v1477_v52 = vrot.slane %v1462_v56, %v3228_v14  ;;  %v673_v19 = vcombine.high %v665_v32, %v665_v32  ;;  %v696_v37 = vrot.slane %v682_v43, %v3228_v14 }
  0x71   :  { %2010 = vmatprep.subr.bf16.mxu0 %v3204_v4  ;;  %2402 = vmatprep.subr.bf16.mxu1 %v3211_v8  ;;  %v1452_v21 = vrot.slane %v1444_v50, %v3228_v14  ;;  %v674_v39 = vcombine.high %v672_v53, %v672_v53  ;;  %v689_v18 = vrot.slane %v2810_v33, %v3228_v14 }
  0x72   :  { %v1459_v4 = vrot.slane %v1445_v42, %v3228_v14  ;;  %v2238_v8 = vcombine.low %v672_v53, %v673_v19  ;;  %v2262_v59 = vrot.slane %v2240_v58, %v3228_v14  ;;  %v2241_v16 = vcombine.low %v3588_v45, %v696_v37 }
  0x73   :  { %2836 = vmatmul.mubr.msk.bf16.gmra.mrb[4].mxu0 %vm817_vm8, %v3751_v41  ;;  %2868 = vmatmul.mubr.msk.bf16.gmra.mrb[4].mxu1 %vm817_vm8, %v3751_v41  ;;  %v2239_v17 = vcombine.low %v674_v39, %v3568_v44  ;;  %v2883_v6 = vcombine.high %v689_v18, %v696_v37  ;;  %v2288_v33 = vcombine.low %v3655_v27, %v3659_v48 }
  0x74   :  { %1559 = vmatprep.mubr.bf16.mxu0 %v3975_v46  ;;  %1973 = vmatprep.mubr.bf16.mxu1 %v3975_v46  ;;  %v2248_v0 = vrot.slane %v2238_v8, %v3228_v14  ;;  %v2884_v62 = vcombine.high %v3655_v27, %v3659_v48  ;;  %v1484_v54 = vrot.slane %v2838_v7, %v3228_v14  ;;  %v3996_v8 = vld [vmem:[#allocation8_spill] sm:$0xff] }
  0x75   :  { %v2255_v56 = vrot.slane %v2239_v17, %v3228_v14  ;;  %v2269_v50 = vrot.slane %v2241_v16, %v3228_v14  ;;  %v2296_v1 = vrot.slane %v2883_v6, %v3228_v14  ;;  %v3787_v44 = vcombine.low %v1452_v21, %v1459_v4  ;;  %v2699_v17 = vld [vmem:[#allocation4] sm:$0x3] }
  0x76   :  { %v1485_v45 = vcombine.low %v1470_v47, %v1477_v52  ;;  %v2303_v42 = vrot.slane %v2288_v33, %v3228_v14  ;;  %v2310_v32 = vrot.slane %v2884_v62, %v3228_v14  ;;  %v1499_v52 = vrot.slane %v1484_v54, %v3228_v14 }
  0x77   :  { %v2270_v43 = vcombine.low %v2248_v0, %v2255_v56  ;;  %v2271_v53 = vcombine.low %v2262_v59, %v2269_v50  ;;  %v2703_v59 = vsub.s32 0, %v3996_v8  ;;  %v2707_v16 = vsub.s32 1, %v3996_v8 }
  0x78   :  { %v2311_v58 = vcombine.low %v2296_v1, %v2303_v42  ;;  %v2325_v27 = vrot.slane %v2310_v32, %v3228_v14  ;;  %v1492_v47 = vrot.slane %v1485_v45, %v3228_v14 }
  0x79   :  { %v2278_v48 = vrot.slane %v2270_v43, %v3228_v14  ;;  %v2285_v7 = vrot.slane %v2271_v53, %v3228_v14  ;;  %v2704_v62 = vrot.slane %v2699_v17, %v2703_v59  ;;  %v2708_v1 = vrot.slane %v2699_v17, %v2707_v16 }
  0x7a   :  { %v2318_v19 = vrot.slane %v2311_v58, %v3228_v14  ;;  %v3811_v37 = vcombine.low %v1492_v47, %v1499_v52  ;;  %v3990_v14 = vld [vmem:[#allocation9_spill] sm:$0xff] }
  0x7b   :  { %2843 = vmatmul.mubr.msk.bf16.vlgmr.msra.gmra.mrb[0].mxu0 %vm817_vm8, %v3787_v44  ;;  %2873 = vmatmul.mubr.msk.bf16.vlgmr.msra.gmra.mrb[0].mxu1 %vm817_vm8, %v3787_v44  ;;  %v3803_v21 = vcombine.low %v2278_v48, %v2285_v7 }
  0x7c   :  { %2011 = vmatpush1.bf16.msra.mxu0 %v3206_v5  ;;  %2403 = vmatpush1.bf16.msra.mxu1 %v3213_v9  ;;  %v3807_v39 = vcombine.low %v2318_v19, %v2325_v27  ;;  %v3984_v5 = vld [vmem:[#allocation10_spill] sm:$0xff]  ;;  %v3985_v9 = vld [vmem:[#allocation11_spill] sm:$0xff] }
  0x7d   :  { %1569 = vmatprep.mubr.bf16.mxu0 %v3975_v46  ;;  %1983 = vmatprep.mubr.bf16.mxu1 %v3975_v46 }
  0x7e   :  { %2012 = vmatprep.subr.bf16.mxu0 %v3216_v10  ;;  %2404 = vmatprep.subr.bf16.mxu1 %v3221_v12  ;;  %v3986_v10 = vld [vmem:[#allocation12_spill] sm:$0xff]  ;;  %v3988_v12 = vld [vmem:[#allocation14_spill] sm:$0xff] }
  0x80   :  { %2013 = vmatpush1.bf16.msra.mxu0 %v3218_v11  ;;  %2405 = vmatpush1.bf16.msra.mxu1 %v3225_v13  ;;  %v3987_v11 = vld [vmem:[#allocation13_spill] sm:$0xff]  ;;  %v3989_v13 = vld [vmem:[#allocation15_spill] sm:$0xff] }
  0x81   :  { %2063 = vmatprep.subr.bf16.mxu0 %v3231_v15  ;;  %2455 = vmatprep.subr.bf16.mxu1 %v3251_v23  ;;  %v3991_v15 = vld [vmem:[#allocation16_spill] sm:$0xff]  ;;  %v3992_v23 = vld [vmem:[#allocation17_spill] sm:$0xff] }
  0x83   :  { %2844 = vmatmul.mubr.msk.bf16.gmra.mrb[4].mxu0 %vm817_vm8, %v3811_v37  ;;  %2874 = vmatmul.mubr.msk.bf16.gmra.mrb[4].mxu1 %vm817_vm8, %v3811_v37 }
  0x84   :  { %2042 = vmatprep.mubr.bf16.mxu0 %v3975_v46  ;;  %2434 = vmatprep.mubr.bf16.mxu1 %v3975_v46 }
  0x8b   :  { %2875 = vmatmul.mubr.msk.bf16.vlgmr.msra.gmra.mrb[8].mxu0 %vm817_vm8, %v3556_v61  ;;  %2887 = vmatmul.mubr.msk.bf16.vlgmr.msra.gmra.mrb[8].mxu1 %vm817_vm8, %v3556_v61 }
  0x8c   :  { %2064 = vmatpush1.bf16.msra.mxu0 %v3338_v3  ;;  %2456 = vmatpush1.bf16.msra.mxu1 %v3346_v20  ;;  %v3993_v3 = vld [vmem:[#allocation18_spill] sm:$0xff]  ;;  %v3994_v20 = vld [vmem:[#allocation19_spill] sm:$0xff] }
  0x8d   :  { %2052 = vmatprep.mubr.bf16.mxu0 %v3975_v46  ;;  %2065 = vmatprep.subr.bf16.mxu0 %v3355_v30 }
  0x8e   :  { %2444 = vmatprep.mubr.bf16.mxu1 %v3975_v46  ;;  %2457 = vmatprep.subr.bf16.mxu1 %v3357_v31 }
  0x90   :  { %2066 = vmatpush1.bf16.msra.mxu0 %v3385_v49  ;;  %2458 = vmatpush1.bf16.msra.mxu1 %v3389_v51 }
  0x91   :  { %2116 = vmatprep.subr.bf16.mxu0 %v3398_v55  ;;  %2508 = vmatprep.subr.bf16.mxu1 %v3401_v57 }
  0x93   :  { %2876 = vmatmul.mubr.msk.bf16.gmra.mrb[12].mxu0 %vm817_vm8, %v3614_v24  ;;  %2888 = vmatmul.mubr.msk.bf16.gmra.mrb[12].mxu1 %vm817_vm8, %v3614_v24 }
  0x94   :  { %2095 = vmatprep.mubr.bf16.mxu0 %v3975_v46  ;;  %2487 = vmatprep.mubr.bf16.mxu1 %v3975_v46 }
  0x9b   :  { %2877 = vmatmul.mubr.msk.bf16.vlgmr.msra.gmra.mrb[8].mxu0 %vm817_vm8, %v3353_v29  ;;  %2889 = vmatmul.mubr.msk.bf16.vlgmr.msra.gmra.mrb[8].mxu1 %vm817_vm8, %v3353_v29  ;;  %v3995_v29 = vld [vmem:[#allocation20_spill] sm:$0xff] }
  0x9c   :  { %2117 = vmatpush1.bf16.msra.mxu0 %v3480_v38  ;;  %2509 = vmatpush1.bf16.msra.mxu1 %v3482_v40 }
  0x9d   :  { %2105 = vmatprep.mubr.bf16.mxu0 %v3975_v46  ;;  %2118 = vmatprep.subr.bf16.mxu0 %v3984_v5 }
  0x9e   :  { %2497 = vmatprep.mubr.bf16.mxu1 %v3975_v46  ;;  %2510 = vmatprep.subr.bf16.mxu1 %v3985_v9 }
  0xa0   :  { %2119 = vmatpush1.bf16.msra.mxu0 %v3986_v10  ;;  %2511 = vmatpush1.bf16.msra.mxu1 %v3987_v11 }
  0xa1   :  { %2177 = vmatprep.subr.bf16.mxu0 %v3988_v12  ;;  %2569 = vmatprep.subr.bf16.mxu1 %v3989_v13 }
  0xa3   :  { %2878 = vmatmul.mubr.msk.bf16.gmra.mrb[12].mxu0 %vm817_vm8, %v3990_v14  ;;  %2890 = vmatmul.mubr.msk.bf16.gmra.mrb[12].mxu1 %vm817_vm8, %v3990_v14 }
  0xa4   :  { %2148 = vmatprep.mubr.bf16.mxu0 %v3975_v46  ;;  %2540 = vmatprep.mubr.bf16.mxu1 %v3975_v46 }
  0xab   :  { %2879 = vmatmul.mubr.msk.bf16.vlgmr.msra.gmra.mrb[8].mxu0 %vm817_vm8, %v3705_v22  ;;  %2891 = vmatmul.mubr.msk.bf16.vlgmr.msra.gmra.mrb[8].mxu1 %vm817_vm8, %v3705_v22 }
  0xac   :  { %2178 = vmatpush1.bf16.msra.mxu0 %v3592_v34  ;;  %2570 = vmatpush1.bf16.msra.mxu1 %v3597_v28 }
  0xad   :  { %2158 = vmatprep.mubr.bf16.mxu0 %v3975_v46  ;;  %2179 = vmatprep.subr.bf16.mxu0 %v3599_v63 }
  0xae   :  { %2550 = vmatprep.mubr.bf16.mxu1 %v3975_v46  ;;  %2571 = vmatprep.subr.bf16.mxu1 %v3991_v15 }
  0xb0   :  { %2180 = vmatpush1.bf16.msra.mxu0 %v3992_v23  ;;  %2572 = vmatpush1.bf16.msra.mxu1 %v3993_v3 }
  0xb1   :  { %2333 = vmatprep.subr.bf16.mxu0 %v3994_v20  ;;  %2630 = vmatprep.subr.bf16.mxu1 %v3995_v29 }
  0xb3   :  { %2880 = vmatmul.mubr.msk.bf16.gmra.mrb[12].mxu0 %vm817_vm8, %v3751_v41  ;;  %2892 = vmatmul.mubr.msk.bf16.gmra.mrb[12].mxu1 %vm817_vm8, %v3751_v41 }
  0xb4   :  { %2209 = vmatprep.mubr.bf16.mxu0 %v3975_v46  ;;  %2601 = vmatprep.mubr.bf16.mxu1 %v3975_v46 }
  0xbb   :  { %2881 = vmatmul.mubr.msk.bf16.vlgmr.msra.gmra.mrb[8].mxu0 %vm817_vm8, %v3787_v44  ;;  %2893 = vmatmul.mubr.msk.bf16.vlgmr.msra.gmra.mrb[8].mxu1 %vm817_vm8, %v3787_v44 }
  0xbc   :  { %2334 = vmatpush1.bf16.msra.mxu0 %v3710_v35  ;;  %2631 = vmatpush1.bf16.msra.mxu1 %v3712_v26 }
  0xbd   :  { %2219 = vmatprep.mubr.bf16.mxu0 %v3975_v46  ;;  %2335 = vmatprep.subr.bf16.mxu0 %v3715_v25 }
  0xbe   :  { %2611 = vmatprep.mubr.bf16.mxu1 %v3975_v46  ;;  %2632 = vmatprep.subr.bf16.mxu1 %v3719_v36 }
  0xc0   :  { %2336 = vmatpush1.bf16.msra.mxu0 %v3727_v2  ;;  %2633 = vmatpush1.bf16.msra.mxu1 %v3737_v60 }
  0xc3   :  { %2882 = vmatmul.mubr.msk.bf16.gmra.mrb[12].mxu0 %vm817_vm8, %v3811_v37  ;;  %2894 = vmatmul.mubr.msk.bf16.gmra.mrb[12].mxu1 %vm817_vm8, %v3811_v37 }
  0xc4   :  { %2365 = vmatprep.mubr.bf16.mxu0 %v3975_v46  ;;  %2662 = vmatprep.mubr.bf16.mxu1 %v3975_v46 }
  0xcb   :  { %2885 = vmatmul.mubr.msk.bf16.vlgmr.msra.gmra.mrb[8].mxu0 %vm817_vm8, %v3803_v21  ;;  %2895 = vmatmul.mubr.msk.bf16.vlgmr.msra.gmra.mrb[8].mxu1 %vm817_vm8, %v3803_v21 }
  0xcc   :  { %2375 = vmatprep.mubr.bf16.mxu0 %v3975_v46  ;;  %2672 = vmatprep.mubr.bf16.mxu1 %v3975_v46 }
  0xd3   :  { %2886 = vmatmul.mubr.msk.bf16.gmra.mrb[12].mxu0 %vm817_vm8, %v3807_v39  ;;  %2896 = vmatmul.mubr.msk.bf16.gmra.mrb[12].mxu1 %vm817_vm8, %v3807_v39 }
 0x14e   :  { %v1561_v30 = vpop.f32.mrb[0].mxu0  ;;  %v1975_v31 = vpop.f32.mrb[0].mxu1 }
 0x14f   :  { %v2002_v49 = vmax.f32 %v1561_v30, %v1975_v31  ;;  %v1563_v51 = vpop.f32.mrb[1].mxu0  ;;  %v1977_v55 = vpop.f32.mrb[1].mxu1 }
 0x150   :  { %v2003_v57 = vmax.f32 %v1563_v51, %v1977_v55  ;;  %v1565_v38 = vpop.f32.mrb[2].mxu0  ;;  %v1979_v40 = vpop.f32.mrb[2].mxu1 }
 0x151   :  { %v2004_v61 = vmax.f32 %v1565_v38, %v1979_v40  ;;  %v1567_v34 = vpop.f32.mrb[3].mxu0  ;;  %v1981_v28 = vpop.f32.mrb[3].mxu1 }
 0x152   :  { %v2005_v63 = vmax.f32 %v1567_v34, %v1981_v28 }
 0x156   :  { %v1571_v24 = vpop.f32.mrb[4].mxu0  ;;  %v1985_v46 = vpop.f32.mrb[4].mxu1 }
 0x157   :  { %v2006_v22 = vmax.f32 %v1571_v24, %v1985_v46  ;;  %v1573_v35 = vpop.f32.mrb[5].mxu0  ;;  %v1987_v26 = vpop.f32.mrb[5].mxu1 }
 0x158   :  { %v2007_v25 = vmax.f32 %v1573_v35, %v1987_v26  ;;  %v1575_v36 = vpop.f32.mrb[6].mxu0  ;;  %v1989_v2 = vpop.f32.mrb[6].mxu1 }
 0x159   :  { %v2008_v60 = vmax.f32 %v1575_v36, %v1989_v2  ;;  %v1577_v41 = vpop.f32.mrb[7].mxu0  ;;  %v1991_v18 = vpop.f32.mrb[7].mxu1 }
 0x15a   :  { %v2009_v4 = vmax.f32 %v1577_v41, %v1991_v18 }
 0x19e   :  { %v2367_v6 = vpop.f32.mrb[8].mxu0  ;;  %v2664_v0 = vpop.f32.mrb[8].mxu1 }
 0x19f   :  { %v2394_v33 = vmax.f32 %v2002_v49, %v2367_v6  ;;  %v2369_v54 = vpop.f32.mrb[9].mxu0  ;;  %v2666_v56 = vpop.f32.mrb[9].mxu1 }
 0x1a0   :  { %v2395_v50 = vmax.f32 %v2003_v57, %v2369_v54  ;;  %v2371_v44 = vpop.f32.mrb[10].mxu0  ;;  %v2668_v45 = vpop.f32.mrb[10].mxu1 }
 0x1a1   :  { %v2691_v42 = vmax.f32 %v2394_v33, %v2664_v0  ;;  %v2396_v32 = vmax.f32 %v2004_v61, %v2371_v44  ;;  %v2373_v43 = vpop.f32.mrb[11].mxu0  ;;  %v2670_v53 = vpop.f32.mrb[11].mxu1 }
 0x1a2   :  { %v2692_v58 = vmax.f32 %v2395_v50, %v2666_v56  ;;  %v2397_v27 = vmax.f32 %v2005_v63, %v2373_v43 }
 0x1a3   :  { %v2711_v48 = vadd.f32 %v2704_v62, %v2691_v42  ;;  %v2693_v7 = vmax.f32 %v2396_v32, %v2668_v45 }
 0x1a4   :  { %v2712_v47 = vadd.f32 %v2708_v1, %v2692_v58  ;;  %v2694_v52 = vmax.f32 %v2397_v27, %v2670_v53 }
 0x1a5   :  { %v2719_v19 = vmax.f32 %v2711_v48, 0.0  ;;  %v2713_v21 = vadd.f32 %v2704_v62, %v2693_v7 }
 0x1a6   :  { %v2720_v39 = vmax.f32 %v2712_v47, 0.0  ;;  %v2714_v37 = vadd.f32 %v2708_v1, %v2694_v52  ;;  %v2377_v5 = vpop.f32.mrb[12].mxu0  ;;  %v2674_v9 = vpop.f32.mrb[12].mxu1 }
 0x1a7   :  { %v2721_v11 = vmax.f32 %v2713_v21, 0.0  ;;  %v2398_v12 = vmax.f32 %v2006_v22, %v2377_v5  ;;  %v2379_v13 = vpop.f32.mrb[13].mxu0  ;;  %v2676_v14 = vpop.f32.mrb[13].mxu1 }
 0x1a8   :  { %v2901_v15 = vpack.c.bf16 %v2720_v39, %v2719_v19  ;;  %v2722_v23 = vmax.f32 %v2714_v37, 0.0  ;;  %v2399_v3 = vmax.f32 %v2007_v25, %v2379_v13  ;;  %v2381_v20 = vpop.f32.mrb[14].mxu0  ;;  %v2678_v29 = vpop.f32.mrb[14].mxu1 }
 0x1a9   :  { %v2695_v30 = vmax.f32 %v2398_v12, %v2674_v9  ;;  %v2400_v31 = vmax.f32 %v2008_v60, %v2381_v20  ;;  %v2383_v49 = vpop.f32.mrb[15].mxu0  ;;  %v2680_v51 = vpop.f32.mrb[15].mxu1 }
 0x1aa   :  { %2754 = vst.msk [vmem:[%s3939_s4] sm:$0xff] %vm3913_vm2, %v2901_v15  ;;  %v2902_v55 = vpack.c.bf16 %v2722_v23, %v2721_v11  ;;  %v2696_v57 = vmax.f32 %v2399_v3, %v2676_v14  ;;  %v2401_v38 = vmax.f32 %v2009_v4, %v2383_v49 }
 0x1ab   :  { %v2715_v40 = vadd.f32 %v2704_v62, %v2695_v30  ;;  %v2697_v61 = vmax.f32 %v2400_v31, %v2678_v29 }
 0x1ac   :  { %2755 = vst.msk [vmem:[%s3939_s4 + $0x8] sm:$0xff] %vm3913_vm2, %v2902_v55  ;;  %v2716_v34 = vadd.f32 %v2708_v1, %v2696_v57  ;;  %v2698_v28 = vmax.f32 %v2401_v38, %v2680_v51 }
 0x1ad   :  { %v2723_v63 = vmax.f32 %v2715_v40, 0.0  ;;  %v2717_v24 = vadd.f32 %v2704_v62, %v2697_v61 }
 0x1ae   :  { %v2724_v46 = vmax.f32 %v2716_v34, 0.0  ;;  %v2718_v22 = vadd.f32 %v2708_v1, %v2698_v28 }
 0x1af   :  { %v2725_v35 = vmax.f32 %v2717_v24, 0.0 }
 0x1b0   :  { %v2903_v26 = vpack.c.bf16 %v2724_v46, %v2723_v63  ;;  %v2726_v25 = vmax.f32 %v2718_v22, 0.0 }
 0x1b2   :  { %2756 = vst.msk [vmem:[%s3939_s4 + $0x10] sm:$0xff] %vm3913_vm2, %v2903_v26  ;;  %v2904_v36 = vpack.c.bf16 %v2726_v25, %v2725_v35 }
 0x1b4   :  { %2760 = vst.msk [vmem:[%s3939_s4 + $0x18] sm:$0x33] %vm2759_vm5, %v2904_v36 }
 0x1b5   :  { %2765 = vsyncpa [#allocation3], 1 }
 0x1b6   :  { %2766 = vsyncpa [#allocation5], 1 }

// kernel: cnn_forward.4
= control target key start
LH: loop header
LB: loop body
LE: loop exit
PB: predicated region body
PF: predicated region fallthrough
CT: control target
= control target key end

     0   :  { %9 = vsyncpa [#allocation3], 0  ;;  %s7154_s0 = inlined_call_operand.vmem [shape: bf16[2,9,288], index: 0, kind: input, shape index: {}]   ;;  %s7155_s1 = inlined_call_operand.vmem [shape: bf16[2,9,288], index: 1, kind: input, shape index: {}]   ;;  %s7156_s2 = inlined_call_operand.hbm [shape: bf16[10,288,224], index: 2, kind: input, shape index: {}]   ;;  %s7157_s3 = inlined_call_operand.hbm [shape: f32[1,224], index: 3, kind: input, shape index: {}]   ;;  %s7158_s4 = inlined_call_operand.vmem [shape: f32[14,224], index: 4, kind: output, shape index: {}]  }
   0x1   :  { %10 = vsyncpa [#allocation5], 0  ;;  %s6422_s15 = smov [#allocation2]   ;;  %s6374_s19 = scalar_lea.hbm %s7156_s2, 46080 }
   0x2   :  { %s20_s16 = sshll.u32 %s6422_s15, 4  ;;  %p6375_p0 = scmp.ne.s32.totalorder %s7156_s2, %s6374_s19  ;;  %s21_s16 = int_to_ptr.vmem [resolvable:$true] %s20_s16 }
   0x3   :  { %p6378_p1 = scmp.lt.u32.totalorder %s6374_s19, %s7156_s2 }
   0x5   :  { %p6380_p2 = pnand %p6378_p1, %p6375_p0 }
   0x7   :  { %6383 = shalt.err (!%p6380_p2)
}
   0x8   :  { %s6384_s24 = scalar_lea.vmem %s21_s16, 46080  ;;  %p6389_p4 = scmp.lt.s32.totalorder %s21_s16, %s21_s16 }
   0x9   :  { %p6385_p3 = scmp.ne.s32.totalorder %s21_s16, %s6384_s24  ;;  %p6390_p5 = scmp.lt.s32.totalorder %s6384_s24, %s6384_s24 }
   0xb   :  { %p6391_p6 = por %p6390_p5, %p6389_p4 }
   0xd   :  { %p6392_p7 = pnand %p6391_p6, %p6385_p3 }
   0xf   :  { %6395 = shalt.err (!%p6392_p7)
}
  0x10   :  { %s6423_s25 = smov 128   ;;  %s6424_s26 = smov 8  }
  0x11   :  { %26 = dma.hbm_to_vmem [thread:$0]  %s7156_s2, 46080, %s21_s16, [#allocation3], %s6423_s25, %s6423_s25, %s6424_s26  }
  0x12   :  { %s6425_s29 = smov [#allocation4]   ;;  %s6396_s7 = scalar_lea.hbm %s7157_s3, 32 }
  0x13   :  { %s33_s30 = sshll.u32 %s6425_s29, 4  ;;  %p6397_p8 = scmp.ne.s32.totalorder %s7157_s3, %s6396_s7  ;;  %s34_s30 = int_to_ptr.vmem [resolvable:$true] %s33_s30 }
  0x14   :  { %p6400_p9 = scmp.lt.u32.totalorder %s6396_s7, %s7157_s3 }
  0x16   :  { %p6402_p10 = pnand %p6400_p9, %p6397_p8 }
  0x18   :  { %6405 = shalt.err (!%p6402_p10)
}
  0x19   :  { %s6406_s12 = scalar_lea.vmem %s34_s30, 32  ;;  %p6411_p12 = scmp.lt.s32.totalorder %s34_s30, %s34_s30 }
  0x1a   :  { %p6407_p11 = scmp.ne.s32.totalorder %s34_s30, %s6406_s12  ;;  %p6412_p13 = scmp.lt.s32.totalorder %s6406_s12, %s6406_s12 }
  0x1c   :  { %p6413_p0 = por %p6412_p13, %p6411_p12 }
  0x1e   :  { %p6414_p1 = pnand %p6413_p0, %p6407_p11 }
  0x20   :  { %6417 = shalt.err (!%p6414_p1)
}
  0x21   :  { %36 = dma.hbm_to_vmem [thread:$0]  %s7157_s3, 32, %s34_s30, [#allocation5]  }
  0x22   :  { %6418 = dma.done.wait [#allocation3], 46080  }
  0x23   :  { %6419 = vsyncadd [#allocation3], 4294921216 }
  0x24   :  { %6420 = dma.done.wait [#allocation5], 32  }
  0x25   :  { %6421 = vsyncadd [#allocation5], 4294967264  ;;  %v5522_v0 = vld [vmem:[#allocation2 + $0x124] ss:$8 sps:$4 sm:$0xff]   ;;  %v5526_v2 = vld [vmem:[#allocation2 + $0x120] ss:$8 sps:$4 sm:$0xff]   ;;  %v71_v41 = vlaneseq }
  0x26   :  { %v5524_v1 = vld [vmem:[#allocation2 + $0x6c4] ss:$8 sps:$4 sm:$0xff]   ;;  %828 = vmatprep.subr.bf16.mxu0 %v5522_v0  ;;  %v5527_v3 = vld [vmem:[#allocation2 + $0x6c0] ss:$8 sps:$4 sm:$0xff]   ;;  %v5528_v4 = vld [vmem:[#allocation2 + $0x134] ss:$8 sps:$4 sm:$0xff]  }
  0x27   :  { %2667 = vmatprep.subr.bf16.mxu1 %v5524_v1  ;;  %829 = vmatpush1.bf16.msra.mxu0 %v5526_v2  ;;  %v5530_v5 = vld [vmem:[#allocation2 + $0x6d4] ss:$8 sps:$4 sm:$0xff]   ;;  %v5532_v6 = vld [vmem:[#allocation2 + $0x130] ss:$8 sps:$4 sm:$0xff]   ;;  %v5534_v8 = vld [vmem:[#allocation2 + $0x144] ss:$8 sps:$4 sm:$0xff]  }
  0x28   :  { %2668 = vmatpush1.bf16.msra.mxu1 %v5527_v3  ;;  %830 = vmatprep.subr.bf16.mxu0 %v5528_v4  ;;  %v5533_v7 = vld [vmem:[#allocation2 + $0x6d0] ss:$8 sps:$4 sm:$0xff]   ;;  %v5536_v9 = vld [vmem:[#allocation2 + $0x6e4] ss:$8 sps:$4 sm:$0xff]   ;;  %v5538_v10 = vld [vmem:[#allocation2 + $0x140] ss:$8 sps:$4 sm:$0xff]  }
  0x29   :  { %2669 = vmatprep.subr.bf16.mxu1 %v5530_v5  ;;  %v5539_v11 = vld [vmem:[#allocation2 + $0x6e0] ss:$8 sps:$4 sm:$0xff]   ;;  %v5540_v12 = vld [vmem:[#allocation2 + $0x154] ss:$8 sps:$4 sm:$0xff]   ;;  %v5544_v14 = vld [vmem:[#allocation2 + $0x150] ss:$8 sps:$4 sm:$0xff]  }
  0x2a   :  { %v5542_v13 = vld [vmem:[#allocation2 + $0x6f4] ss:$8 sps:$4 sm:$0xff]   ;;  %v5545_v15 = vld [vmem:[#allocation2 + $0x6f0] ss:$8 sps:$4 sm:$0xff]   ;;  %v5546_v16 = vld [vmem:[#allocation2 + $0x164] ss:$8 sps:$4 sm:$0xff]  }
  0x2b   :  { %831 = vmatpush1.bf16.msra.mxu0 %v5532_v6  ;;  %v5548_v17 = vld [vmem:[#allocation2 + $0x704] ss:$8 sps:$4 sm:$0xff]   ;;  %v5550_v18 = vld [vmem:[#allocation2 + $0x160] ss:$8 sps:$4 sm:$0xff]   ;;  %v5552_v20 = vld [vmem:[#allocation2 + $0x174] ss:$8 sps:$4 sm:$0xff]  }
  0x2c   :  { %2670 = vmatpush1.bf16.msra.mxu1 %v5533_v7  ;;  %832 = vmatprep.subr.bf16.mxu0 %v5534_v8  ;;  %v5551_v19 = vld [vmem:[#allocation2 + $0x700] ss:$8 sps:$4 sm:$0xff]   ;;  %v5554_v21 = vld [vmem:[#allocation2 + $0x714] ss:$8 sps:$4 sm:$0xff]   ;;  %v5556_v22 = vld [vmem:[#allocation2 + $0x170] ss:$8 sps:$4 sm:$0xff]  }
  0x2d   :  { %2671 = vmatprep.subr.bf16.mxu1 %v5536_v9  ;;  %v5557_v23 = vld [vmem:[#allocation2 + $0x710] ss:$8 sps:$4 sm:$0xff]   ;;  %v5558_v24 = vld [vmem:[#allocation2 + $0x184] ss:$8 sps:$4 sm:$0xff]   ;;  %v5562_v26 = vld [vmem:[#allocation2 + $0x180] ss:$8 sps:$4 sm:$0xff]  }
  0x2e   :  { %v5560_v25 = vld [vmem:[#allocation2 + $0x724] ss:$8 sps:$4 sm:$0xff]   ;;  %v5563_v27 = vld [vmem:[#allocation2 + $0x720] ss:$8 sps:$4 sm:$0xff]   ;;  %v5564_v28 = vld [vmem:[#allocation2 + $0x194] ss:$8 sps:$4 sm:$0xff]  }
  0x2f   :  { %833 = vmatpush1.bf16.msra.mxu0 %v5538_v10  ;;  %v5566_v29 = vld [vmem:[#allocation2 + $0x734] ss:$8 sps:$4 sm:$0xff]   ;;  %v5568_v30 = vld [vmem:[#allocation2 + $0x190] ss:$8 sps:$4 sm:$0xff]   ;;  %v5570_v32 = vld [vmem:[#allocation2 + $0x1a4] ss:$8 sps:$4 sm:$0xff]  }
  0x30   :  { %2672 = vmatpush1.bf16.msra.mxu1 %v5539_v11  ;;  %834 = vmatprep.subr.bf16.mxu0 %v5540_v12  ;;  %v5569_v31 = vld [vmem:[#allocation2 + $0x730] ss:$8 sps:$4 sm:$0xff]   ;;  %v5572_v33 = vld [vmem:[#allocation2 + $0x744] ss:$8 sps:$4 sm:$0xff]   ;;  %v5574_v34 = vld [vmem:[#allocation2 + $0x1a0] ss:$8 sps:$4 sm:$0xff]  }
  0x31   :  { %2673 = vmatprep.subr.bf16.mxu1 %v5542_v13  ;;  %v5575_v35 = vld [vmem:[#allocation2 + $0x740] ss:$8 sps:$4 sm:$0xff]   ;;  %v5576_v36 = vld [vmem:[#allocation2 + $0x1b4] ss:$8 sps:$4 sm:$0xff]   ;;  %v5580_v38 = vld [vmem:[#allocation2 + $0x1b0] ss:$8 sps:$4 sm:$0xff]  }
  0x32   :  { %v5578_v37 = vld [vmem:[#allocation2 + $0x754] ss:$8 sps:$4 sm:$0xff]   ;;  %v6426_v39 = vmov 1966171168   ;;  %v5581_v42 = vld [vmem:[#allocation2 + $0x750] ss:$8 sps:$4 sm:$0xff]  }
  0x33   :  { %835 = vmatpush1.bf16.msra.mxu0 %v5544_v14  ;;  %v69_v40 = vunpack.c.l.s4 %v6426_v39  ;;  %v5582_v43 = vld [vmem:[#allocation2 + $0x1c4] ss:$8 sps:$4 sm:$0xff]   ;;  %v5586_v45 = vld [vmem:[#allocation2 + $0x1c0] ss:$8 sps:$4 sm:$0xff]   ;;  %v6477_v48 = vshrl.u32 %v71_v41, 7  ;;  %vm824_vm0 = vcmask 261120  }
  0x34   :  { %2674 = vmatpush1.bf16.msra.mxu1 %v5545_v15  ;;  %836 = vmatprep.subr.bf16.mxu0 %v5546_v16  ;;  %v5584_v44 = vld [vmem:[#allocation2 + $0x764] ss:$8 sps:$4 sm:$0xff]   ;;  %v5587_v46 = vld [vmem:[#allocation2 + $0x760] ss:$8 sps:$4 sm:$0xff]   ;;  %v5588_v49 = vld [vmem:[#allocation2 + $0x1d4] ss:$8 sps:$4 sm:$0xff]  }
  0x35   :  { %2675 = vmatprep.subr.bf16.mxu1 %v5548_v17  ;;  %v70_v47 = vunpack.c.0.s8 %v69_v40  ;;  %7183 = vst [vmem:[#allocation8_spill] sm:$0xff] %v6477_v48  ;;  %v5590_v50 = vld [vmem:[#allocation2 + $0x774] ss:$8 sps:$4 sm:$0xff]   ;;  %v5592_v51 = vld [vmem:[#allocation2 + $0x1d0] ss:$8 sps:$4 sm:$0xff]   ;;  %vm4935_vm1 = vcmask 785408  }
  0x36   :  { %v5593_v52 = vld [vmem:[#allocation2 + $0x770] ss:$8 sps:$4 sm:$0xff]   ;;  %v5594_v53 = vld [vmem:[#allocation2 + $0x1e4] ss:$8 sps:$4 sm:$0xff]   ;;  %v5598_v2 = vld [vmem:[#allocation2 + $0x1e0] ss:$8 sps:$4 sm:$0xff]  }
  0x37   :  { %837 = vmatpush1.bf16.msra.mxu0 %v5550_v18  ;;  %v6480_v54 = vsub.s32 %v70_v47, %v6477_v48  ;;  %v4950_v55 = vld.sshfl [vmem:[%s7155_s1] sm:$0xff pattern:$0x75316420]  ;;  %v4952_v56 = vld.sshfl [vmem:[%s7155_s1 + $0x18] sm:$0xff pattern:$0x75316420] }
  0x38   :  { %2676 = vmatpush1.bf16.msra.mxu1 %v5551_v19  ;;  %838 = vmatprep.subr.bf16.mxu0 %v5552_v20  ;;  %v4951_v57 = vld.sshfl [vmem:[%s7155_s1 + $0x8] sm:$0x33 pattern:$0x75316420]  ;;  %v5596_v58 = vld [vmem:[#allocation2 + $0x784] ss:$8 sps:$4 sm:$0xff]  }
  0x39   :  { %2677 = vmatprep.subr.bf16.mxu1 %v5554_v21  ;;  %v4953_v59 = vld.sshfl [vmem:[%s7155_s1 + $0x20] sm:$0x33 pattern:$0x75316420]  ;;  %v152_v60 = vcombine.low %v4950_v55, %v4951_v57  ;;  %v153_v61 = vcombine.high %v4950_v55, %v4951_v57  ;;  %v5599_v3 = vld [vmem:[#allocation2 + $0x780] ss:$8 sps:$4 sm:$0xff]  }
  0x3a   :  { %v184_v62 = vcombine.low %v4952_v56, %v4953_v59  ;;  %v185_v63 = vcombine.high %v4952_v56, %v4953_v59  ;;  %v5600_v6 = vld [vmem:[#allocation2 + $0x1f4] ss:$8 sps:$4 sm:$0xff]   ;;  %v5604_v16 = vld [vmem:[#allocation2 + $0x1f0] ss:$8 sps:$4 sm:$0xff]   ;;  %v5606_v21 = vld [vmem:[#allocation2 + $0x204] ss:$8 sps:$4 sm:$0xff]  }
  0x3b   :  { %839 = vmatpush1.bf16.msra.mxu0 %v5556_v22  ;;  %v6495_v0 = vrot.slane %v152_v60, %v6480_v54  ;;  %v6498_v1 = vrot.slane %v153_v61, %v6480_v54  ;;  %v5602_v7 = vld [vmem:[#allocation2 + $0x794] ss:$8 sps:$4 sm:$0xff]   ;;  %v5605_v17 = vld [vmem:[#allocation2 + $0x790] ss:$8 sps:$4 sm:$0xff]   ;;  %v5608_v22 = vld [vmem:[#allocation2 + $0x7a4] ss:$8 sps:$4 sm:$0xff]  }
  0x3c   :  { %2678 = vmatpush1.bf16.msra.mxu1 %v5557_v23  ;;  %840 = vmatprep.subr.bf16.mxu0 %v5558_v24  ;;  %v6501_v4 = vrot.slane %v184_v62, %v6480_v54  ;;  %v6504_v5 = vrot.slane %v185_v63, %v6480_v54  ;;  %v5616_v40 = vld [vmem:[#allocation2 + $0x210] ss:$8 sps:$4 sm:$0xff]   ;;  %v5632_v56 = vld [vmem:[#allocation2 + $0x4] ss:$8 sps:$4 sm:$0xff]   ;;  %v5630_v60 = vld [vmem:[#allocation2] ss:$8 sps:$4 sm:$0xff]  }
  0x3d   :  { %2679 = vmatprep.subr.bf16.mxu1 %v5560_v25  ;;  %v6508_v8 = vcombine.high %v6495_v0, %v6495_v0  ;;  %v6512_v9 = vcombine.high %v6498_v1, %v6498_v1  ;;  %v576_v10 = vcombine.low %v6495_v0, %v6498_v1  ;;  %v5617_v41 = vld [vmem:[#allocation2 + $0x7b0] ss:$8 sps:$4 sm:$0xff]   ;;  %v5635_v57 = vld [vmem:[#allocation2 + $0x5a4] ss:$8 sps:$4 sm:$0xff]   ;;  %v5633_v61 = vld [vmem:[#allocation2 + $0x5a0] ss:$8 sps:$4 sm:$0xff]  }
  0x3e   :  { %v6518_v11 = vcombine.high %v6501_v4, %v6501_v4  ;;  %v6522_v12 = vcombine.high %v6504_v5, %v6504_v5  ;;  %v210_v13 = vunpack.i.h.s16 %v6501_v4  ;;  %v212_v14 = vunpack.i.h.s16 %v6504_v5  ;;  %v5627_v55 = vld [vmem:[#allocation2 + $0x7d0] ss:$8 sps:$4 sm:$0xff]   ;;  %v5638_v62 = vld [vmem:[#allocation2 + $0x14] ss:$8 sps:$4 sm:$0xff]   ;;  %v6062_v48 = vld [vmem:[#allocation2 + $0x124] ss:$8 sps:$4 sm:$0xff]  }
  0x3f   :  { %841 = vmatpush1.bf16.msra.mxu0 %v5562_v26  ;;  %v4970_v15 = vpack.i.b16 %v6501_v4, %v6512_v9  ;;  %v585_v24 = vrot.slane %v576_v10, %v6480_v54  ;;  %v5641_v63 = vld [vmem:[#allocation2 + $0x5b4] ss:$8 sps:$4 sm:$0xff]   ;;  %v5642_v10 = vld [vmem:[#allocation2 + $0x20] ss:$8 sps:$4 sm:$0xff]   ;;  %vm4938_vm2 = vcmask 783360  }
  0x40   :  { %2680 = vmatpush1.bf16.msra.mxu1 %v5563_v27  ;;  %842 = vmatprep.subr.bf16.mxu0 %v5564_v28  ;;  %v214_v18 = vunpack.i.h.s16 %v6518_v11  ;;  %v4971_v19 = vpack.i.b16 %v6504_v5, %v210_v13  ;;  %v4972_v20 = vpack.i.b16 %v6518_v11, %v212_v14  ;;  %v5610_v28 = vld [vmem:[#allocation2 + $0x200] ss:$8 sps:$4 sm:$0xff]  }
  0x41   :  { %2681 = vmatprep.subr.bf16.mxu1 %v5566_v29  ;;  %v577_v23 = vcombine.low %v6508_v8, %v4970_v15  ;;  %v5611_v29 = vld [vmem:[#allocation2 + $0x7a0] ss:$8 sps:$4 sm:$0xff]   ;;  %v5650_v15 = vld [vmem:[#allocation2 + $0x34] ss:$8 sps:$4 sm:$0xff]  }
  0x42   :  { %v4973_v25 = vpack.i.b16 %v6522_v12, %v214_v18  ;;  %v578_v26 = vcombine.low %v4971_v19, %v4972_v20  ;;  %v5645_v14 = vld [vmem:[#allocation2 + $0x5c0] ss:$8 sps:$4 sm:$0xff]   ;;  %v5651_v18 = vld [vmem:[#allocation2 + $0x5d0] ss:$8 sps:$4 sm:$0xff]   ;;  %v5656_v19 = vld [vmem:[#allocation2 + $0x44] ss:$8 sps:$4 sm:$0xff]  }
  0x43   :  { %843 = vmatpush1.bf16.msra.mxu0 %v5568_v30  ;;  %v592_v27 = vrot.slane %v577_v23, %v6480_v54  ;;  %v5659_v20 = vld [vmem:[#allocation2 + $0x5e4] ss:$8 sps:$4 sm:$0xff]   ;;  %v5662_v23 = vld [vmem:[#allocation2 + $0x54] ss:$8 sps:$4 sm:$0xff]   ;;  %v5834_v4 = vld [vmem:[#allocation2 + $0x340] ss:$8 sps:$4 sm:$0xff]  }
  0x44   :  { %2682 = vmatpush1.bf16.msra.mxu1 %v5569_v31  ;;  %844 = vmatprep.subr.bf16.mxu0 %v5570_v32  ;;  %v599_v30 = vrot.slane %v578_v26, %v6480_v54  ;;  %v606_v31 = vrot.slane %v4973_v25, %v6480_v54  ;;  %v5612_v32 = vld [vmem:[#allocation2 + $0x214] ss:$8 sps:$4 sm:$0xff]   ;;  %v4948_v26 = vld.sshfl [vmem:[%s7154_s0 + $0x18] sm:$0xff pattern:$0x75316420] }
  0x45   :  { %2683 = vmatprep.subr.bf16.mxu1 %v5572_v33  ;;  %v5614_v33 = vld [vmem:[#allocation2 + $0x7b4] ss:$8 sps:$4 sm:$0xff]  }
  0x46   :  { %v4946_v25 = vld.sshfl [vmem:[%s7154_s0] sm:$0xff pattern:$0x75316420] }
  0x47   :  { %845 = vmatpush1.bf16.msra.mxu0 %v5574_v34  ;;  %v608_v34 = vcombine.high %v585_v24, %v592_v27 }
  0x48   :  { %2684 = vmatpush1.bf16.msra.mxu1 %v5575_v35  ;;  %846 = vmatprep.subr.bf16.mxu0 %v5576_v36  ;;  %v607_v35 = vcombine.low %v585_v24, %v592_v27  ;;  %v610_v36 = vcombine.high %v599_v30, %v606_v31  ;;  %v5665_v24 = vld [vmem:[#allocation2 + $0x5f4] ss:$8 sps:$4 sm:$0xff]   ;;  %v4947_v27 = vld.sshfl [vmem:[%s7154_s0 + $0x8] sm:$0x33 pattern:$0x75316420] }
  0x49   :  { %2685 = vmatprep.subr.bf16.mxu1 %v5578_v37  ;;  %v609_v37 = vcombine.low %v599_v30, %v606_v31  ;;  %v66_v30 = vcombine.low %v4946_v25, %v4947_v27  ;;  %v67_v31 = vcombine.high %v4946_v25, %v4947_v27  ;;  %v5687_v27 = vld [vmem:[#allocation2 + $0x630] ss:$8 sps:$4 sm:$0xff]  }
  0x4a   :  { %v617_v39 = vrot.slane %v607_v35, %v6480_v54 }
  0x4b   :  { %847 = vmatpush1.bf16.msra.mxu0 %v5580_v38  ;;  %v624_v38 = vrot.slane %v608_v34, %v6480_v54 }
  0x4c   :  { %2686 = vmatpush1.bf16.msra.mxu1 %v5581_v42  ;;  %848 = vmatprep.subr.bf16.mxu0 %v5582_v43  ;;  %v638_v42 = vrot.slane %v610_v36, %v6480_v54  ;;  %v631_v43 = vrot.slane %v609_v37, %v6480_v54  ;;  %v5671_v36 = vld [vmem:[#allocation2 + $0x604] ss:$8 sps:$4 sm:$0xff]   ;;  %v6572_v37 = vrot.slane %v66_v30, %v6480_v54 }
  0x4d   :  { %2687 = vmatprep.subr.bf16.mxu1 %v5584_v44  ;;  %v5620_v44 = vld [vmem:[#allocation2 + $0x224] ss:$8 sps:$4 sm:$0xff]  }
  0x4e   :  { %v6545_v47 = vcombine.low %v617_v39, %v631_v43  ;;  %v6553_v59 = vcombine.high %v617_v39, %v631_v43  ;;  %v6585_v43 = vcombine.high %v6572_v37, %v6572_v37  ;;  %v5695_v30 = vld [vmem:[#allocation2 + $0x644] ss:$8 sps:$4 sm:$0xff]  }
  0x4f   :  { %849 = vmatpush1.bf16.msra.mxu0 %v5586_v45  ;;  %v6543_v45 = vcombine.low %v624_v38, %v638_v42  ;;  %v6575_v38 = vrot.slane %v67_v31, %v6480_v54  ;;  %v5669_v42 = vld [vmem:[#allocation2 + $0x600] ss:$8 sps:$4 sm:$0xff]  }
  0x50   :  { %2688 = vmatpush1.bf16.msra.mxu1 %v5587_v46  ;;  %850 = vmatprep.subr.bf16.mxu0 %v5588_v49  ;;  %v5623_v46 = vld [vmem:[#allocation2 + $0x7c4] ss:$8 sps:$4 sm:$0xff]   ;;  %v5618_v49 = vld [vmem:[#allocation2 + $0x220] ss:$8 sps:$4 sm:$0xff]  }
  0x51   :  { %2689 = vmatprep.subr.bf16.mxu1 %v5590_v50  ;;  %v5621_v50 = vld [vmem:[#allocation2 + $0x7c0] ss:$8 sps:$4 sm:$0xff]   ;;  %860 = vmatprep.mubr.bf16.mxu0 %v6543_v45 }
  0x52   :  { %2699 = vmatprep.mubr.bf16.mxu1 %v6543_v45  ;;  %v5690_v31 = vld [vmem:[#allocation2 + $0xa0] ss:$8 sps:$4 sm:$0xff]  }
  0x53   :  { %851 = vmatpush1.bf16.msra.mxu0 %v5592_v51  ;;  %v5626_v51 = vld [vmem:[#allocation2 + $0x234] ss:$8 sps:$4 sm:$0xff]  }
  0x54   :  { %2690 = vmatpush1.bf16.msra.mxu1 %v5593_v52  ;;  %852 = vmatprep.subr.bf16.mxu0 %v5594_v53  ;;  %v5629_v52 = vld [vmem:[#allocation2 + $0x7d4] ss:$8 sps:$4 sm:$0xff]   ;;  %v5624_v53 = vld [vmem:[#allocation2 + $0x230] ss:$8 sps:$4 sm:$0xff]  }
  0x55   :  { %2691 = vmatprep.subr.bf16.mxu1 %v5596_v58  ;;  %v7165_v58 = vmov 0  }
  0x57   :  { %853 = vmatpush1.bf16.msra.mxu0 %v5598_v2  ;;  %v5636_v2 = vld [vmem:[#allocation2 + $0x10] ss:$8 sps:$4 sm:$0xff]  }
  0x58   :  { %2692 = vmatpush1.bf16.msra.mxu1 %v5599_v3  ;;  %854 = vmatprep.subr.bf16.mxu0 %v5600_v6  ;;  %v5639_v3 = vld [vmem:[#allocation2 + $0x5b0] ss:$8 sps:$4 sm:$0xff]   ;;  %v5644_v6 = vld [vmem:[#allocation2 + $0x24] ss:$8 sps:$4 sm:$0xff]  }
  0x59   :  { %2693 = vmatprep.subr.bf16.mxu1 %v5602_v7  ;;  %v5647_v7 = vld [vmem:[#allocation2 + $0x5c4] ss:$8 sps:$4 sm:$0xff]  }
  0x5b   :  { %855 = vmatpush1.bf16.msra.mxu0 %v5604_v16  ;;  %v5653_v16 = vld [vmem:[#allocation2 + $0x5d4] ss:$8 sps:$4 sm:$0xff]  }
  0x5c   :  { %2694 = vmatpush1.bf16.msra.mxu1 %v5605_v17  ;;  %856 = vmatprep.subr.bf16.mxu0 %v5606_v21  ;;  %v5648_v17 = vld [vmem:[#allocation2 + $0x30] ss:$8 sps:$4 sm:$0xff]   ;;  %v5654_v21 = vld [vmem:[#allocation2 + $0x40] ss:$8 sps:$4 sm:$0xff]  }
  0x5d   :  { %2695 = vmatprep.subr.bf16.mxu1 %v5608_v22  ;;  %v5657_v22 = vld [vmem:[#allocation2 + $0x5e0] ss:$8 sps:$4 sm:$0xff]  }
  0x5f   :  { %857 = vmatpush1.bf16.msra.mxu0 %v5610_v28  ;;  %v5660_v28 = vld [vmem:[#allocation2 + $0x50] ss:$8 sps:$4 sm:$0xff]  }
  0x60   :  { %2696 = vmatpush1.bf16.msra.mxu1 %v5611_v29  ;;  %858 = vmatprep.subr.bf16.mxu0 %v5612_v32  ;;  %v4949_v29 = vld.sshfl [vmem:[%s7154_s0 + $0x20] sm:$0x33 pattern:$0x75316420] }
  0x61   :  { %2697 = vmatprep.subr.bf16.mxu1 %v5614_v33  ;;  %v5663_v32 = vld [vmem:[#allocation2 + $0x5f0] ss:$8 sps:$4 sm:$0xff]   ;;  %v5668_v33 = vld [vmem:[#allocation2 + $0x64] ss:$8 sps:$4 sm:$0xff]   ;;  %v98_v34 = vcombine.low %v4948_v26, %v4949_v29  ;;  %v99_v35 = vcombine.high %v4948_v26, %v4949_v29 }
  0x62   :  { %v5684_v26 = vld [vmem:[#allocation2 + $0x90] ss:$8 sps:$4 sm:$0xff]  }
  0x63   :  { %859 = vmatpush1.bf16.msra.mxu0 %v5616_v40  ;;  %v6578_v39 = vrot.slane %v98_v34, %v6480_v54  ;;  %v6581_v40 = vrot.slane %v99_v35, %v6480_v54  ;;  %v5701_v34 = vld [vmem:[#allocation2 + $0x654] ss:$8 sps:$4 sm:$0xff]   ;;  %v5696_v35 = vld [vmem:[#allocation2 + $0xb0] ss:$8 sps:$4 sm:$0xff]  }
  0x64   :  { %2698 = vmatpush1.bf16.msra.mxu1 %v5617_v41  ;;  %871 = vmatprep.subr.bf16.mxu0 %v5620_v44  ;;  %v5666_v41 = vld [vmem:[#allocation2 + $0x60] ss:$8 sps:$4 sm:$0xff]   ;;  %v6589_v44 = vcombine.high %v6575_v38, %v6575_v38 }
  0x65   :  { %2710 = vmatprep.subr.bf16.mxu1 %v5623_v46  ;;  %v921_v46 = vcombine.low %v6572_v37, %v6575_v38 }
  0x66   :  { %861 = vmatmul.mubr.bf16.vlgmr.msra.gmra.mrb[0].mxu0 %v6545_v47 }
  0x67   :  { %2700 = vmatmul.mubr.bf16.vlgmr.msra.gmra.mrb[0].mxu1 %v6545_v47  ;;  %872 = vmatpush1.bf16.msra.mxu0 %v5618_v49  ;;  %v5674_v49 = vld [vmem:[#allocation2 + $0x74] ss:$8 sps:$4 sm:$0xff]  }
  0x68   :  { %2711 = vmatpush1.bf16.msra.mxu1 %v5621_v50  ;;  %873 = vmatprep.subr.bf16.mxu0 %v5626_v51  ;;  %v6595_v50 = vcombine.high %v6578_v39, %v6578_v39  ;;  %v6599_v51 = vcombine.high %v6581_v40, %v6581_v40 }
  0x69   :  { %2712 = vmatprep.subr.bf16.mxu1 %v5629_v52  ;;  %903 = vmatprep.mubr.bf16.mxu0 %v7165_v58  ;;  %v124_v52 = vunpack.i.h.s16 %v6578_v39 }
  0x6a   :  { %2742 = vmatprep.mubr.bf16.mxu1 %v7165_v58 }
  0x6b   :  { %874 = vmatpush1.bf16.msra.mxu0 %v5624_v53  ;;  %v126_v53 = vunpack.i.h.s16 %v6581_v40 }
  0x6c   :  { %2713 = vmatpush1.bf16.msra.mxu1 %v5627_v55  ;;  %1172 = vmatprep.subr.bf16.mxu0 %v5632_v56  ;;  %v5677_v55 = vld [vmem:[#allocation2 + $0x614] ss:$8 sps:$4 sm:$0xff]   ;;  %v5011_v56 = vpack.i.b16 %v6578_v39, %v6589_v44  ;;  %v5726_v39 = vld [vmem:[#allocation2 + $0x100] ss:$8 sps:$4 sm:$0xff]  }
  0x6d   :  { %2933 = vmatprep.subr.bf16.mxu1 %v5635_v57  ;;  %v128_v57 = vunpack.i.h.s16 %v6595_v50 }
  0x72   :  { %5010 = vmatmul.mubr.msk.bf16.vlgmr.msra.gmra.mrb[0].mxu0 %vm824_vm0, %v6553_v59 }
  0x73   :  { %5209 = vmatmul.mubr.msk.bf16.vlgmr.msra.gmra.mrb[0].mxu1 %vm824_vm0, %v6553_v59  ;;  %1173 = vmatpush1.bf16.msra.mxu0 %v5630_v60  ;;  %v5012_v60 = vpack.i.b16 %v6581_v40, %v124_v52 }
  0x74   :  { %2934 = vmatpush1.bf16.msra.mxu1 %v5633_v61  ;;  %1174 = vmatprep.subr.bf16.mxu0 %v5638_v62  ;;  %v5013_v61 = vpack.i.b16 %v6595_v50, %v126_v53  ;;  %v5672_v62 = vld [vmem:[#allocation2 + $0x70] ss:$8 sps:$4 sm:$0xff]   ;;  %v5710_v53 = vld [vmem:[#allocation2 + $0xd4] ss:$8 sps:$4 sm:$0xff]  }
  0x75   :  { %2935 = vmatprep.subr.bf16.mxu1 %v5641_v63  ;;  %v5675_v63 = vld [vmem:[#allocation2 + $0x610] ss:$8 sps:$4 sm:$0xff]  }
  0x77   :  { %1175 = vmatpush1.bf16.msra.mxu0 %v5636_v2  ;;  %v922_v2 = vcombine.low %v6585_v43, %v5011_v56  ;;  %v5708_v56 = vld [vmem:[#allocation2 + $0xd0] ss:$8 sps:$4 sm:$0xff]  }
  0x78   :  { %2936 = vmatpush1.bf16.msra.mxu1 %v5639_v3  ;;  %1176 = vmatprep.subr.bf16.mxu0 %v5644_v6  ;;  %v6612_v3 = vrot.slane %v921_v46, %v6480_v54  ;;  %v5680_v6 = vld [vmem:[#allocation2 + $0x84] ss:$8 sps:$4 sm:$0xff]   ;;  %v5702_v46 = vld [vmem:[#allocation2 + $0xc0] ss:$8 sps:$4 sm:$0xff]  }
  0x79   :  { %2937 = vmatprep.subr.bf16.mxu1 %v5647_v7  ;;  %v5014_v7 = vpack.i.b16 %v6599_v51, %v128_v57  ;;  %v5711_v57 = vld [vmem:[#allocation2 + $0x670] ss:$8 sps:$4 sm:$0xff]  }
  0x7b   :  { %1177 = vmatpush1.bf16.msra.mxu0 %v5642_v10  ;;  %v923_v10 = vcombine.low %v5012_v60, %v5013_v61  ;;  %v5716_v60 = vld [vmem:[#allocation2 + $0xe4] ss:$8 sps:$4 sm:$0xff]  }
  0x7c   :  { %2938 = vmatpush1.bf16.msra.mxu1 %v5645_v14  ;;  %1178 = vmatprep.subr.bf16.mxu0 %v5650_v15  ;;  %v5683_v14 = vld [vmem:[#allocation2 + $0x624] ss:$8 sps:$4 sm:$0xff]   ;;  %v6616_v15 = vrot.slane %v922_v2, %v6480_v54  ;;  %v121_v2 = vunpack.i.h.s16 %v6585_v43 }
  0x7d   :  { %2939 = vmatprep.subr.bf16.mxu1 %v5653_v16  ;;  %v6619_v16 = vrot.slane %v923_v10, %v6480_v54  ;;  %v5719_v61 = vld [vmem:[#allocation2 + $0x684] ss:$8 sps:$4 sm:$0xff]   ;;  %v5717_v10 = vld [vmem:[#allocation2 + $0x680] ss:$8 sps:$4 sm:$0xff]  }
  0x7f   :  { %1179 = vmatpush1.bf16.msra.mxu0 %v5648_v17  ;;  %v6622_v17 = vrot.slane %v5014_v7, %v6480_v54  ;;  %v5714_v7 = vld [vmem:[#allocation2 + $0xe0] ss:$8 sps:$4 sm:$0xff]  }
  0x80   :  { %2940 = vmatpush1.bf16.msra.mxu1 %v5651_v18  ;;  %1180 = vmatprep.subr.bf16.mxu0 %v5656_v19  ;;  %v5678_v18 = vld [vmem:[#allocation2 + $0x80] ss:$8 sps:$4 sm:$0xff]  }
  0x81   :  { %2941 = vmatprep.subr.bf16.mxu1 %v5659_v20  ;;  %v5681_v19 = vld [vmem:[#allocation2 + $0x620] ss:$8 sps:$4 sm:$0xff]   ;;  %v953_v20 = vcombine.high %v6612_v3, %v6616_v15 }
  0x83   :  { %1181 = vmatpush1.bf16.msra.mxu0 %v5654_v21  ;;  %v5686_v21 = vld [vmem:[#allocation2 + $0x94] ss:$8 sps:$4 sm:$0xff]  }
  0x84   :  { %2942 = vmatpush1.bf16.msra.mxu1 %v5657_v22  ;;  %1182 = vmatprep.subr.bf16.mxu0 %v5662_v23  ;;  %v955_v22 = vcombine.high %v6619_v16, %v6622_v17  ;;  %v5689_v23 = vld [vmem:[#allocation2 + $0x634] ss:$8 sps:$4 sm:$0xff]  }
  0x85   :  { %2943 = vmatprep.subr.bf16.mxu1 %v5665_v24  ;;  %v969_v24 = vrot.slane %v953_v20, %v6480_v54 }
  0x86   :  { %v983_v25 = vrot.slane %v955_v22, %v6480_v54  ;;  %v5054_v22 = vpack.i.b16 %v6589_v44, %v121_v2  ;;  %v5753_v2 = vld [vmem:[#allocation2 + $0x800] ss:$8 sps:$4 sm:$0xff]  }
  0x87   :  { %1183 = vmatpush1.bf16.msra.mxu0 %v5660_v28  ;;  %v5692_v28 = vld [vmem:[#allocation2 + $0xa4] ss:$8 sps:$4 sm:$0xff]  }
  0x88   :  { %2944 = vmatpush1.bf16.msra.mxu1 %v5663_v32  ;;  %1184 = vmatprep.subr.bf16.mxu0 %v5668_v33  ;;  %v986_v29 = vcombine.low %v969_v24, %v983_v25  ;;  %v5693_v32 = vld [vmem:[#allocation2 + $0x640] ss:$8 sps:$4 sm:$0xff]   ;;  %v5698_v33 = vld [vmem:[#allocation2 + $0xb4] ss:$8 sps:$4 sm:$0xff]   ;;  %v5720_v24 = vld [vmem:[#allocation2 + $0xf0] ss:$8 sps:$4 sm:$0xff]  }
  0x89   :  { %2945 = vmatprep.subr.bf16.mxu1 %v5671_v36  ;;  %v5699_v36 = vld [vmem:[#allocation2 + $0x650] ss:$8 sps:$4 sm:$0xff]   ;;  %v5731_v25 = vld [vmem:[#allocation2 + $0x6a4] ss:$8 sps:$4 sm:$0xff]  }
  0x8a   :  { %1204 = vmatprep.mubr.bf16.mxu0 %v986_v29  ;;  %2965 = vmatprep.mubr.bf16.mxu1 %v986_v29 }
  0x8b   :  { %1185 = vmatpush1.bf16.msra.mxu0 %v5666_v41  ;;  %v5704_v41 = vld [vmem:[#allocation2 + $0xc4] ss:$8 sps:$4 sm:$0xff]  }
  0x8c   :  { %2946 = vmatpush1.bf16.msra.mxu1 %v5669_v42  ;;  %1186 = vmatprep.subr.bf16.mxu0 %v5674_v49  ;;  %v5707_v42 = vld [vmem:[#allocation2 + $0x664] ss:$8 sps:$4 sm:$0xff]   ;;  %v5705_v49 = vld [vmem:[#allocation2 + $0x660] ss:$8 sps:$4 sm:$0xff]  }
  0x8d   :  { %2947 = vmatprep.subr.bf16.mxu1 %v5677_v55  ;;  %v5713_v55 = vld [vmem:[#allocation2 + $0x674] ss:$8 sps:$4 sm:$0xff]  }
  0x8f   :  { %1187 = vmatpush1.bf16.msra.mxu0 %v5672_v62  ;;  %v117_v62 = vunpack.i.h.s16 %v6572_v37  ;;  %v5725_v37 = vld [vmem:[#allocation2 + $0x694] ss:$8 sps:$4 sm:$0xff]  }
  0x90   :  { %2948 = vmatpush1.bf16.msra.mxu1 %v5675_v63  ;;  %1188 = vmatprep.subr.bf16.mxu0 %v5680_v6  ;;  %v119_v63 = vunpack.i.h.s16 %v6575_v38  ;;  %v216_v6 = vunpack.i.h.s16 %v6589_v44 }
  0x91   :  { %2949 = vmatprep.subr.bf16.mxu1 %v5683_v14  ;;  %v952_v14 = vcombine.low %v6612_v3, %v6616_v15  ;;  %v5052_v20 = vpack.i.b16 %v6575_v38, %v117_v62  ;;  %v5723_v3 = vld [vmem:[#allocation2 + $0x690] ss:$8 sps:$4 sm:$0xff]   ;;  %v5755_v62 = vld [vmem:[#allocation2 + $0x804] ss:$8 sps:$4 sm:$0xff]  }
  0x93   :  { %1189 = vmatpush1.bf16.msra.mxu0 %v5678_v18  ;;  %v954_v18 = vcombine.low %v6619_v16, %v6622_v17  ;;  %v962_v15 = vrot.slane %v952_v14, %v6480_v54  ;;  %v5728_v17 = vld [vmem:[#allocation2 + $0x104] ss:$8 sps:$4 sm:$0xff]   ;;  %v5759_v14 = vld [vmem:[#allocation2 + $0x810] ss:$8 sps:$4 sm:$0xff]  }
  0x94   :  { %2950 = vmatpush1.bf16.msra.mxu1 %v5681_v19  ;;  %1190 = vmatprep.subr.bf16.mxu0 %v5686_v21  ;;  %v5722_v19 = vld [vmem:[#allocation2 + $0xf4] ss:$8 sps:$4 sm:$0xff]   ;;  %v5053_v21 = vpack.i.b16 %v6585_v43, %v119_v63  ;;  %v1304_v43 = vcombine.low %v6581_v40, %v6595_v50  ;;  %v6658_v40 = vrot.slane %v6599_v51, %v6480_v54  ;;  %v5732_v50 = vld [vmem:[#allocation2 + $0x110] ss:$8 sps:$4 sm:$0xff]   ;;  %v5750_v63 = vld [vmem:[#allocation2 + $0x260] ss:$8 sps:$4 sm:$0xff]  }
  0x95   :  { %2951 = vmatprep.subr.bf16.mxu1 %v5689_v23  ;;  %v1298_v23 = vpack.i.b16 %v124_v52, %v216_v6  ;;  %v976_v16 = vrot.slane %v954_v18, %v6480_v54  ;;  %v5729_v52 = vld [vmem:[#allocation2 + $0x6a0] ss:$8 sps:$4 sm:$0xff]   ;;  %v5758_v6 = vld [vmem:[#allocation2 + $0x274] ss:$8 sps:$4 sm:$0xff]   ;;  %v5764_v18 = vld [vmem:[#allocation2 + $0x284] ss:$8 sps:$4 sm:$0xff]  }
  0x96   :  { %v1302_v38 = vcombine.low %v5052_v20, %v5053_v21  ;;  %v5765_v20 = vld [vmem:[#allocation2 + $0x820] ss:$8 sps:$4 sm:$0xff]   ;;  %v5770_v21 = vld [vmem:[#allocation2 + $0x294] ss:$8 sps:$4 sm:$0xff]  }
  0x97   :  { %1191 = vmatpush1.bf16.msra.mxu0 %v5684_v26  ;;  %v1303_v26 = vcombine.low %v5054_v22, %v1298_v23  ;;  %v984_v44 = vcombine.low %v962_v15, %v976_v16  ;;  %v5773_v22 = vld [vmem:[#allocation2 + $0x834] ss:$8 sps:$4 sm:$0xff]   ;;  %v5768_v23 = vld [vmem:[#allocation2 + $0x290] ss:$8 sps:$4 sm:$0xff]  }
  0x98   :  { %2952 = vmatpush1.bf16.msra.mxu1 %v5687_v27  ;;  %1192 = vmatprep.subr.bf16.mxu0 %v5692_v28  ;;  %v5734_v27 = vld [vmem:[#allocation2 + $0x114] ss:$8 sps:$4 sm:$0xff]   ;;  %v6648_v29 = vrot.slane %v1302_v38, %v6480_v54 }
  0x99   :  { %2953 = vmatprep.subr.bf16.mxu1 %v5695_v30  ;;  %v5737_v28 = vld [vmem:[#allocation2 + $0x6b4] ss:$8 sps:$4 sm:$0xff]   ;;  %v6651_v30 = vrot.slane %v1303_v26, %v6480_v54  ;;  %v5780_v26 = vld [vmem:[#allocation2 + $0x2b0] ss:$8 sps:$4 sm:$0xff]  }
  0x9a   :  { %v5785_v38 = vld [vmem:[#allocation2 + $0x854] ss:$8 sps:$4 sm:$0xff]  }
  0x9b   :  { %1193 = vmatpush1.bf16.msra.mxu0 %v5690_v31  ;;  %v6654_v31 = vrot.slane %v1304_v43, %v6480_v54  ;;  %v5783_v43 = vld [vmem:[#allocation2 + $0x850] ss:$8 sps:$4 sm:$0xff]  }
  0x9c   :  { %2954 = vmatpush1.bf16.msra.mxu1 %v5693_v32  ;;  %1194 = vmatprep.subr.bf16.mxu0 %v5698_v33  ;;  %v5735_v32 = vld [vmem:[#allocation2 + $0x6b0] ss:$8 sps:$4 sm:$0xff]   ;;  %v5740_v33 = vld [vmem:[#allocation2 + $0x244] ss:$8 sps:$4 sm:$0xff]  }
  0x9d   :  { %2955 = vmatprep.subr.bf16.mxu1 %v5701_v34  ;;  %v5743_v34 = vld [vmem:[#allocation2 + $0x7e4] ss:$8 sps:$4 sm:$0xff]   ;;  %v1336_v51 = vcombine.high %v6654_v31, %v6658_v40 }
  0x9f   :  { %1195 = vmatpush1.bf16.msra.mxu0 %v5696_v35  ;;  %v1334_v35 = vcombine.high %v6648_v29, %v6651_v30 }
  0xa0   :  { %2956 = vmatpush1.bf16.msra.mxu1 %v5699_v36  ;;  %1196 = vmatprep.subr.bf16.mxu0 %v5704_v41  ;;  %v1364_v41 = vrot.slane %v1336_v51, %v6480_v54  ;;  %v5798_v51 = vld [vmem:[#allocation2 + $0x2e0] ss:$8 sps:$4 sm:$0xff]  }
  0xa1   :  { %2957 = vmatprep.subr.bf16.mxu1 %v5707_v42  ;;  %v1350_v36 = vrot.slane %v1334_v35, %v6480_v54  ;;  %v985_v42 = vcombine.high %v962_v15, %v976_v16  ;;  %v5779_v15 = vld [vmem:[#allocation2 + $0x844] ss:$8 sps:$4 sm:$0xff]   ;;  %v5774_v16 = vld [vmem:[#allocation2 + $0x2a0] ss:$8 sps:$4 sm:$0xff]  }
  0xa2   :  { %v5803_v35 = vld [vmem:[#allocation2 + $0x884] ss:$8 sps:$4 sm:$0xff]  }
  0xa3   :  { %1197 = vmatpush1.bf16.msra.mxu0 %v5702_v46  ;;  %v5738_v46 = vld [vmem:[#allocation2 + $0x240] ss:$8 sps:$4 sm:$0xff]  }
  0xa4   :  { %2958 = vmatpush1.bf16.msra.mxu1 %v5705_v49  ;;  %1198 = vmatprep.subr.bf16.mxu0 %v5710_v53  ;;  %v5741_v49 = vld [vmem:[#allocation2 + $0x7e0] ss:$8 sps:$4 sm:$0xff]   ;;  %v5746_v53 = vld [vmem:[#allocation2 + $0x254] ss:$8 sps:$4 sm:$0xff]  }
  0xa5   :  { %2959 = vmatprep.subr.bf16.mxu1 %v5713_v55  ;;  %v5749_v55 = vld [vmem:[#allocation2 + $0x7f4] ss:$8 sps:$4 sm:$0xff]  }
  0xa7   :  { %1199 = vmatpush1.bf16.msra.mxu0 %v5708_v56  ;;  %v6668_v56 = vcombine.low %v1350_v36, %v1364_v41  ;;  %v5801_v36 = vld [vmem:[#allocation2 + $0x880] ss:$8 sps:$4 sm:$0xff]   ;;  %v5806_v41 = vld [vmem:[#allocation2 + $0x2f4] ss:$8 sps:$4 sm:$0xff]  }
  0xa8   :  { %2960 = vmatpush1.bf16.msra.mxu1 %v5711_v57  ;;  %1200 = vmatprep.subr.bf16.mxu0 %v5716_v60  ;;  %v5744_v57 = vld [vmem:[#allocation2 + $0x250] ss:$8 sps:$4 sm:$0xff]  }
  0xa9   :  { %2961 = vmatprep.subr.bf16.mxu1 %v5719_v61  ;;  %v5747_v60 = vld [vmem:[#allocation2 + $0x7f0] ss:$8 sps:$4 sm:$0xff]   ;;  %v5752_v61 = vld [vmem:[#allocation2 + $0x264] ss:$8 sps:$4 sm:$0xff]  }
  0xab   :  { %1201 = vmatpush1.bf16.msra.mxu0 %v5714_v7  ;;  %v5761_v7 = vld [vmem:[#allocation2 + $0x814] ss:$8 sps:$4 sm:$0xff]  }
  0xac   :  { %2962 = vmatpush1.bf16.msra.mxu1 %v5717_v10  ;;  %1202 = vmatprep.subr.bf16.mxu0 %v5722_v19  ;;  %v5756_v10 = vld [vmem:[#allocation2 + $0x270] ss:$8 sps:$4 sm:$0xff]   ;;  %v5767_v19 = vld [vmem:[#allocation2 + $0x824] ss:$8 sps:$4 sm:$0xff]  }
  0xad   :  { %2963 = vmatprep.subr.bf16.mxu1 %v5725_v37  ;;  %v5762_v37 = vld [vmem:[#allocation2 + $0x280] ss:$8 sps:$4 sm:$0xff]  }
  0xaf   :  { %1203 = vmatpush1.bf16.msra.mxu0 %v5720_v24  ;;  %v5771_v24 = vld [vmem:[#allocation2 + $0x830] ss:$8 sps:$4 sm:$0xff]  }
  0xb0   :  { %2964 = vmatpush1.bf16.msra.mxu1 %v5723_v3  ;;  %1215 = vmatprep.subr.bf16.mxu0 %v5728_v17  ;;  %v5776_v3 = vld [vmem:[#allocation2 + $0x2a4] ss:$8 sps:$4 sm:$0xff]   ;;  %v5777_v17 = vld [vmem:[#allocation2 + $0x840] ss:$8 sps:$4 sm:$0xff]  }
  0xb1   :  { %2976 = vmatprep.subr.bf16.mxu1 %v5731_v25  ;;  %v5782_v25 = vld [vmem:[#allocation2 + $0x2b4] ss:$8 sps:$4 sm:$0xff]  }
  0xb2   :  { %1205 = vmatmul.mubr.bf16.vlgmr.msra.gmra.mrb[0].mxu0 %v984_v44 }
  0xb3   :  { %2966 = vmatmul.mubr.bf16.vlgmr.msra.gmra.mrb[0].mxu1 %v984_v44  ;;  %1216 = vmatpush1.bf16.msra.mxu0 %v5726_v39  ;;  %v5788_v44 = vld [vmem:[#allocation2 + $0x2c4] ss:$8 sps:$4 sm:$0xff]  }
  0xb4   :  { %2977 = vmatpush1.bf16.msra.mxu1 %v5729_v52  ;;  %1217 = vmatprep.subr.bf16.mxu0 %v5734_v27  ;;  %v5791_v39 = vld [vmem:[#allocation2 + $0x864] ss:$8 sps:$4 sm:$0xff]   ;;  %v5786_v52 = vld [vmem:[#allocation2 + $0x2c0] ss:$8 sps:$4 sm:$0xff]  }
  0xb5   :  { %2978 = vmatprep.subr.bf16.mxu1 %v5737_v28  ;;  %1247 = vmatprep.mubr.bf16.mxu0 %v7165_v58  ;;  %v5789_v27 = vld [vmem:[#allocation2 + $0x860] ss:$8 sps:$4 sm:$0xff]   ;;  %v5794_v28 = vld [vmem:[#allocation2 + $0x2d4] ss:$8 sps:$4 sm:$0xff]  }
  0xb6   :  { %3008 = vmatprep.mubr.bf16.mxu1 %v7165_v58 }
  0xb7   :  { %1218 = vmatpush1.bf16.msra.mxu0 %v5732_v50  ;;  %v5797_v50 = vld [vmem:[#allocation2 + $0x874] ss:$8 sps:$4 sm:$0xff]  }
  0xb8   :  { %2979 = vmatpush1.bf16.msra.mxu1 %v5735_v32  ;;  %1553 = vmatprep.subr.bf16.mxu0 %v5740_v33  ;;  %v5792_v32 = vld [vmem:[#allocation2 + $0x2d0] ss:$8 sps:$4 sm:$0xff]  }
  0xb9   :  { %3236 = vmatprep.subr.bf16.mxu1 %v5743_v34  ;;  %v5795_v33 = vld [vmem:[#allocation2 + $0x870] ss:$8 sps:$4 sm:$0xff]   ;;  %v5800_v34 = vld [vmem:[#allocation2 + $0x2e4] ss:$8 sps:$4 sm:$0xff]  }
  0xbe   :  { %5051 = vmatmul.mubr.msk.bf16.vlgmr.msra.gmra.mrb[0].mxu0 %vm824_vm0, %v985_v42 }
  0xbf   :  { %5246 = vmatmul.mubr.msk.bf16.vlgmr.msra.gmra.mrb[0].mxu1 %vm824_vm0, %v985_v42  ;;  %1554 = vmatpush1.bf16.msra.mxu0 %v5738_v46  ;;  %v5809_v42 = vld [vmem:[#allocation2 + $0x894] ss:$8 sps:$4 sm:$0xff]   ;;  %v5804_v46 = vld [vmem:[#allocation2 + $0x2f0] ss:$8 sps:$4 sm:$0xff]  }
  0xc0   :  { %3237 = vmatpush1.bf16.msra.mxu1 %v5741_v49  ;;  %1555 = vmatprep.subr.bf16.mxu0 %v5746_v53  ;;  %v5807_v49 = vld [vmem:[#allocation2 + $0x890] ss:$8 sps:$4 sm:$0xff]   ;;  %v5812_v53 = vld [vmem:[#allocation2 + $0x304] ss:$8 sps:$4 sm:$0xff]  }
  0xc1   :  { %3238 = vmatprep.subr.bf16.mxu1 %v5749_v55  ;;  %1585 = vmatprep.mubr.bf16.mxu0 %v6668_v56  ;;  %v5815_v55 = vld [vmem:[#allocation2 + $0x8a4] ss:$8 sps:$4 sm:$0xff]  }
  0xc2   :  { %3268 = vmatprep.mubr.bf16.mxu1 %v6668_v56 }
  0xc3   :  { %1556 = vmatpush1.bf16.msra.mxu0 %v5744_v57  ;;  %v5810_v57 = vld [vmem:[#allocation2 + $0x300] ss:$8 sps:$4 sm:$0xff]  }
  0xc4   :  { %3239 = vmatpush1.bf16.msra.mxu1 %v5747_v60  ;;  %1557 = vmatprep.subr.bf16.mxu0 %v5752_v61  ;;  %v5813_v60 = vld [vmem:[#allocation2 + $0x8a0] ss:$8 sps:$4 sm:$0xff]   ;;  %v5818_v61 = vld [vmem:[#allocation2 + $0x314] ss:$8 sps:$4 sm:$0xff]  }
  0xc5   :  { %3240 = vmatprep.subr.bf16.mxu1 %v5755_v62  ;;  %v5821_v62 = vld [vmem:[#allocation2 + $0x8b4] ss:$8 sps:$4 sm:$0xff]  }
  0xc7   :  { %1558 = vmatpush1.bf16.msra.mxu0 %v5750_v63  ;;  %v5816_v63 = vld [vmem:[#allocation2 + $0x310] ss:$8 sps:$4 sm:$0xff]  }
  0xc8   :  { %3241 = vmatpush1.bf16.msra.mxu1 %v5753_v2  ;;  %1559 = vmatprep.subr.bf16.mxu0 %v5758_v6  ;;  %v5819_v2 = vld [vmem:[#allocation2 + $0x8b0] ss:$8 sps:$4 sm:$0xff]   ;;  %v5824_v6 = vld [vmem:[#allocation2 + $0x324] ss:$8 sps:$4 sm:$0xff]  }
  0xc9   :  { %3242 = vmatprep.subr.bf16.mxu1 %v5761_v7  ;;  %v5827_v7 = vld [vmem:[#allocation2 + $0x8c4] ss:$8 sps:$4 sm:$0xff]  }
  0xcb   :  { %1560 = vmatpush1.bf16.msra.mxu0 %v5756_v10  ;;  %v203_v10 = vunpack.i.h.s16 %v6495_v0  ;;  %v5833_v0 = vld [vmem:[#allocation2 + $0x8d4] ss:$8 sps:$4 sm:$0xff]  }
  0xcc   :  { %3243 = vmatpush1.bf16.msra.mxu1 %v5759_v14  ;;  %1561 = vmatprep.subr.bf16.mxu0 %v5764_v18  ;;  %v205_v14 = vunpack.i.h.s16 %v6498_v1  ;;  %v207_v18 = vunpack.i.h.s16 %v6508_v8 }
  0xcd   :  { %3244 = vmatprep.subr.bf16.mxu1 %v5767_v19  ;;  %v218_v19 = vunpack.i.h.s16 %v6512_v9 }
  0xcf   :  { %1562 = vmatpush1.bf16.msra.mxu0 %v5762_v37  ;;  %v5822_v37 = vld [vmem:[#allocation2 + $0x320] ss:$8 sps:$4 sm:$0xff]  }
  0xd0   :  { %3245 = vmatpush1.bf16.msra.mxu1 %v5765_v20  ;;  %1563 = vmatprep.subr.bf16.mxu0 %v5770_v21  ;;  %v5825_v20 = vld [vmem:[#allocation2 + $0x8c0] ss:$8 sps:$4 sm:$0xff]   ;;  %v1333_v21 = vcombine.low %v6648_v29, %v6651_v30  ;;  %v5831_v29 = vld [vmem:[#allocation2 + $0x8d0] ss:$8 sps:$4 sm:$0xff]  }
  0xd1   :  { %3246 = vmatprep.subr.bf16.mxu1 %v5773_v22  ;;  %v1335_v22 = vcombine.low %v6654_v31, %v6658_v40  ;;  %v5836_v40 = vld [vmem:[#allocation2 + $0x344] ss:$8 sps:$4 sm:$0xff]  }
  0xd2   :  { %v1343_v30 = vrot.slane %v1333_v21, %v6480_v54  ;;  %v5879_v21 = vld [vmem:[#allocation2 + $0x950] ss:$8 sps:$4 sm:$0xff]  }
  0xd3   :  { %1564 = vmatpush1.bf16.msra.mxu0 %v5768_v23  ;;  %v5830_v23 = vld [vmem:[#allocation2 + $0x334] ss:$8 sps:$4 sm:$0xff]   ;;  %v1357_v31 = vrot.slane %v1335_v22, %v6480_v54  ;;  %v5884_v22 = vld [vmem:[#allocation2 + $0x3c4] ss:$8 sps:$4 sm:$0xff]  }
  0xd4   :  { %3247 = vmatpush1.bf16.msra.mxu1 %v5771_v24  ;;  %1565 = vmatprep.subr.bf16.mxu0 %v5776_v3  ;;  %v5092_v24 = vpack.i.b16 %v6498_v1, %v203_v10  ;;  %v5093_v3 = vpack.i.b16 %v6508_v8, %v205_v14  ;;  %v1689_v8 = vcombine.low %v6504_v5, %v6518_v11  ;;  %v5840_v11 = vld [vmem:[#allocation2 + $0x350] ss:$8 sps:$4 sm:$0xff]   ;;  %v5875_v10 = vld [vmem:[#allocation2 + $0x944] ss:$8 sps:$4 sm:$0xff]   ;;  %v5870_v14 = vld [vmem:[#allocation2 + $0x3a0] ss:$8 sps:$4 sm:$0xff]  }
  0xd5   :  { %3248 = vmatprep.subr.bf16.mxu1 %v5779_v15  ;;  %v5094_v15 = vpack.i.b16 %v6512_v9, %v207_v18  ;;  %v6691_v9 = vcombine.low %v1343_v30, %v1357_v31  ;;  %v6704_v5 = vrot.slane %v6522_v12, %v6480_v54  ;;  %v5873_v18 = vld [vmem:[#allocation2 + $0x940] ss:$8 sps:$4 sm:$0xff]  }
  0xd6   :  { %v1687_v1 = vcombine.low %v5092_v24, %v5093_v3  ;;  %v5885_v24 = vld [vmem:[#allocation2 + $0x960] ss:$8 sps:$4 sm:$0xff]   ;;  %v5890_v3 = vld [vmem:[#allocation2 + $0x3d4] ss:$8 sps:$4 sm:$0xff]  }
  0xd7   :  { %1566 = vmatpush1.bf16.msra.mxu0 %v5774_v16  ;;  %v1683_v16 = vpack.i.b16 %v210_v13, %v218_v19  ;;  %v5837_v13 = vld [vmem:[#allocation2 + $0x8e0] ss:$8 sps:$4 sm:$0xff]   ;;  %v5878_v19 = vld [vmem:[#allocation2 + $0x3b4] ss:$8 sps:$4 sm:$0xff]  }
  0xd8   :  { %3249 = vmatpush1.bf16.msra.mxu1 %v5777_v17  ;;  %1567 = vmatprep.subr.bf16.mxu0 %v5782_v25  ;;  %v5828_v17 = vld [vmem:[#allocation2 + $0x330] ss:$8 sps:$4 sm:$0xff]   ;;  %v5839_v25 = vld [vmem:[#allocation2 + $0x8e4] ss:$8 sps:$4 sm:$0xff]  }
  0xd9   :  { %3250 = vmatprep.subr.bf16.mxu1 %v5785_v38  ;;  %v1688_v38 = vcombine.low %v5094_v15, %v1683_v16  ;;  %v5893_v15 = vld [vmem:[#allocation2 + $0x974] ss:$8 sps:$4 sm:$0xff]   ;;  %v5888_v16 = vld [vmem:[#allocation2 + $0x3d0] ss:$8 sps:$4 sm:$0xff]  }
  0xdb   :  { %1568 = vmatpush1.bf16.msra.mxu0 %v5780_v26  ;;  %v5842_v26 = vld [vmem:[#allocation2 + $0x354] ss:$8 sps:$4 sm:$0xff]  }
  0xdc   :  { %3251 = vmatpush1.bf16.msra.mxu1 %v5783_v43  ;;  %1569 = vmatprep.subr.bf16.mxu0 %v5788_v44  ;;  %v5845_v43 = vld [vmem:[#allocation2 + $0x8f4] ss:$8 sps:$4 sm:$0xff]   ;;  %v6694_v44 = vrot.slane %v1687_v1, %v6480_v54 }
  0xdd   :  { %3252 = vmatprep.subr.bf16.mxu1 %v5791_v39  ;;  %v6697_v39 = vrot.slane %v1688_v38, %v6480_v54  ;;  %v5905_v1 = vld [vmem:[#allocation2 + $0x994] ss:$8 sps:$4 sm:$0xff]   ;;  %v5900_v38 = vld [vmem:[#allocation2 + $0x3f0] ss:$8 sps:$4 sm:$0xff]  }
  0xdf   :  { %1570 = vmatpush1.bf16.msra.mxu0 %v5786_v52  ;;  %v6700_v52 = vrot.slane %v1689_v8, %v6480_v54  ;;  %v1719_v12 = vcombine.high %v6694_v44, %v6697_v39  ;;  %v5903_v8 = vld [vmem:[#allocation2 + $0x990] ss:$8 sps:$4 sm:$0xff]  }
  0xe0   :  { %3253 = vmatpush1.bf16.msra.mxu1 %v5789_v27  ;;  %1571 = vmatprep.subr.bf16.mxu0 %v5794_v28  ;;  %v5843_v27 = vld [vmem:[#allocation2 + $0x8f0] ss:$8 sps:$4 sm:$0xff]   ;;  %v5848_v28 = vld [vmem:[#allocation2 + $0x364] ss:$8 sps:$4 sm:$0xff]  }
  0xe1   :  { %3254 = vmatprep.subr.bf16.mxu1 %v5797_v50  ;;  %v5851_v50 = vld [vmem:[#allocation2 + $0x904] ss:$8 sps:$4 sm:$0xff]  }
  0xe3   :  { %1572 = vmatpush1.bf16.msra.mxu0 %v5792_v32  ;;  %v1721_v32 = vcombine.high %v6700_v52, %v6704_v5 }
  0xe4   :  { %3255 = vmatpush1.bf16.msra.mxu1 %v5795_v33  ;;  %1573 = vmatprep.subr.bf16.mxu0 %v5800_v34  ;;  %v1735_v33 = vrot.slane %v1719_v12, %v6480_v54 }
  0xe5   :  { %3256 = vmatprep.subr.bf16.mxu1 %v5803_v35  ;;  %v1749_v34 = vrot.slane %v1721_v32, %v6480_v54  ;;  %v6716_v35 = vcombine.high %v1343_v30, %v1357_v31  ;;  %v5899_v30 = vld [vmem:[#allocation2 + $0x984] ss:$8 sps:$4 sm:$0xff]   ;;  %v5894_v31 = vld [vmem:[#allocation2 + $0x3e0] ss:$8 sps:$4 sm:$0xff]   ;;  %v5912_v32 = vld [vmem:[#allocation2 + $0x410] ss:$8 sps:$4 sm:$0xff]  }
  0xe7   :  { %1574 = vmatpush1.bf16.msra.mxu0 %v5798_v51  ;;  %v5846_v51 = vld [vmem:[#allocation2 + $0x360] ss:$8 sps:$4 sm:$0xff]  }
  0xe8   :  { %3257 = vmatpush1.bf16.msra.mxu1 %v5801_v36  ;;  %1575 = vmatprep.subr.bf16.mxu0 %v5806_v41  ;;  %v5849_v36 = vld [vmem:[#allocation2 + $0x900] ss:$8 sps:$4 sm:$0xff]   ;;  %v5854_v41 = vld [vmem:[#allocation2 + $0x374] ss:$8 sps:$4 sm:$0xff]  }
  0xe9   :  { %3258 = vmatprep.subr.bf16.mxu1 %v5809_v42  ;;  %v5857_v42 = vld [vmem:[#allocation2 + $0x914] ss:$8 sps:$4 sm:$0xff]  }
  0xeb   :  { %1576 = vmatpush1.bf16.msra.mxu0 %v5804_v46  ;;  %v6718_v46 = vcombine.low %v1735_v33, %v1749_v34  ;;  %v5915_v33 = vld [vmem:[#allocation2 + $0x9b0] ss:$8 sps:$4 sm:$0xff]   ;;  %v5920_v34 = vld [vmem:[#allocation2 + $0x424] ss:$8 sps:$4 sm:$0xff]  }
  0xec   :  { %3259 = vmatpush1.bf16.msra.mxu1 %v5807_v49  ;;  %1577 = vmatprep.subr.bf16.mxu0 %v5812_v53  ;;  %v5852_v49 = vld [vmem:[#allocation2 + $0x370] ss:$8 sps:$4 sm:$0xff]  }
  0xed   :  { %3260 = vmatprep.subr.bf16.mxu1 %v5815_v55  ;;  %v5855_v53 = vld [vmem:[#allocation2 + $0x910] ss:$8 sps:$4 sm:$0xff]   ;;  %v5860_v55 = vld [vmem:[#allocation2 + $0x384] ss:$8 sps:$4 sm:$0xff]  }
  0xef   :  { %1578 = vmatpush1.bf16.msra.mxu0 %v5810_v57  ;;  %v5863_v57 = vld [vmem:[#allocation2 + $0x924] ss:$8 sps:$4 sm:$0xff]  }
  0xf0   :  { %3261 = vmatpush1.bf16.msra.mxu1 %v5813_v60  ;;  %1579 = vmatprep.subr.bf16.mxu0 %v5818_v61  ;;  %v5858_v60 = vld [vmem:[#allocation2 + $0x380] ss:$8 sps:$4 sm:$0xff]  }
  0xf1   :  { %3262 = vmatprep.subr.bf16.mxu1 %v5821_v62  ;;  %v5861_v61 = vld [vmem:[#allocation2 + $0x920] ss:$8 sps:$4 sm:$0xff]   ;;  %v5866_v62 = vld [vmem:[#allocation2 + $0x394] ss:$8 sps:$4 sm:$0xff]  }
  0xf3   :  { %1580 = vmatpush1.bf16.msra.mxu0 %v5816_v63  ;;  %v5869_v63 = vld [vmem:[#allocation2 + $0x934] ss:$8 sps:$4 sm:$0xff]  }
  0xf4   :  { %3263 = vmatpush1.bf16.msra.mxu1 %v5819_v2  ;;  %1581 = vmatprep.subr.bf16.mxu0 %v5824_v6  ;;  %v5864_v2 = vld [vmem:[#allocation2 + $0x390] ss:$8 sps:$4 sm:$0xff]  }
  0xf5   :  { %3264 = vmatprep.subr.bf16.mxu1 %v5827_v7  ;;  %v5867_v6 = vld [vmem:[#allocation2 + $0x930] ss:$8 sps:$4 sm:$0xff]   ;;  %v5872_v7 = vld [vmem:[#allocation2 + $0x3a4] ss:$8 sps:$4 sm:$0xff]  }
  0xf7   :  { %1582 = vmatpush1.bf16.msra.mxu0 %v5822_v37  ;;  %v5881_v37 = vld [vmem:[#allocation2 + $0x954] ss:$8 sps:$4 sm:$0xff]  }
  0xf8   :  { %3265 = vmatpush1.bf16.msra.mxu1 %v5825_v20  ;;  %1583 = vmatprep.subr.bf16.mxu0 %v5830_v23  ;;  %v5876_v20 = vld [vmem:[#allocation2 + $0x3b0] ss:$8 sps:$4 sm:$0xff]   ;;  %v5887_v23 = vld [vmem:[#allocation2 + $0x964] ss:$8 sps:$4 sm:$0xff]  }
  0xf9   :  { %3266 = vmatprep.subr.bf16.mxu1 %v5833_v0  ;;  %v5882_v0 = vld [vmem:[#allocation2 + $0x3c0] ss:$8 sps:$4 sm:$0xff]  }
  0xfb   :  { %1584 = vmatpush1.bf16.msra.mxu0 %v5828_v17  ;;  %v5891_v17 = vld [vmem:[#allocation2 + $0x970] ss:$8 sps:$4 sm:$0xff]  }
  0xfc   :  { %3267 = vmatpush1.bf16.msra.mxu1 %v5831_v29  ;;  %1596 = vmatprep.subr.bf16.mxu0 %v5836_v40  ;;  %v5896_v29 = vld [vmem:[#allocation2 + $0x3e4] ss:$8 sps:$4 sm:$0xff]   ;;  %v5897_v40 = vld [vmem:[#allocation2 + $0x980] ss:$8 sps:$4 sm:$0xff]  }
  0xfd   :  { %3279 = vmatprep.subr.bf16.mxu1 %v5839_v25  ;;  %v5902_v25 = vld [vmem:[#allocation2 + $0x3f4] ss:$8 sps:$4 sm:$0xff]  }
  0xfe   :  { %1586 = vmatmul.mubr.bf16.vlgmr.msra.gmra.mrb[0].mxu0 %v6691_v9 }
  0xff   :  { %3269 = vmatmul.mubr.bf16.vlgmr.msra.gmra.mrb[0].mxu1 %v6691_v9  ;;  %1597 = vmatpush1.bf16.msra.mxu0 %v5834_v4  ;;  %v5908_v4 = vld [vmem:[#allocation2 + $0x404] ss:$8 sps:$4 sm:$0xff]  }
 0x100   :  { %3280 = vmatpush1.bf16.msra.mxu1 %v5837_v13  ;;  %1598 = vmatprep.subr.bf16.mxu0 %v5842_v26  ;;  %v5911_v13 = vld [vmem:[#allocation2 + $0x9a4] ss:$8 sps:$4 sm:$0xff]  }
 0x101   :  { %3281 = vmatprep.subr.bf16.mxu1 %v5845_v43  ;;  %1628 = vmatprep.mubr.bf16.mxu0 %v7165_v58  ;;  %v4958_v26 = vld.sshfl [vmem:[%s7154_s0 + $0x18] sm:$0xfa pattern:$0x75316420] }
 0x102   :  { %3311 = vmatprep.mubr.bf16.mxu1 %v7165_v58  ;;  %v4959_v43 = vld.sshfl [vmem:[%s7154_s0 + $0x20] sm:$0x32 pattern:$0x75316420] }
 0x103   :  { %1599 = vmatpush1.bf16.msra.mxu0 %v5840_v11  ;;  %v5906_v11 = vld [vmem:[#allocation2 + $0x400] ss:$8 sps:$4 sm:$0xff]   ;;  %v304_v12 = vcombine.low %v4958_v26, %v4959_v43 }
 0x104   :  { %3282 = vmatpush1.bf16.msra.mxu1 %v5843_v27  ;;  %1938 = vmatprep.subr.bf16.mxu0 %v5848_v28  ;;  %v5909_v27 = vld [vmem:[#allocation2 + $0x9a0] ss:$8 sps:$4 sm:$0xff]   ;;  %v5914_v28 = vld [vmem:[#allocation2 + $0x414] ss:$8 sps:$4 sm:$0xff]  }
 0x105   :  { %3543 = vmatprep.subr.bf16.mxu1 %v5851_v50  ;;  %v5917_v50 = vld [vmem:[#allocation2 + $0x9b4] ss:$8 sps:$4 sm:$0xff]  }
 0x10a   :  { %5091 = vmatmul.mubr.msk.bf16.vlgmr.msra.gmra.mrb[0].mxu0 %vm824_vm0, %v6716_v35 }
 0x10b   :  { %5283 = vmatmul.mubr.msk.bf16.vlgmr.msra.gmra.mrb[0].mxu1 %vm824_vm0, %v6716_v35  ;;  %1939 = vmatpush1.bf16.msra.mxu0 %v5846_v51  ;;  %v4954_v51 = vld.sshfl [vmem:[%s7154_s0] sm:$0xfa pattern:$0x75316420] }
 0x10c   :  { %3544 = vmatpush1.bf16.msra.mxu1 %v5849_v36  ;;  %1940 = vmatprep.subr.bf16.mxu0 %v5854_v41  ;;  %v5923_v36 = vld [vmem:[#allocation2 + $0x9c4] ss:$8 sps:$4 sm:$0xff]   ;;  %v4955_v41 = vld.sshfl [vmem:[%s7154_s0 + $0x8] sm:$0x32 pattern:$0x75316420] }
 0x10d   :  { %3545 = vmatprep.subr.bf16.mxu1 %v5857_v42  ;;  %1970 = vmatprep.mubr.bf16.mxu0 %v6718_v46  ;;  %v4956_v42 = vld.sshfl [vmem:[%s7154_s0 + $0xc] sm:$0x5 pattern:$0x75316420] }
 0x10e   :  { %3575 = vmatprep.mubr.bf16.mxu1 %v6718_v46 }
 0x10f   :  { %1941 = vmatpush1.bf16.msra.mxu0 %v5852_v49  ;;  %v305_v49 = vcombine.high %v4958_v26, %v4959_v43 }
 0x110   :  { %3546 = vmatpush1.bf16.msra.mxu1 %v5855_v53  ;;  %1942 = vmatprep.subr.bf16.mxu0 %v5860_v55  ;;  %v312_v53 = vrot.slane %v304_v12, %v6480_v54  ;;  %v4957_v55 = vld.sshfl [vmem:[%s7154_s0 + $0x14] sm:$0x1 pattern:$0x75316420] }
 0x111   :  { %3547 = vmatprep.subr.bf16.mxu1 %v5863_v57  ;;  %v5918_v57 = vld [vmem:[#allocation2 + $0x420] ss:$8 sps:$4 sm:$0xff]  }
 0x113   :  { %1943 = vmatpush1.bf16.msra.mxu0 %v5858_v60  ;;  %v5921_v60 = vld [vmem:[#allocation2 + $0x9c0] ss:$8 sps:$4 sm:$0xff]  }
 0x114   :  { %3548 = vmatpush1.bf16.msra.mxu1 %v5861_v61  ;;  %1944 = vmatprep.subr.bf16.mxu0 %v5866_v62  ;;  %v5926_v61 = vld [vmem:[#allocation2 + $0x434] ss:$8 sps:$4 sm:$0xff]  }
 0x115   :  { %3549 = vmatprep.subr.bf16.mxu1 %v5869_v63  ;;  %v5929_v62 = vld [vmem:[#allocation2 + $0x9d4] ss:$8 sps:$4 sm:$0xff]  }
 0x116   :  { %v4960_v63 = vld.sshfl [vmem:[%s7154_s0 + $0x24] sm:$0x5 pattern:$0x75316420] }
 0x117   :  { %1945 = vmatpush1.bf16.msra.mxu0 %v5864_v2  ;;  %v250_v2 = vcombine.low %v4954_v51, %v4955_v41 }
 0x118   :  { %3550 = vmatpush1.bf16.msra.mxu1 %v5867_v6  ;;  %1946 = vmatprep.subr.bf16.mxu0 %v5872_v7  ;;  %v251_v6 = vcombine.high %v4954_v51, %v4955_v41  ;;  %v4961_v7 = vld.sshfl [vmem:[%s7154_s0 + $0x2c] sm:$0x1 pattern:$0x75316420]  ;;  %v5945_v51 = vld [vmem:[#allocation2 + $0xa00] ss:$8 sps:$4 sm:$0xff]  }
 0x119   :  { %3551 = vmatprep.subr.bf16.mxu1 %v5875_v10  ;;  %v282_v10 = vcombine.low %v4956_v42, %v4957_v55  ;;  %v5953_v41 = vld [vmem:[#allocation2 + $0xa14] ss:$8 sps:$4 sm:$0xff]  }
 0x11b   :  { %1947 = vmatpush1.bf16.msra.mxu0 %v5870_v14  ;;  %v319_v14 = vrot.slane %v305_v49, %v6480_v54 }
 0x11c   :  { %3552 = vmatpush1.bf16.msra.mxu1 %v5873_v18  ;;  %1948 = vmatprep.subr.bf16.mxu0 %v5878_v19  ;;  %v320_v18 = vcombine.high %v312_v53, %v312_v53  ;;  %v5924_v19 = vld [vmem:[#allocation2 + $0x430] ss:$8 sps:$4 sm:$0xff]  }
 0x11d   :  { %3553 = vmatprep.subr.bf16.mxu1 %v5881_v37  ;;  %v5927_v37 = vld [vmem:[#allocation2 + $0x9d0] ss:$8 sps:$4 sm:$0xff]  }
 0x11f   :  { %1949 = vmatpush1.bf16.msra.mxu0 %v5876_v20  ;;  %v5932_v20 = vld [vmem:[#allocation2 + $0x444] ss:$8 sps:$4 sm:$0xff]  }
 0x120   :  { %3554 = vmatpush1.bf16.msra.mxu1 %v5879_v21  ;;  %1950 = vmatprep.subr.bf16.mxu0 %v5884_v22  ;;  %v5935_v21 = vld [vmem:[#allocation2 + $0x9e4] ss:$8 sps:$4 sm:$0xff]   ;;  %v258_v22 = vrot.slane %v250_v2, %v6480_v54 }
 0x121   :  { %3555 = vmatprep.subr.bf16.mxu1 %v5887_v23  ;;  %v265_v23 = vrot.slane %v251_v6, %v6480_v54 }
 0x123   :  { %1951 = vmatpush1.bf16.msra.mxu0 %v5882_v0  ;;  %v336_v0 = vcombine.low %v4960_v63, %v4961_v7 }
 0x124   :  { %3556 = vmatpush1.bf16.msra.mxu1 %v5885_v24  ;;  %1952 = vmatprep.subr.bf16.mxu0 %v5890_v3  ;;  %v289_v24 = vrot.slane %v282_v10, %v6480_v54  ;;  %v321_v3 = vcombine.high %v319_v14, %v319_v14 }
 0x125   :  { %3557 = vmatprep.subr.bf16.mxu1 %v5893_v15  ;;  %v352_v15 = vunpack.i.h.s16 %v319_v14 }
 0x127   :  { %1953 = vmatpush1.bf16.msra.mxu0 %v5888_v16  ;;  %v354_v16 = vunpack.i.h.s16 %v320_v18  ;;  %v5133_v26 = vpack.i.b16 %v320_v18, %v352_v15  ;;  %v5957_v18 = vld [vmem:[#allocation2 + $0xa20] ss:$8 sps:$4 sm:$0xff]   ;;  %v5974_v15 = vld [vmem:[#allocation2 + $0x4b4] ss:$8 sps:$4 sm:$0xff]  }
 0x128   :  { %3558 = vmatpush1.bf16.msra.mxu1 %v5891_v17  ;;  %1954 = vmatprep.subr.bf16.mxu0 %v5896_v29  ;;  %v1718_v17 = vcombine.low %v6694_v44, %v6697_v39  ;;  %v1720_v29 = vcombine.low %v6700_v52, %v6704_v5  ;;  %v5936_v52 = vld [vmem:[#allocation2 + $0x450] ss:$8 sps:$4 sm:$0xff]  }
 0x129   :  { %3559 = vmatprep.subr.bf16.mxu1 %v5899_v30  ;;  %v5930_v30 = vld [vmem:[#allocation2 + $0x440] ss:$8 sps:$4 sm:$0xff]   ;;  %v5134_v43 = vpack.i.b16 %v321_v3, %v354_v16  ;;  %v5939_v5 = vld [vmem:[#allocation2 + $0x9f0] ss:$8 sps:$4 sm:$0xff]   ;;  %v5977_v16 = vld [vmem:[#allocation2 + $0xa54] ss:$8 sps:$4 sm:$0xff]  }
 0x12a   :  { %v1728_v44 = vrot.slane %v1718_v17, %v6480_v54  ;;  %v1742_v39 = vrot.slane %v1720_v29, %v6480_v54  ;;  %v5972_v17 = vld [vmem:[#allocation2 + $0x4b0] ss:$8 sps:$4 sm:$0xff]  }
 0x12b   :  { %1955 = vmatpush1.bf16.msra.mxu0 %v5894_v31  ;;  %v5933_v31 = vld [vmem:[#allocation2 + $0x9e0] ss:$8 sps:$4 sm:$0xff]   ;;  %v5975_v29 = vld [vmem:[#allocation2 + $0xa50] ss:$8 sps:$4 sm:$0xff]  }
 0x12c   :  { %3560 = vmatpush1.bf16.msra.mxu1 %v5897_v40  ;;  %1956 = vmatprep.subr.bf16.mxu0 %v5902_v25  ;;  %v5938_v40 = vld [vmem:[#allocation2 + $0x454] ss:$8 sps:$4 sm:$0xff]   ;;  %v6786_v10 = vcombine.high %v1728_v44, %v1742_v39 }
 0x12d   :  { %3561 = vmatprep.subr.bf16.mxu1 %v5905_v1  ;;  %v5941_v25 = vld [vmem:[#allocation2 + $0x9f4] ss:$8 sps:$4 sm:$0xff]   ;;  %v266_v1 = vcombine.high %v258_v22, %v258_v22  ;;  %v5963_v22 = vld [vmem:[#allocation2 + $0xa30] ss:$8 sps:$4 sm:$0xff]  }
 0x12f   :  { %1957 = vmatpush1.bf16.msra.mxu0 %v5900_v38  ;;  %v267_v38 = vcombine.high %v265_v23, %v265_v23 }
 0x130   :  { %3562 = vmatpush1.bf16.msra.mxu1 %v5903_v8  ;;  %1958 = vmatprep.subr.bf16.mxu0 %v5908_v4  ;;  %v343_v8 = vrot.slane %v336_v0, %v6480_v54  ;;  %v356_v4 = vunpack.i.h.s16 %v321_v3  ;;  %v5971_v0 = vld [vmem:[#allocation2 + $0xa44] ss:$8 sps:$4 sm:$0xff]   ;;  %v5969_v3 = vld [vmem:[#allocation2 + $0xa40] ss:$8 sps:$4 sm:$0xff]  }
 0x131   :  { %3563 = vmatprep.subr.bf16.mxu1 %v5911_v13  ;;  %v5132_v13 = vpack.i.b16 %v319_v14, %v289_v24  ;;  %v5954_v14 = vld [vmem:[#allocation2 + $0x480] ss:$8 sps:$4 sm:$0xff]  }
 0x132   :  { %v5966_v24 = vld [vmem:[#allocation2 + $0x4a0] ss:$8 sps:$4 sm:$0xff]  }
 0x133   :  { %1959 = vmatpush1.bf16.msra.mxu0 %v5906_v11  ;;  %v5944_v11 = vld [vmem:[#allocation2 + $0x464] ss:$8 sps:$4 sm:$0xff]   ;;  %v2073_v12 = vcombine.low %v267_v38, %v5132_v13  ;;  %v5989_v38 = vld [vmem:[#allocation2 + $0xa74] ss:$8 sps:$4 sm:$0xff]  }
 0x134   :  { %3564 = vmatpush1.bf16.msra.mxu1 %v5909_v27  ;;  %1960 = vmatprep.subr.bf16.mxu0 %v5914_v28  ;;  %v5947_v27 = vld [vmem:[#allocation2 + $0xa04] ss:$8 sps:$4 sm:$0xff]   ;;  %v5135_v28 = vpack.i.b16 %v343_v8, %v356_v4  ;;  %v5984_v8 = vld [vmem:[#allocation2 + $0x4d0] ss:$8 sps:$4 sm:$0xff]  }
 0x135   :  { %3565 = vmatprep.subr.bf16.mxu1 %v5917_v50  ;;  %v2072_v50 = vcombine.low %v265_v23, %v266_v1  ;;  %v6768_v49 = vrot.slane %v2073_v12, %v6480_v54  ;;  %v5968_v23 = vld [vmem:[#allocation2 + $0x4a4] ss:$8 sps:$4 sm:$0xff]   ;;  %v5986_v1 = vld [vmem:[#allocation2 + $0x4d4] ss:$8 sps:$4 sm:$0xff]   ;;  %v5987_v4 = vld [vmem:[#allocation2 + $0xa70] ss:$8 sps:$4 sm:$0xff]  }
 0x136   :  { %v6774_v55 = vrot.slane %v5135_v28, %v6480_v54  ;;  %v6796_v13 = vld [vmem:[#allocation2 + $0x4e4] ss:$8 sps:$4 sm:$0xff]   ;;  %v6826_v12 = vld [vmem:[#allocation2 + $0xaa0] ss:$8 sps:$4 sm:$0xff]  }
 0x137   :  { %1961 = vmatpush1.bf16.msra.mxu0 %v5912_v32  ;;  %v2074_v32 = vcombine.low %v5133_v26, %v5134_v43  ;;  %v6765_v42 = vrot.slane %v2072_v50, %v6480_v54  ;;  %v6798_v26 = vld [vmem:[#allocation2 + $0xa84] ss:$8 sps:$4 sm:$0xff]   ;;  %v6800_v43 = vld [vmem:[#allocation2 + $0x4e0] ss:$8 sps:$4 sm:$0xff]  }
 0x138   :  { %3566 = vmatpush1.bf16.msra.mxu1 %v5915_v33  ;;  %1962 = vmatprep.subr.bf16.mxu0 %v5920_v34  ;;  %v6762_v33 = vcombine.low %v1728_v44, %v1742_v39  ;;  %v5942_v34 = vld [vmem:[#allocation2 + $0x460] ss:$8 sps:$4 sm:$0xff]   ;;  %v6806_v39 = vld [vmem:[#allocation2 + $0x4f4] ss:$8 sps:$4 sm:$0xff]   ;;  %v6820_v28 = vld [vmem:[#allocation2 + $0xaa4] ss:$8 sps:$4 sm:$0xff]  }
 0x139   :  { %3567 = vmatprep.subr.bf16.mxu1 %v5923_v36  ;;  %v5950_v36 = vld [vmem:[#allocation2 + $0x474] ss:$8 sps:$4 sm:$0xff]   ;;  %v6771_v53 = vrot.slane %v2074_v32, %v6480_v54  ;;  %v2104_v63 = vcombine.high %v6765_v42, %v6768_v49  ;;  %v6802_v44 = vld [vmem:[#allocation2 + $0xa80] ss:$8 sps:$4 sm:$0xff]  }
 0x13a   :  { %v6824_v50 = vld [vmem:[#allocation2 + $0x500] ss:$8 sps:$4 sm:$0xff]   ;;  %v6830_v32 = vld [vmem:[#allocation2 + $0x514] ss:$8 sps:$4 sm:$0xff]  }
 0x13b   :  { %1963 = vmatpush1.bf16.msra.mxu0 %v5918_v57  ;;  %v5948_v57 = vld [vmem:[#allocation2 + $0x470] ss:$8 sps:$4 sm:$0xff]   ;;  %v2106_v2 = vcombine.high %v6771_v53, %v6774_v55  ;;  %v2120_v6 = vrot.slane %v2104_v63, %v6480_v54  ;;  %v6856_v63 = vld [vmem:[#allocation2 + $0xad4] ss:$8 sps:$4 sm:$0xff]  }
 0x13c   :  { %3568 = vmatpush1.bf16.msra.mxu1 %v5921_v60  ;;  %1964 = vmatprep.subr.bf16.mxu0 %v5926_v61  ;;  %v5951_v60 = vld [vmem:[#allocation2 + $0xa10] ss:$8 sps:$4 sm:$0xff]   ;;  %v5956_v61 = vld [vmem:[#allocation2 + $0x484] ss:$8 sps:$4 sm:$0xff]  }
 0x13d   :  { %3569 = vmatprep.subr.bf16.mxu1 %v5929_v62  ;;  %v5959_v62 = vld [vmem:[#allocation2 + $0xa24] ss:$8 sps:$4 sm:$0xff]   ;;  %v2134_v7 = vrot.slane %v2106_v2, %v6480_v54  ;;  %v6860_v2 = vld [vmem:[#allocation2 + $0x530] ss:$8 sps:$4 sm:$0xff]  }
 0x13f   :  { %1965 = vmatpush1.bf16.msra.mxu0 %v5924_v19  ;;  %v5962_v19 = vld [vmem:[#allocation2 + $0x494] ss:$8 sps:$4 sm:$0xff]  }
 0x140   :  { %3570 = vmatpush1.bf16.msra.mxu1 %v5927_v37  ;;  %1966 = vmatprep.subr.bf16.mxu0 %v5932_v20  ;;  %v5965_v37 = vld [vmem:[#allocation2 + $0xa34] ss:$8 sps:$4 sm:$0xff]   ;;  %v6788_v20 = vcombine.low %v2120_v6, %v2134_v7  ;;  %v6862_v6 = vld [vmem:[#allocation2 + $0xad0] ss:$8 sps:$4 sm:$0xff]   ;;  %v6866_v7 = vld [vmem:[#allocation2 + $0x544] ss:$8 sps:$4 sm:$0xff]  }
 0x141   :  { %3571 = vmatprep.subr.bf16.mxu1 %v5935_v21  ;;  %v5960_v21 = vld [vmem:[#allocation2 + $0x490] ss:$8 sps:$4 sm:$0xff]  }
 0x143   :  { %1967 = vmatpush1.bf16.msra.mxu0 %v5930_v30  ;;  %v5980_v30 = vld [vmem:[#allocation2 + $0x4c4] ss:$8 sps:$4 sm:$0xff]  }
 0x144   :  { %3572 = vmatpush1.bf16.msra.mxu1 %v5933_v31  ;;  %1968 = vmatprep.subr.bf16.mxu0 %v5938_v40  ;;  %v5983_v31 = vld [vmem:[#allocation2 + $0xa64] ss:$8 sps:$4 sm:$0xff]   ;;  %v5978_v40 = vld [vmem:[#allocation2 + $0x4c0] ss:$8 sps:$4 sm:$0xff]  }
 0x145   :  { %3573 = vmatprep.subr.bf16.mxu1 %v5941_v25  ;;  %v5981_v25 = vld [vmem:[#allocation2 + $0xa60] ss:$8 sps:$4 sm:$0xff]  }
 0x147   :  { %1969 = vmatpush1.bf16.msra.mxu0 %v5936_v52  ;;  %v6808_v52 = vld [vmem:[#allocation2 + $0xa94] ss:$8 sps:$4 sm:$0xff]  }
 0x148   :  { %3574 = vmatpush1.bf16.msra.mxu1 %v5939_v5  ;;  %1981 = vmatprep.subr.bf16.mxu0 %v5944_v11  ;;  %v6812_v5 = vld [vmem:[#allocation2 + $0x4f0] ss:$8 sps:$4 sm:$0xff]  }
 0x149   :  { %3586 = vmatprep.subr.bf16.mxu1 %v5947_v27  ;;  %v6814_v11 = vld [vmem:[#allocation2 + $0xa90] ss:$8 sps:$4 sm:$0xff]   ;;  %v6818_v27 = vld [vmem:[#allocation2 + $0x504] ss:$8 sps:$4 sm:$0xff]  }
 0x14a   :  { %1971 = vmatmul.mubr.bf16.vlgmr.msra.gmra.mrb[0].mxu0 %v6762_v33 }
 0x14b   :  { %3576 = vmatmul.mubr.bf16.vlgmr.msra.gmra.mrb[0].mxu1 %v6762_v33  ;;  %1982 = vmatpush1.bf16.msra.mxu0 %v5942_v34  ;;  %v6832_v34 = vld [vmem:[#allocation2 + $0xab4] ss:$8 sps:$4 sm:$0xff]  }
 0x14c   :  { %3587 = vmatpush1.bf16.msra.mxu1 %v5945_v51  ;;  %1983 = vmatprep.subr.bf16.mxu0 %v5950_v36  ;;  %v6836_v51 = vld [vmem:[#allocation2 + $0x510] ss:$8 sps:$4 sm:$0xff]  }
 0x14d   :  { %3588 = vmatprep.subr.bf16.mxu1 %v5953_v41  ;;  %2013 = vmatprep.mubr.bf16.mxu0 %v7165_v58  ;;  %v6838_v36 = vld [vmem:[#allocation2 + $0xab0] ss:$8 sps:$4 sm:$0xff]   ;;  %v6842_v41 = vld [vmem:[#allocation2 + $0x524] ss:$8 sps:$4 sm:$0xff]  }
 0x14e   :  { %3618 = vmatprep.mubr.bf16.mxu1 %v7165_v58 }
 0x14f   :  { %1984 = vmatpush1.bf16.msra.mxu0 %v5948_v57  ;;  %v6844_v57 = vld [vmem:[#allocation2 + $0xac4] ss:$8 sps:$4 sm:$0xff]  }
 0x150   :  { %3589 = vmatpush1.bf16.msra.mxu1 %v5951_v60  ;;  %2323 = vmatprep.subr.bf16.mxu0 %v5956_v61  ;;  %v6848_v60 = vld [vmem:[#allocation2 + $0x520] ss:$8 sps:$4 sm:$0xff]  }
 0x151   :  { %3850 = vmatprep.subr.bf16.mxu1 %v5959_v62  ;;  %v6850_v61 = vld [vmem:[#allocation2 + $0xac0] ss:$8 sps:$4 sm:$0xff]   ;;  %v6854_v62 = vld [vmem:[#allocation2 + $0x534] ss:$8 sps:$4 sm:$0xff]  }
 0x156   :  { %5131 = vmatmul.mubr.msk.bf16.vlgmr.msra.gmra.mrb[0].mxu0 %vm824_vm0, %v6786_v10 }
 0x157   :  { %5320 = vmatmul.mubr.msk.bf16.vlgmr.msra.gmra.mrb[0].mxu1 %vm824_vm0, %v6786_v10  ;;  %2324 = vmatpush1.bf16.msra.mxu0 %v5954_v14  ;;  %v6868_v14 = vld [vmem:[#allocation2 + $0xae4] ss:$8 sps:$4 sm:$0xff]  }
 0x158   :  { %3851 = vmatpush1.bf16.msra.mxu1 %v5957_v18  ;;  %2325 = vmatprep.subr.bf16.mxu0 %v5962_v19  ;;  %v6872_v18 = vld [vmem:[#allocation2 + $0x540] ss:$8 sps:$4 sm:$0xff]  }
 0x159   :  { %3852 = vmatprep.subr.bf16.mxu1 %v5965_v37  ;;  %2355 = vmatprep.mubr.bf16.mxu0 %v6788_v20  ;;  %v6874_v19 = vld [vmem:[#allocation2 + $0xae0] ss:$8 sps:$4 sm:$0xff]   ;;  %v6878_v37 = vld [vmem:[#allocation2 + $0x554] ss:$8 sps:$4 sm:$0xff]  }
 0x15a   :  { %3882 = vmatprep.mubr.bf16.mxu1 %v6788_v20 }
 0x15b   :  { %2326 = vmatpush1.bf16.msra.mxu0 %v5960_v21  ;;  %v6880_v21 = vld [vmem:[#allocation2 + $0xaf4] ss:$8 sps:$4 sm:$0xff]  }
 0x15c   :  { %3853 = vmatpush1.bf16.msra.mxu1 %v5963_v22  ;;  %2327 = vmatprep.subr.bf16.mxu0 %v5968_v23  ;;  %v6884_v22 = vld [vmem:[#allocation2 + $0x550] ss:$8 sps:$4 sm:$0xff]  }
 0x15d   :  { %3854 = vmatprep.subr.bf16.mxu1 %v5971_v0  ;;  %v6886_v23 = vld [vmem:[#allocation2 + $0xaf0] ss:$8 sps:$4 sm:$0xff]   ;;  %v6890_v0 = vld [vmem:[#allocation2 + $0x564] ss:$8 sps:$4 sm:$0xff]  }
 0x15f   :  { %2328 = vmatpush1.bf16.msra.mxu0 %v5966_v24  ;;  %v6892_v24 = vld [vmem:[#allocation2 + $0xb04] ss:$8 sps:$4 sm:$0xff]  }
 0x160   :  { %3855 = vmatpush1.bf16.msra.mxu1 %v5969_v3  ;;  %2329 = vmatprep.subr.bf16.mxu0 %v5974_v15  ;;  %v2103_v3 = vcombine.low %v6765_v42, %v6768_v49  ;;  %v2105_v15 = vcombine.low %v6771_v53, %v6774_v55  ;;  %v6914_v53 = vld [vmem:[#allocation2 + $0x570] ss:$8 sps:$4 sm:$0xff]  }
 0x161   :  { %3856 = vmatprep.subr.bf16.mxu1 %v5977_v16  ;;  %v6900_v16 = vld [vmem:[#allocation2 + $0x560] ss:$8 sps:$4 sm:$0xff]   ;;  %7186 = vst [vmem:[#allocation11_spill] sm:$0xff] %v6914_v53  ;;  %v6916_v55 = vld [vmem:[#allocation2 + $0xb10] ss:$8 sps:$4 sm:$0xff]  }
 0x162   :  { %v2113_v42 = vrot.slane %v2103_v3, %v6480_v54  ;;  %v2127_v49 = vrot.slane %v2105_v15, %v6480_v54  ;;  %7187 = vst [vmem:[#allocation12_spill] sm:$0xff] %v6916_v55  ;;  %v6942_v3 = vld [vmem:[#allocation2 + $0x590] ss:$8 sps:$4 sm:$0xff]  }
 0x163   :  { %2330 = vmatpush1.bf16.msra.mxu0 %v5972_v17  ;;  %v6902_v17 = vld [vmem:[#allocation2 + $0xb00] ss:$8 sps:$4 sm:$0xff]   ;;  %7194 = vst [vmem:[#allocation19_spill] sm:$0xff] %v6942_v3  ;;  %v6944_v15 = vld [vmem:[#allocation2 + $0xb30] ss:$8 sps:$4 sm:$0xff]  }
 0x164   :  { %3857 = vmatpush1.bf16.msra.mxu1 %v5975_v29  ;;  %2331 = vmatprep.subr.bf16.mxu0 %v5980_v30  ;;  %v6906_v29 = vld [vmem:[#allocation2 + $0x574] ss:$8 sps:$4 sm:$0xff]   ;;  %7195 = vst [vmem:[#allocation20_spill] sm:$0xff] %v6944_v15 }
 0x165   :  { %3858 = vmatprep.subr.bf16.mxu1 %v5983_v31  ;;  %7184 = vst [vmem:[#allocation9_spill] sm:$0xff] %v6906_v29  ;;  %v6908_v30 = vld [vmem:[#allocation2 + $0xb14] ss:$8 sps:$4 sm:$0xff]   ;;  %v6920_v31 = vld [vmem:[#allocation2 + $0x584] ss:$8 sps:$4 sm:$0xff]  }
 0x166   :  { %7185 = vst [vmem:[#allocation10_spill] sm:$0xff] %v6908_v30  ;;  %7188 = vst [vmem:[#allocation13_spill] sm:$0xff] %v6920_v31 }
 0x167   :  { %2332 = vmatpush1.bf16.msra.mxu0 %v5978_v40  ;;  %v6922_v40 = vld [vmem:[#allocation2 + $0xb24] ss:$8 sps:$4 sm:$0xff]  }
 0x168   :  { %3859 = vmatpush1.bf16.msra.mxu1 %v5981_v25  ;;  %2333 = vmatprep.subr.bf16.mxu0 %v5986_v1  ;;  %7189 = vst [vmem:[#allocation14_spill] sm:$0xff] %v6922_v40  ;;  %v6924_v25 = vcombine.low %v2113_v42, %v2127_v49  ;;  %v6928_v1 = vld [vmem:[#allocation2 + $0x580] ss:$8 sps:$4 sm:$0xff]  }
 0x169   :  { %3860 = vmatprep.subr.bf16.mxu1 %v5989_v38  ;;  %7190 = vst [vmem:[#allocation15_spill] sm:$0xff] %v6928_v1  ;;  %v6930_v38 = vld [vmem:[#allocation2 + $0xb20] ss:$8 sps:$4 sm:$0xff]  }
 0x16a   :  { %7191 = vst [vmem:[#allocation16_spill] sm:$0xff] %v6930_v38 }
 0x16b   :  { %2334 = vmatpush1.bf16.msra.mxu0 %v5984_v8  ;;  %v6934_v8 = vld [vmem:[#allocation2 + $0x594] ss:$8 sps:$4 sm:$0xff]  }
 0x16c   :  { %3861 = vmatpush1.bf16.msra.mxu1 %v5987_v4  ;;  %2335 = vmatprep.subr.bf16.mxu0 %v6796_v13  ;;  %7192 = vst [vmem:[#allocation17_spill] sm:$0xff] %v6934_v8  ;;  %v6936_v4 = vld [vmem:[#allocation2 + $0xb34] ss:$8 sps:$4 sm:$0xff]  }
 0x16d   :  { %3862 = vmatprep.subr.bf16.mxu1 %v6798_v26  ;;  %7193 = vst [vmem:[#allocation18_spill] sm:$0xff] %v6936_v4 }
 0x16f   :  { %2336 = vmatpush1.bf16.msra.mxu0 %v6800_v43 }
 0x170   :  { %3863 = vmatpush1.bf16.msra.mxu1 %v6802_v44  ;;  %2337 = vmatprep.subr.bf16.mxu0 %v6806_v39 }
 0x171   :  { %3864 = vmatprep.subr.bf16.mxu1 %v6808_v52 }
 0x173   :  { %2338 = vmatpush1.bf16.msra.mxu0 %v6812_v5 }
 0x174   :  { %3865 = vmatpush1.bf16.msra.mxu1 %v6814_v11  ;;  %2339 = vmatprep.subr.bf16.mxu0 %v6818_v27 }
 0x175   :  { %3866 = vmatprep.subr.bf16.mxu1 %v6820_v28 }
 0x177   :  { %2340 = vmatpush1.bf16.msra.mxu0 %v6824_v50 }
 0x178   :  { %3867 = vmatpush1.bf16.msra.mxu1 %v6826_v12  ;;  %2341 = vmatprep.subr.bf16.mxu0 %v6830_v32 }
 0x179   :  { %3868 = vmatprep.subr.bf16.mxu1 %v6832_v34 }
 0x17b   :  { %2342 = vmatpush1.bf16.msra.mxu0 %v6836_v51 }
 0x17c   :  { %3869 = vmatpush1.bf16.msra.mxu1 %v6838_v36  ;;  %2343 = vmatprep.subr.bf16.mxu0 %v6842_v41 }
 0x17d   :  { %3870 = vmatprep.subr.bf16.mxu1 %v6844_v57 }
 0x17f   :  { %2344 = vmatpush1.bf16.msra.mxu0 %v6848_v60 }
 0x180   :  { %3871 = vmatpush1.bf16.msra.mxu1 %v6850_v61  ;;  %2345 = vmatprep.subr.bf16.mxu0 %v6854_v62 }
 0x181   :  { %3872 = vmatprep.subr.bf16.mxu1 %v6856_v63 }
 0x183   :  { %2346 = vmatpush1.bf16.msra.mxu0 %v6860_v2 }
 0x184   :  { %3873 = vmatpush1.bf16.msra.mxu1 %v6862_v6  ;;  %2347 = vmatprep.subr.bf16.mxu0 %v6866_v7 }
 0x185   :  { %3874 = vmatprep.subr.bf16.mxu1 %v6868_v14 }
 0x187   :  { %2348 = vmatpush1.bf16.msra.mxu0 %v6872_v18 }
 0x188   :  { %3875 = vmatpush1.bf16.msra.mxu1 %v6874_v19  ;;  %2349 = vmatprep.subr.bf16.mxu0 %v6878_v37 }
 0x189   :  { %3876 = vmatprep.subr.bf16.mxu1 %v6880_v21 }
 0x18b   :  { %2350 = vmatpush1.bf16.msra.mxu0 %v6884_v22 }
 0x18c   :  { %3877 = vmatpush1.bf16.msra.mxu1 %v6886_v23  ;;  %2351 = vmatprep.subr.bf16.mxu0 %v6890_v0 }
 0x18d   :  { %3878 = vmatprep.subr.bf16.mxu1 %v6892_v24 }
 0x18f   :  { %2352 = vmatpush1.bf16.msra.mxu0 %v6900_v16 }
 0x190   :  { %3879 = vmatpush1.bf16.msra.mxu1 %v6902_v17  ;;  %2353 = vmatprep.subr.bf16.mxu0 %v6906_v29  ;;  %v6336_v29 = vld [vmem:[#allocation2 + $0x440] ss:$8 sps:$4 sm:$0xff]  }
 0x191   :  { %3880 = vmatprep.subr.bf16.mxu1 %v6908_v30 }
 0x193   :  { %2354 = vmatpush1.bf16.msra.mxu0 %v6914_v53 }
 0x194   :  { %3881 = vmatpush1.bf16.msra.mxu1 %v6916_v55  ;;  %2366 = vmatprep.subr.bf16.mxu0 %v6920_v31  ;;  %v6333_v31 = vld [vmem:[#allocation2 + $0x9d0] ss:$8 sps:$4 sm:$0xff]  }
 0x195   :  { %3893 = vmatprep.subr.bf16.mxu1 %v6922_v40  ;;  %v6077_v40 = vld [vmem:[#allocation2 + $0x6f0] ss:$8 sps:$4 sm:$0xff]  }
 0x196   :  { %2356 = vmatmul.mubr.bf16.vlgmr.msra.gmra.mrb[0].mxu0 %v6924_v25 }
 0x197   :  { %3883 = vmatmul.mubr.bf16.vlgmr.msra.gmra.mrb[0].mxu1 %v6924_v25  ;;  %2367 = vmatpush1.bf16.msra.mxu0 %v6928_v1  ;;  %v6063_v1 = vld [vmem:[#allocation2 + $0x6c4] ss:$8 sps:$4 sm:$0xff]  }
 0x198   :  { %3894 = vmatpush1.bf16.msra.mxu1 %v6930_v38  ;;  %2368 = vmatprep.subr.bf16.mxu0 %v6934_v8  ;;  %v6952_v38 = vcombine.high %v2113_v42, %v2127_v49  ;;  %v6065_v8 = vld [vmem:[#allocation2 + $0x6c0] ss:$8 sps:$4 sm:$0xff]   ;;  %v6069_v42 = vld [vmem:[#allocation2 + $0x6d0] ss:$8 sps:$4 sm:$0xff]   ;;  %v6070_v49 = vld [vmem:[#allocation2 + $0x144] ss:$8 sps:$4 sm:$0xff]  }
 0x199   :  { %3895 = vmatprep.subr.bf16.mxu1 %v6936_v4  ;;  %2398 = vmatprep.mubr.bf16.mxu0 %v7165_v58  ;;  %v6064_v4 = vld [vmem:[#allocation2 + $0x120] ss:$8 sps:$4 sm:$0xff]  }
 0x19a   :  { %3925 = vmatprep.mubr.bf16.mxu1 %v7165_v58  ;;  %v6066_v58 = vld [vmem:[#allocation2 + $0x134] ss:$8 sps:$4 sm:$0xff]  }
 0x19b   :  { %2369 = vmatpush1.bf16.msra.mxu0 %v6942_v3  ;;  %v6067_v3 = vld [vmem:[#allocation2 + $0x6d4] ss:$8 sps:$4 sm:$0xff]  }
 0x19c   :  { %3896 = vmatpush1.bf16.msra.mxu1 %v6944_v15  ;;  %3944 = vmatprep.subr.bf16.mxu0 %v6062_v48  ;;  %v6068_v48 = vld [vmem:[#allocation2 + $0x130] ss:$8 sps:$4 sm:$0xff]   ;;  %v6072_v15 = vld [vmem:[#allocation2 + $0x140] ss:$8 sps:$4 sm:$0xff]  }
 0x19d   :  { %4468 = vmatprep.subr.bf16.mxu1 %v6063_v1  ;;  %v6071_v1 = vld [vmem:[#allocation2 + $0x6e4] ss:$8 sps:$4 sm:$0xff]  }
 0x1a2   :  { %5172 = vmatmul.mubr.msk.bf16.vlgmr.msra.gmra.mrb[0].mxu0 %vm824_vm0, %v6952_v38 }
 0x1a3   :  { %5357 = vmatmul.mubr.msk.bf16.vlgmr.msra.gmra.mrb[0].mxu1 %vm824_vm0, %v6952_v38  ;;  %3945 = vmatpush1.bf16.msra.mxu0 %v6064_v4  ;;  %v6073_v4 = vld [vmem:[#allocation2 + $0x6e0] ss:$8 sps:$4 sm:$0xff]  }
 0x1a4   :  { %4469 = vmatpush1.bf16.msra.mxu1 %v6065_v8  ;;  %3946 = vmatprep.subr.bf16.mxu0 %v6066_v58  ;;  %v6074_v8 = vld [vmem:[#allocation2 + $0x154] ss:$8 sps:$4 sm:$0xff]  }
 0x1a5   :  { %4470 = vmatprep.subr.bf16.mxu1 %v6067_v3  ;;  %3976 = vmatprep.mubr.bf16.mxu0 %v6668_v56  ;;  %v6075_v58 = vld [vmem:[#allocation2 + $0x6f4] ss:$8 sps:$4 sm:$0xff]   ;;  %v6076_v3 = vld [vmem:[#allocation2 + $0x150] ss:$8 sps:$4 sm:$0xff]  }
 0x1a6   :  { %4500 = vmatprep.mubr.bf16.mxu1 %v6668_v56  ;;  %v6078_v56 = vld [vmem:[#allocation2 + $0x164] ss:$8 sps:$4 sm:$0xff]  }
 0x1a7   :  { %3947 = vmatpush1.bf16.msra.mxu0 %v6068_v48  ;;  %v6079_v48 = vld [vmem:[#allocation2 + $0x704] ss:$8 sps:$4 sm:$0xff]  }
 0x1a8   :  { %4471 = vmatpush1.bf16.msra.mxu1 %v6069_v42  ;;  %3948 = vmatprep.subr.bf16.mxu0 %v6070_v49  ;;  %v6080_v42 = vld [vmem:[#allocation2 + $0x160] ss:$8 sps:$4 sm:$0xff]  }
 0x1a9   :  { %4472 = vmatprep.subr.bf16.mxu1 %v6071_v1  ;;  %v6081_v49 = vld [vmem:[#allocation2 + $0x700] ss:$8 sps:$4 sm:$0xff]   ;;  %v6082_v1 = vld [vmem:[#allocation2 + $0x174] ss:$8 sps:$4 sm:$0xff]  }
 0x1ab   :  { %3949 = vmatpush1.bf16.msra.mxu0 %v6072_v15  ;;  %v6083_v15 = vld [vmem:[#allocation2 + $0x714] ss:$8 sps:$4 sm:$0xff]  }
 0x1ac   :  { %4473 = vmatpush1.bf16.msra.mxu1 %v6073_v4  ;;  %3950 = vmatprep.subr.bf16.mxu0 %v6074_v8  ;;  %v6084_v4 = vld [vmem:[#allocation2 + $0x170] ss:$8 sps:$4 sm:$0xff]  }
 0x1ad   :  { %4474 = vmatprep.subr.bf16.mxu1 %v6075_v58  ;;  %v6085_v8 = vld [vmem:[#allocation2 + $0x710] ss:$8 sps:$4 sm:$0xff]   ;;  %v6086_v58 = vld [vmem:[#allocation2 + $0x184] ss:$8 sps:$4 sm:$0xff]  }
 0x1af   :  { %3951 = vmatpush1.bf16.msra.mxu0 %v6076_v3  ;;  %v6087_v3 = vld [vmem:[#allocation2 + $0x724] ss:$8 sps:$4 sm:$0xff]  }
 0x1b0   :  { %4475 = vmatpush1.bf16.msra.mxu1 %v6077_v40  ;;  %3952 = vmatprep.subr.bf16.mxu0 %v6078_v56  ;;  %v6088_v40 = vld [vmem:[#allocation2 + $0x180] ss:$8 sps:$4 sm:$0xff]  }
 0x1b1   :  { %4476 = vmatprep.subr.bf16.mxu1 %v6079_v48  ;;  %v6089_v56 = vld [vmem:[#allocation2 + $0x720] ss:$8 sps:$4 sm:$0xff]   ;;  %v6090_v48 = vld [vmem:[#allocation2 + $0x194] ss:$8 sps:$4 sm:$0xff]  }
 0x1b3   :  { %3953 = vmatpush1.bf16.msra.mxu0 %v6080_v42  ;;  %v6091_v42 = vld [vmem:[#allocation2 + $0x734] ss:$8 sps:$4 sm:$0xff]  }
 0x1b4   :  { %4477 = vmatpush1.bf16.msra.mxu1 %v6081_v49  ;;  %3954 = vmatprep.subr.bf16.mxu0 %v6082_v1  ;;  %v6092_v49 = vld [vmem:[#allocation2 + $0x190] ss:$8 sps:$4 sm:$0xff]  }
 0x1b5   :  { %4478 = vmatprep.subr.bf16.mxu1 %v6083_v15  ;;  %v6093_v1 = vld [vmem:[#allocation2 + $0x730] ss:$8 sps:$4 sm:$0xff]   ;;  %v6094_v15 = vld [vmem:[#allocation2 + $0x1a4] ss:$8 sps:$4 sm:$0xff]  }
 0x1b7   :  { %3955 = vmatpush1.bf16.msra.mxu0 %v6084_v4  ;;  %v6095_v4 = vld [vmem:[#allocation2 + $0x744] ss:$8 sps:$4 sm:$0xff]  }
 0x1b8   :  { %4479 = vmatpush1.bf16.msra.mxu1 %v6085_v8  ;;  %3956 = vmatprep.subr.bf16.mxu0 %v6086_v58  ;;  %v6096_v8 = vld [vmem:[#allocation2 + $0x1a0] ss:$8 sps:$4 sm:$0xff]  }
 0x1b9   :  { %4480 = vmatprep.subr.bf16.mxu1 %v6087_v3  ;;  %v6097_v58 = vld [vmem:[#allocation2 + $0x740] ss:$8 sps:$4 sm:$0xff]   ;;  %v6098_v3 = vld [vmem:[#allocation2 + $0x1b4] ss:$8 sps:$4 sm:$0xff]  }
 0x1bb   :  { %3957 = vmatpush1.bf16.msra.mxu0 %v6088_v40  ;;  %v6099_v40 = vld [vmem:[#allocation2 + $0x754] ss:$8 sps:$4 sm:$0xff]  }
 0x1bc   :  { %4481 = vmatpush1.bf16.msra.mxu1 %v6089_v56  ;;  %3958 = vmatprep.subr.bf16.mxu0 %v6090_v48  ;;  %v6100_v56 = vld [vmem:[#allocation2 + $0x1b0] ss:$8 sps:$4 sm:$0xff]  }
 0x1bd   :  { %4482 = vmatprep.subr.bf16.mxu1 %v6091_v42  ;;  %v6101_v48 = vld [vmem:[#allocation2 + $0x750] ss:$8 sps:$4 sm:$0xff]   ;;  %v6102_v42 = vld [vmem:[#allocation2 + $0x1c4] ss:$8 sps:$4 sm:$0xff]  }
 0x1bf   :  { %3959 = vmatpush1.bf16.msra.mxu0 %v6092_v49  ;;  %v6103_v49 = vld [vmem:[#allocation2 + $0x764] ss:$8 sps:$4 sm:$0xff]  }
 0x1c0   :  { %4483 = vmatpush1.bf16.msra.mxu1 %v6093_v1  ;;  %3960 = vmatprep.subr.bf16.mxu0 %v6094_v15  ;;  %v6104_v1 = vld [vmem:[#allocation2 + $0x1c0] ss:$8 sps:$4 sm:$0xff]  }
 0x1c1   :  { %4484 = vmatprep.subr.bf16.mxu1 %v6095_v4  ;;  %v6105_v15 = vld [vmem:[#allocation2 + $0x760] ss:$8 sps:$4 sm:$0xff]   ;;  %v6106_v4 = vld [vmem:[#allocation2 + $0x1d4] ss:$8 sps:$4 sm:$0xff]  }
 0x1c3   :  { %3961 = vmatpush1.bf16.msra.mxu0 %v6096_v8  ;;  %v6107_v8 = vld [vmem:[#allocation2 + $0x774] ss:$8 sps:$4 sm:$0xff]  }
 0x1c4   :  { %4485 = vmatpush1.bf16.msra.mxu1 %v6097_v58  ;;  %3962 = vmatprep.subr.bf16.mxu0 %v6098_v3  ;;  %v6108_v58 = vld [vmem:[#allocation2 + $0x1d0] ss:$8 sps:$4 sm:$0xff]  }
 0x1c5   :  { %4486 = vmatprep.subr.bf16.mxu1 %v6099_v40  ;;  %v6109_v3 = vld [vmem:[#allocation2 + $0x770] ss:$8 sps:$4 sm:$0xff]   ;;  %v6110_v40 = vld [vmem:[#allocation2 + $0x1e4] ss:$8 sps:$4 sm:$0xff]  }
 0x1c7   :  { %3963 = vmatpush1.bf16.msra.mxu0 %v6100_v56  ;;  %v6111_v56 = vld [vmem:[#allocation2 + $0x784] ss:$8 sps:$4 sm:$0xff]  }
 0x1c8   :  { %4487 = vmatpush1.bf16.msra.mxu1 %v6101_v48  ;;  %3964 = vmatprep.subr.bf16.mxu0 %v6102_v42  ;;  %v6112_v48 = vld [vmem:[#allocation2 + $0x1e0] ss:$8 sps:$4 sm:$0xff]  }
 0x1c9   :  { %4488 = vmatprep.subr.bf16.mxu1 %v6103_v49  ;;  %v6113_v42 = vld [vmem:[#allocation2 + $0x780] ss:$8 sps:$4 sm:$0xff]   ;;  %v6114_v49 = vld [vmem:[#allocation2 + $0x1f4] ss:$8 sps:$4 sm:$0xff]  }
 0x1cb   :  { %3965 = vmatpush1.bf16.msra.mxu0 %v6104_v1  ;;  %v6115_v1 = vld [vmem:[#allocation2 + $0x794] ss:$8 sps:$4 sm:$0xff]  }
 0x1cc   :  { %4489 = vmatpush1.bf16.msra.mxu1 %v6105_v15  ;;  %3966 = vmatprep.subr.bf16.mxu0 %v6106_v4  ;;  %v6116_v15 = vld [vmem:[#allocation2 + $0x1f0] ss:$8 sps:$4 sm:$0xff]  }
 0x1cd   :  { %4490 = vmatprep.subr.bf16.mxu1 %v6107_v8  ;;  %v6117_v4 = vld [vmem:[#allocation2 + $0x790] ss:$8 sps:$4 sm:$0xff]   ;;  %v6118_v8 = vld [vmem:[#allocation2 + $0x204] ss:$8 sps:$4 sm:$0xff]  }
 0x1cf   :  { %3967 = vmatpush1.bf16.msra.mxu0 %v6108_v58  ;;  %v6119_v58 = vld [vmem:[#allocation2 + $0x7a4] ss:$8 sps:$4 sm:$0xff]  }
 0x1d0   :  { %4491 = vmatpush1.bf16.msra.mxu1 %v6109_v3  ;;  %3968 = vmatprep.subr.bf16.mxu0 %v6110_v40  ;;  %v6120_v3 = vld [vmem:[#allocation2 + $0x200] ss:$8 sps:$4 sm:$0xff]  }
 0x1d1   :  { %4492 = vmatprep.subr.bf16.mxu1 %v6111_v56  ;;  %v6121_v40 = vld [vmem:[#allocation2 + $0x7a0] ss:$8 sps:$4 sm:$0xff]   ;;  %v6122_v56 = vld [vmem:[#allocation2 + $0x214] ss:$8 sps:$4 sm:$0xff]  }
 0x1d3   :  { %3969 = vmatpush1.bf16.msra.mxu0 %v6112_v48  ;;  %v6123_v48 = vld [vmem:[#allocation2 + $0x7b4] ss:$8 sps:$4 sm:$0xff]  }
 0x1d4   :  { %4493 = vmatpush1.bf16.msra.mxu1 %v6113_v42  ;;  %3970 = vmatprep.subr.bf16.mxu0 %v6114_v49  ;;  %v6124_v42 = vld [vmem:[#allocation2 + $0x210] ss:$8 sps:$4 sm:$0xff]  }
 0x1d5   :  { %4494 = vmatprep.subr.bf16.mxu1 %v6115_v1  ;;  %v6125_v49 = vld [vmem:[#allocation2 + $0x7b0] ss:$8 sps:$4 sm:$0xff]   ;;  %v6126_v1 = vld [vmem:[#allocation2 + $0x224] ss:$8 sps:$4 sm:$0xff]  }
 0x1d7   :  { %3971 = vmatpush1.bf16.msra.mxu0 %v6116_v15  ;;  %v6127_v15 = vld [vmem:[#allocation2 + $0x7c4] ss:$8 sps:$4 sm:$0xff]  }
 0x1d8   :  { %4495 = vmatpush1.bf16.msra.mxu1 %v6117_v4  ;;  %3972 = vmatprep.subr.bf16.mxu0 %v6118_v8  ;;  %v6128_v4 = vld [vmem:[#allocation2 + $0x220] ss:$8 sps:$4 sm:$0xff]  }
 0x1d9   :  { %4496 = vmatprep.subr.bf16.mxu1 %v6119_v58  ;;  %v6129_v8 = vld [vmem:[#allocation2 + $0x7c0] ss:$8 sps:$4 sm:$0xff]   ;;  %v6130_v58 = vld [vmem:[#allocation2 + $0x234] ss:$8 sps:$4 sm:$0xff]  }
 0x1db   :  { %3973 = vmatpush1.bf16.msra.mxu0 %v6120_v3  ;;  %v6131_v3 = vld [vmem:[#allocation2 + $0x7d4] ss:$8 sps:$4 sm:$0xff]  }
 0x1dc   :  { %4497 = vmatpush1.bf16.msra.mxu1 %v6121_v40  ;;  %3974 = vmatprep.subr.bf16.mxu0 %v6122_v56  ;;  %v7196_v40 = vmov 0   ;;  %v6132_v56 = vld [vmem:[#allocation2 + $0x230] ss:$8 sps:$4 sm:$0xff]  }
 0x1dd   :  { %4498 = vmatprep.subr.bf16.mxu1 %v6123_v48  ;;  %v6133_v48 = vld [vmem:[#allocation2 + $0x7d0] ss:$8 sps:$4 sm:$0xff]  }
 0x1df   :  { %3975 = vmatpush1.bf16.msra.mxu0 %v6124_v42  ;;  %v6134_v42 = vld [vmem:[#allocation2 + $0x4] ss:$8 sps:$4 sm:$0xff]  }
 0x1e0   :  { %4499 = vmatpush1.bf16.msra.mxu1 %v6125_v49  ;;  %3987 = vmatprep.subr.bf16.mxu0 %v6126_v1  ;;  %v6135_v49 = vld [vmem:[#allocation2 + $0x5a4] ss:$8 sps:$4 sm:$0xff]   ;;  %v6137_v1 = vld [vmem:[#allocation2 + $0x5a0] ss:$8 sps:$4 sm:$0xff]  }
 0x1e1   :  { %4511 = vmatprep.subr.bf16.mxu1 %v6127_v15  ;;  %v6138_v15 = vld [vmem:[#allocation2 + $0x14] ss:$8 sps:$4 sm:$0xff]  }
 0x1e2   :  { %3977 = vmatmul.mubr.bf16.vlgmr.msra.gmra.mrb[4].mxu0 %v6691_v9 }
 0x1e3   :  { %4501 = vmatmul.mubr.bf16.vlgmr.msra.gmra.mrb[4].mxu1 %v6691_v9  ;;  %3988 = vmatpush1.bf16.msra.mxu0 %v6128_v4  ;;  %v6136_v9 = vld [vmem:[#allocation2] ss:$8 sps:$4 sm:$0xff]   ;;  %v6139_v4 = vld [vmem:[#allocation2 + $0x5b4] ss:$8 sps:$4 sm:$0xff]  }
 0x1e4   :  { %4512 = vmatpush1.bf16.msra.mxu1 %v6129_v8  ;;  %3989 = vmatprep.subr.bf16.mxu0 %v6130_v58  ;;  %v6140_v8 = vld [vmem:[#allocation2 + $0x10] ss:$8 sps:$4 sm:$0xff]  }
 0x1e5   :  { %4513 = vmatprep.subr.bf16.mxu1 %v6131_v3  ;;  %4019 = vmatprep.mubr.bf16.mxu0 %v7196_v40  ;;  %v6141_v58 = vld [vmem:[#allocation2 + $0x5b0] ss:$8 sps:$4 sm:$0xff]   ;;  %v6142_v3 = vld [vmem:[#allocation2 + $0x24] ss:$8 sps:$4 sm:$0xff]  }
 0x1e6   :  { %4543 = vmatprep.mubr.bf16.mxu1 %v7196_v40 }
 0x1e7   :  { %3990 = vmatpush1.bf16.msra.mxu0 %v6132_v56  ;;  %v6143_v56 = vld [vmem:[#allocation2 + $0x5c4] ss:$8 sps:$4 sm:$0xff]  }
 0x1e8   :  { %4514 = vmatpush1.bf16.msra.mxu1 %v6133_v48  ;;  %4030 = vmatprep.subr.bf16.mxu0 %v6134_v42  ;;  %v6145_v48 = vld [vmem:[#allocation2 + $0x5c0] ss:$8 sps:$4 sm:$0xff]   ;;  %v6146_v42 = vld [vmem:[#allocation2 + $0x34] ss:$8 sps:$4 sm:$0xff]  }
 0x1e9   :  { %4554 = vmatprep.subr.bf16.mxu1 %v6135_v49  ;;  %v6147_v49 = vld [vmem:[#allocation2 + $0x5d4] ss:$8 sps:$4 sm:$0xff]  }
 0x1ee   :  { %5358 = vmatmul.mubr.msk.bf16.vlgmr.msra.gmra.mrb[4].mxu0 %vm824_vm0, %v6716_v35 }
 0x1ef   :  { %5367 = vmatmul.mubr.msk.bf16.vlgmr.msra.gmra.mrb[4].mxu1 %vm824_vm0, %v6716_v35  ;;  %4031 = vmatpush1.bf16.msra.mxu0 %v6136_v9  ;;  %v6144_v35 = vld [vmem:[#allocation2 + $0x20] ss:$8 sps:$4 sm:$0xff]   ;;  %v6148_v9 = vld [vmem:[#allocation2 + $0x30] ss:$8 sps:$4 sm:$0xff]  }
 0x1f0   :  { %4555 = vmatpush1.bf16.msra.mxu1 %v6137_v1  ;;  %4032 = vmatprep.subr.bf16.mxu0 %v6138_v15  ;;  %v6149_v1 = vld [vmem:[#allocation2 + $0x5d0] ss:$8 sps:$4 sm:$0xff]   ;;  %v6151_v15 = vld [vmem:[#allocation2 + $0x5e4] ss:$8 sps:$4 sm:$0xff]  }
 0x1f1   :  { %4556 = vmatprep.subr.bf16.mxu1 %v6139_v4  ;;  %4062 = vmatprep.mubr.bf16.mxu0 %v6543_v45  ;;  %v6152_v4 = vld [vmem:[#allocation2 + $0x40] ss:$8 sps:$4 sm:$0xff]  }
 0x1f2   :  { %4586 = vmatprep.mubr.bf16.mxu1 %v6543_v45  ;;  %v6150_v45 = vld [vmem:[#allocation2 + $0x44] ss:$8 sps:$4 sm:$0xff]  }
 0x1f3   :  { %4033 = vmatpush1.bf16.msra.mxu0 %v6140_v8  ;;  %v6153_v8 = vld [vmem:[#allocation2 + $0x5e0] ss:$8 sps:$4 sm:$0xff]  }
 0x1f4   :  { %4557 = vmatpush1.bf16.msra.mxu1 %v6141_v58  ;;  %4034 = vmatprep.subr.bf16.mxu0 %v6142_v3  ;;  %v6154_v58 = vld [vmem:[#allocation2 + $0x54] ss:$8 sps:$4 sm:$0xff]  }
 0x1f5   :  { %4558 = vmatprep.subr.bf16.mxu1 %v6143_v56  ;;  %v6155_v3 = vld [vmem:[#allocation2 + $0x5f4] ss:$8 sps:$4 sm:$0xff]   ;;  %v6156_v56 = vld [vmem:[#allocation2 + $0x50] ss:$8 sps:$4 sm:$0xff]  }
 0x1f7   :  { %4035 = vmatpush1.bf16.msra.mxu0 %v6144_v35  ;;  %v6157_v35 = vld [vmem:[#allocation2 + $0x5f0] ss:$8 sps:$4 sm:$0xff]  }
 0x1f8   :  { %4559 = vmatpush1.bf16.msra.mxu1 %v6145_v48  ;;  %4036 = vmatprep.subr.bf16.mxu0 %v6146_v42  ;;  %v6158_v48 = vld [vmem:[#allocation2 + $0x64] ss:$8 sps:$4 sm:$0xff]  }
 0x1f9   :  { %4560 = vmatprep.subr.bf16.mxu1 %v6147_v49  ;;  %v6159_v42 = vld [vmem:[#allocation2 + $0x604] ss:$8 sps:$4 sm:$0xff]   ;;  %v6160_v49 = vld [vmem:[#allocation2 + $0x60] ss:$8 sps:$4 sm:$0xff]  }
 0x1fb   :  { %4037 = vmatpush1.bf16.msra.mxu0 %v6148_v9  ;;  %v6161_v9 = vld [vmem:[#allocation2 + $0x600] ss:$8 sps:$4 sm:$0xff]  }
 0x1fc   :  { %4561 = vmatpush1.bf16.msra.mxu1 %v6149_v1  ;;  %4038 = vmatprep.subr.bf16.mxu0 %v6150_v45  ;;  %v6162_v1 = vld [vmem:[#allocation2 + $0x74] ss:$8 sps:$4 sm:$0xff]  }
 0x1fd   :  { %4562 = vmatprep.subr.bf16.mxu1 %v6151_v15  ;;  %v6163_v45 = vld [vmem:[#allocation2 + $0x614] ss:$8 sps:$4 sm:$0xff]   ;;  %v6164_v15 = vld [vmem:[#allocation2 + $0x70] ss:$8 sps:$4 sm:$0xff]  }
 0x1ff   :  { %4039 = vmatpush1.bf16.msra.mxu0 %v6152_v4  ;;  %v6165_v4 = vld [vmem:[#allocation2 + $0x610] ss:$8 sps:$4 sm:$0xff]  }
 0x200   :  { %4563 = vmatpush1.bf16.msra.mxu1 %v6153_v8  ;;  %4040 = vmatprep.subr.bf16.mxu0 %v6154_v58  ;;  %v6166_v8 = vld [vmem:[#allocation2 + $0x84] ss:$8 sps:$4 sm:$0xff]  }
 0x201   :  { %4564 = vmatprep.subr.bf16.mxu1 %v6155_v3  ;;  %v6167_v58 = vld [vmem:[#allocation2 + $0x624] ss:$8 sps:$4 sm:$0xff]   ;;  %v6168_v3 = vld [vmem:[#allocation2 + $0x80] ss:$8 sps:$4 sm:$0xff]  }
 0x203   :  { %4041 = vmatpush1.bf16.msra.mxu0 %v6156_v56  ;;  %v6169_v56 = vld [vmem:[#allocation2 + $0x620] ss:$8 sps:$4 sm:$0xff]  }
 0x204   :  { %4565 = vmatpush1.bf16.msra.mxu1 %v6157_v35  ;;  %4042 = vmatprep.subr.bf16.mxu0 %v6158_v48  ;;  %v6170_v35 = vld [vmem:[#allocation2 + $0x94] ss:$8 sps:$4 sm:$0xff]  }
 0x205   :  { %4566 = vmatprep.subr.bf16.mxu1 %v6159_v42  ;;  %v6171_v48 = vld [vmem:[#allocation2 + $0x634] ss:$8 sps:$4 sm:$0xff]   ;;  %v6172_v42 = vld [vmem:[#allocation2 + $0x90] ss:$8 sps:$4 sm:$0xff]  }
 0x207   :  { %4043 = vmatpush1.bf16.msra.mxu0 %v6160_v49  ;;  %v6173_v49 = vld [vmem:[#allocation2 + $0x630] ss:$8 sps:$4 sm:$0xff]  }
 0x208   :  { %4567 = vmatpush1.bf16.msra.mxu1 %v6161_v9  ;;  %4044 = vmatprep.subr.bf16.mxu0 %v6162_v1  ;;  %v6174_v9 = vld [vmem:[#allocation2 + $0xa4] ss:$8 sps:$4 sm:$0xff]  }
 0x209   :  { %4568 = vmatprep.subr.bf16.mxu1 %v6163_v45  ;;  %v6175_v1 = vld [vmem:[#allocation2 + $0x644] ss:$8 sps:$4 sm:$0xff]   ;;  %v6176_v45 = vld [vmem:[#allocation2 + $0xa0] ss:$8 sps:$4 sm:$0xff]  }
 0x20b   :  { %4045 = vmatpush1.bf16.msra.mxu0 %v6164_v15  ;;  %v6177_v15 = vld [vmem:[#allocation2 + $0x640] ss:$8 sps:$4 sm:$0xff]  }
 0x20c   :  { %4569 = vmatpush1.bf16.msra.mxu1 %v6165_v4  ;;  %4046 = vmatprep.subr.bf16.mxu0 %v6166_v8  ;;  %v6178_v4 = vld [vmem:[#allocation2 + $0xb4] ss:$8 sps:$4 sm:$0xff]  }
 0x20d   :  { %4570 = vmatprep.subr.bf16.mxu1 %v6167_v58  ;;  %v6179_v8 = vld [vmem:[#allocation2 + $0x654] ss:$8 sps:$4 sm:$0xff]   ;;  %v6180_v58 = vld [vmem:[#allocation2 + $0xb0] ss:$8 sps:$4 sm:$0xff]  }
 0x20f   :  { %4047 = vmatpush1.bf16.msra.mxu0 %v6168_v3  ;;  %v6181_v3 = vld [vmem:[#allocation2 + $0x650] ss:$8 sps:$4 sm:$0xff]  }
 0x210   :  { %4571 = vmatpush1.bf16.msra.mxu1 %v6169_v56  ;;  %4048 = vmatprep.subr.bf16.mxu0 %v6170_v35  ;;  %v6182_v56 = vld [vmem:[#allocation2 + $0xc4] ss:$8 sps:$4 sm:$0xff]  }
 0x211   :  { %4572 = vmatprep.subr.bf16.mxu1 %v6171_v48  ;;  %v6183_v35 = vld [vmem:[#allocation2 + $0x664] ss:$8 sps:$4 sm:$0xff]   ;;  %v6184_v48 = vld [vmem:[#allocation2 + $0xc0] ss:$8 sps:$4 sm:$0xff]  }
 0x213   :  { %4049 = vmatpush1.bf16.msra.mxu0 %v6172_v42  ;;  %v6185_v42 = vld [vmem:[#allocation2 + $0x660] ss:$8 sps:$4 sm:$0xff]  }
 0x214   :  { %4573 = vmatpush1.bf16.msra.mxu1 %v6173_v49  ;;  %4050 = vmatprep.subr.bf16.mxu0 %v6174_v9  ;;  %v6186_v49 = vld [vmem:[#allocation2 + $0xd4] ss:$8 sps:$4 sm:$0xff]  }
 0x215   :  { %4574 = vmatprep.subr.bf16.mxu1 %v6175_v1  ;;  %v6187_v9 = vld [vmem:[#allocation2 + $0x674] ss:$8 sps:$4 sm:$0xff]   ;;  %v6188_v1 = vld [vmem:[#allocation2 + $0xd0] ss:$8 sps:$4 sm:$0xff]  }
 0x217   :  { %4051 = vmatpush1.bf16.msra.mxu0 %v6176_v45  ;;  %v6189_v45 = vld [vmem:[#allocation2 + $0x670] ss:$8 sps:$4 sm:$0xff]  }
 0x218   :  { %4575 = vmatpush1.bf16.msra.mxu1 %v6177_v15  ;;  %4052 = vmatprep.subr.bf16.mxu0 %v6178_v4  ;;  %v6190_v15 = vld [vmem:[#allocation2 + $0xe4] ss:$8 sps:$4 sm:$0xff]  }
 0x219   :  { %4576 = vmatprep.subr.bf16.mxu1 %v6179_v8  ;;  %v6191_v4 = vld [vmem:[#allocation2 + $0x684] ss:$8 sps:$4 sm:$0xff]   ;;  %v6192_v8 = vld [vmem:[#allocation2 + $0xe0] ss:$8 sps:$4 sm:$0xff]  }
 0x21b   :  { %4053 = vmatpush1.bf16.msra.mxu0 %v6180_v58  ;;  %v6193_v58 = vld [vmem:[#allocation2 + $0x680] ss:$8 sps:$4 sm:$0xff]  }
 0x21c   :  { %4577 = vmatpush1.bf16.msra.mxu1 %v6181_v3  ;;  %4054 = vmatprep.subr.bf16.mxu0 %v6182_v56  ;;  %v6194_v3 = vld [vmem:[#allocation2 + $0xf4] ss:$8 sps:$4 sm:$0xff]  }
 0x21d   :  { %4578 = vmatprep.subr.bf16.mxu1 %v6183_v35  ;;  %v6195_v56 = vld [vmem:[#allocation2 + $0x694] ss:$8 sps:$4 sm:$0xff]   ;;  %v6196_v35 = vld [vmem:[#allocation2 + $0xf0] ss:$8 sps:$4 sm:$0xff]  }
 0x21f   :  { %4055 = vmatpush1.bf16.msra.mxu0 %v6184_v48  ;;  %v6197_v48 = vld [vmem:[#allocation2 + $0x690] ss:$8 sps:$4 sm:$0xff]  }
 0x220   :  { %4579 = vmatpush1.bf16.msra.mxu1 %v6185_v42  ;;  %4056 = vmatprep.subr.bf16.mxu0 %v6186_v49  ;;  %v6198_v42 = vld [vmem:[#allocation2 + $0x104] ss:$8 sps:$4 sm:$0xff]  }
 0x221   :  { %4580 = vmatprep.subr.bf16.mxu1 %v6187_v9  ;;  %v6199_v49 = vld [vmem:[#allocation2 + $0x6a4] ss:$8 sps:$4 sm:$0xff]   ;;  %v6200_v9 = vld [vmem:[#allocation2 + $0x100] ss:$8 sps:$4 sm:$0xff]  }
 0x223   :  { %4057 = vmatpush1.bf16.msra.mxu0 %v6188_v1  ;;  %v6201_v1 = vld [vmem:[#allocation2 + $0x6a0] ss:$8 sps:$4 sm:$0xff]  }
 0x224   :  { %4581 = vmatpush1.bf16.msra.mxu1 %v6189_v45  ;;  %4058 = vmatprep.subr.bf16.mxu0 %v6190_v15  ;;  %v6202_v45 = vld [vmem:[#allocation2 + $0x114] ss:$8 sps:$4 sm:$0xff]  }
 0x225   :  { %4582 = vmatprep.subr.bf16.mxu1 %v6191_v4  ;;  %v6203_v15 = vld [vmem:[#allocation2 + $0x6b4] ss:$8 sps:$4 sm:$0xff]   ;;  %v6204_v4 = vld [vmem:[#allocation2 + $0x110] ss:$8 sps:$4 sm:$0xff]  }
 0x227   :  { %4059 = vmatpush1.bf16.msra.mxu0 %v6192_v8  ;;  %v6205_v8 = vld [vmem:[#allocation2 + $0x6b0] ss:$8 sps:$4 sm:$0xff]  }
 0x228   :  { %4583 = vmatpush1.bf16.msra.mxu1 %v6193_v58  ;;  %4060 = vmatprep.subr.bf16.mxu0 %v6194_v3  ;;  %v6206_v58 = vld [vmem:[#allocation2 + $0x244] ss:$8 sps:$4 sm:$0xff]  }
 0x229   :  { %4584 = vmatprep.subr.bf16.mxu1 %v6195_v56  ;;  %v6207_v3 = vld [vmem:[#allocation2 + $0x7e4] ss:$8 sps:$4 sm:$0xff]   ;;  %v6209_v56 = vld [vmem:[#allocation2 + $0x7e0] ss:$8 sps:$4 sm:$0xff]  }
 0x22b   :  { %4061 = vmatpush1.bf16.msra.mxu0 %v6196_v35  ;;  %v6210_v35 = vld [vmem:[#allocation2 + $0x254] ss:$8 sps:$4 sm:$0xff]  }
 0x22c   :  { %4585 = vmatpush1.bf16.msra.mxu1 %v6197_v48  ;;  %4073 = vmatprep.subr.bf16.mxu0 %v6198_v42  ;;  %v6211_v48 = vld [vmem:[#allocation2 + $0x7f4] ss:$8 sps:$4 sm:$0xff]   ;;  %v6212_v42 = vld [vmem:[#allocation2 + $0x250] ss:$8 sps:$4 sm:$0xff]  }
 0x22d   :  { %4597 = vmatprep.subr.bf16.mxu1 %v6199_v49  ;;  %v6213_v49 = vld [vmem:[#allocation2 + $0x7f0] ss:$8 sps:$4 sm:$0xff]  }
 0x22e   :  { %4063 = vmatmul.mubr.bf16.vlgmr.msra.gmra.mrb[4].mxu0 %v6545_v47 }
 0x22f   :  { %4587 = vmatmul.mubr.bf16.vlgmr.msra.gmra.mrb[4].mxu1 %v6545_v47  ;;  %4074 = vmatpush1.bf16.msra.mxu0 %v6200_v9  ;;  %v6208_v47 = vld [vmem:[#allocation2 + $0x240] ss:$8 sps:$4 sm:$0xff]   ;;  %v6214_v9 = vld [vmem:[#allocation2 + $0x264] ss:$8 sps:$4 sm:$0xff]  }
 0x230   :  { %4598 = vmatpush1.bf16.msra.mxu1 %v6201_v1  ;;  %4075 = vmatprep.subr.bf16.mxu0 %v6202_v45  ;;  %v6215_v1 = vld [vmem:[#allocation2 + $0x804] ss:$8 sps:$4 sm:$0xff]   ;;  %v6217_v45 = vld [vmem:[#allocation2 + $0x800] ss:$8 sps:$4 sm:$0xff]  }
 0x231   :  { %4599 = vmatprep.subr.bf16.mxu1 %v6203_v15  ;;  %4105 = vmatprep.mubr.bf16.mxu0 %v7196_v40  ;;  %v6218_v15 = vld [vmem:[#allocation2 + $0x274] ss:$8 sps:$4 sm:$0xff]  }
 0x232   :  { %4629 = vmatprep.mubr.bf16.mxu1 %v7196_v40 }
 0x233   :  { %4076 = vmatpush1.bf16.msra.mxu0 %v6204_v4  ;;  %v6219_v4 = vld [vmem:[#allocation2 + $0x814] ss:$8 sps:$4 sm:$0xff]  }
 0x234   :  { %4600 = vmatpush1.bf16.msra.mxu1 %v6205_v8  ;;  %4116 = vmatprep.subr.bf16.mxu0 %v6206_v58  ;;  %v6220_v8 = vld [vmem:[#allocation2 + $0x270] ss:$8 sps:$4 sm:$0xff]  }
 0x235   :  { %4640 = vmatprep.subr.bf16.mxu1 %v6207_v3  ;;  %v6221_v58 = vld [vmem:[#allocation2 + $0x810] ss:$8 sps:$4 sm:$0xff]   ;;  %v6223_v3 = vld [vmem:[#allocation2 + $0x824] ss:$8 sps:$4 sm:$0xff]  }
 0x23a   :  { %5359 = vmatmul.mubr.msk.bf16.vlgmr.msra.gmra.mrb[4].mxu0 %vm824_vm0, %v6553_v59 }
 0x23b   :  { %5368 = vmatmul.mubr.msk.bf16.vlgmr.msra.gmra.mrb[4].mxu1 %vm824_vm0, %v6553_v59  ;;  %4117 = vmatpush1.bf16.msra.mxu0 %v6208_v47  ;;  %v6216_v59 = vld [vmem:[#allocation2 + $0x260] ss:$8 sps:$4 sm:$0xff]  }
 0x23c   :  { %4641 = vmatpush1.bf16.msra.mxu1 %v6209_v56  ;;  %4118 = vmatprep.subr.bf16.mxu0 %v6210_v35  ;;  %v6224_v47 = vld [vmem:[#allocation2 + $0x280] ss:$8 sps:$4 sm:$0xff]   ;;  %v6226_v35 = vld [vmem:[#allocation2 + $0x294] ss:$8 sps:$4 sm:$0xff]  }
 0x23d   :  { %4642 = vmatprep.subr.bf16.mxu1 %v6211_v48  ;;  %4148 = vmatprep.mubr.bf16.mxu0 %v6718_v46  ;;  %v6225_v56 = vld [vmem:[#allocation2 + $0x820] ss:$8 sps:$4 sm:$0xff]   ;;  %v6227_v48 = vld [vmem:[#allocation2 + $0x834] ss:$8 sps:$4 sm:$0xff]  }
 0x23e   :  { %4672 = vmatprep.mubr.bf16.mxu1 %v6718_v46  ;;  %v6222_v46 = vld [vmem:[#allocation2 + $0x284] ss:$8 sps:$4 sm:$0xff]  }
 0x23f   :  { %4119 = vmatpush1.bf16.msra.mxu0 %v6212_v42  ;;  %v6228_v42 = vld [vmem:[#allocation2 + $0x290] ss:$8 sps:$4 sm:$0xff]  }
 0x240   :  { %4643 = vmatpush1.bf16.msra.mxu1 %v6213_v49  ;;  %4120 = vmatprep.subr.bf16.mxu0 %v6214_v9  ;;  %v6229_v49 = vld [vmem:[#allocation2 + $0x830] ss:$8 sps:$4 sm:$0xff]   ;;  %v6230_v9 = vld [vmem:[#allocation2 + $0x2a4] ss:$8 sps:$4 sm:$0xff]  }
 0x241   :  { %4644 = vmatprep.subr.bf16.mxu1 %v6215_v1  ;;  %v6231_v1 = vld [vmem:[#allocation2 + $0x844] ss:$8 sps:$4 sm:$0xff]  }
 0x243   :  { %4121 = vmatpush1.bf16.msra.mxu0 %v6216_v59  ;;  %v6232_v59 = vld [vmem:[#allocation2 + $0x2a0] ss:$8 sps:$4 sm:$0xff]  }
 0x244   :  { %4645 = vmatpush1.bf16.msra.mxu1 %v6217_v45  ;;  %4122 = vmatprep.subr.bf16.mxu0 %v6218_v15  ;;  %v6233_v45 = vld [vmem:[#allocation2 + $0x840] ss:$8 sps:$4 sm:$0xff]   ;;  %v6234_v15 = vld [vmem:[#allocation2 + $0x2b4] ss:$8 sps:$4 sm:$0xff]  }
 0x245   :  { %4646 = vmatprep.subr.bf16.mxu1 %v6219_v4  ;;  %v6235_v4 = vld [vmem:[#allocation2 + $0x854] ss:$8 sps:$4 sm:$0xff]  }
 0x247   :  { %4123 = vmatpush1.bf16.msra.mxu0 %v6220_v8  ;;  %v6236_v8 = vld [vmem:[#allocation2 + $0x2b0] ss:$8 sps:$4 sm:$0xff]  }
 0x248   :  { %4647 = vmatpush1.bf16.msra.mxu1 %v6221_v58  ;;  %4124 = vmatprep.subr.bf16.mxu0 %v6222_v46  ;;  %v6237_v58 = vld [vmem:[#allocation2 + $0x850] ss:$8 sps:$4 sm:$0xff]   ;;  %v6238_v46 = vld [vmem:[#allocation2 + $0x2c4] ss:$8 sps:$4 sm:$0xff]  }
 0x249   :  { %4648 = vmatprep.subr.bf16.mxu1 %v6223_v3  ;;  %v6239_v3 = vld [vmem:[#allocation2 + $0x864] ss:$8 sps:$4 sm:$0xff]  }
 0x24b   :  { %4125 = vmatpush1.bf16.msra.mxu0 %v6224_v47  ;;  %v6240_v47 = vld [vmem:[#allocation2 + $0x2c0] ss:$8 sps:$4 sm:$0xff]  }
 0x24c   :  { %4649 = vmatpush1.bf16.msra.mxu1 %v6225_v56  ;;  %4126 = vmatprep.subr.bf16.mxu0 %v6226_v35  ;;  %v6241_v56 = vld [vmem:[#allocation2 + $0x860] ss:$8 sps:$4 sm:$0xff]   ;;  %v6242_v35 = vld [vmem:[#allocation2 + $0x2d4] ss:$8 sps:$4 sm:$0xff]  }
 0x24d   :  { %4650 = vmatprep.subr.bf16.mxu1 %v6227_v48  ;;  %v6243_v48 = vld [vmem:[#allocation2 + $0x874] ss:$8 sps:$4 sm:$0xff]  }
 0x24f   :  { %4127 = vmatpush1.bf16.msra.mxu0 %v6228_v42  ;;  %v6244_v42 = vld [vmem:[#allocation2 + $0x2d0] ss:$8 sps:$4 sm:$0xff]  }
 0x250   :  { %4651 = vmatpush1.bf16.msra.mxu1 %v6229_v49  ;;  %4128 = vmatprep.subr.bf16.mxu0 %v6230_v9  ;;  %v6245_v49 = vld [vmem:[#allocation2 + $0x870] ss:$8 sps:$4 sm:$0xff]   ;;  %v6246_v9 = vld [vmem:[#allocation2 + $0x2e4] ss:$8 sps:$4 sm:$0xff]  }
 0x251   :  { %4652 = vmatprep.subr.bf16.mxu1 %v6231_v1  ;;  %v6247_v1 = vld [vmem:[#allocation2 + $0x884] ss:$8 sps:$4 sm:$0xff]  }
 0x253   :  { %4129 = vmatpush1.bf16.msra.mxu0 %v6232_v59  ;;  %v6248_v59 = vld [vmem:[#allocation2 + $0x2e0] ss:$8 sps:$4 sm:$0xff]  }
 0x254   :  { %4653 = vmatpush1.bf16.msra.mxu1 %v6233_v45  ;;  %4130 = vmatprep.subr.bf16.mxu0 %v6234_v15  ;;  %v6249_v45 = vld [vmem:[#allocation2 + $0x880] ss:$8 sps:$4 sm:$0xff]   ;;  %v6250_v15 = vld [vmem:[#allocation2 + $0x2f4] ss:$8 sps:$4 sm:$0xff]  }
 0x255   :  { %4654 = vmatprep.subr.bf16.mxu1 %v6235_v4  ;;  %v6251_v4 = vld [vmem:[#allocation2 + $0x894] ss:$8 sps:$4 sm:$0xff]  }
 0x257   :  { %4131 = vmatpush1.bf16.msra.mxu0 %v6236_v8  ;;  %v6252_v8 = vld [vmem:[#allocation2 + $0x2f0] ss:$8 sps:$4 sm:$0xff]  }
 0x258   :  { %4655 = vmatpush1.bf16.msra.mxu1 %v6237_v58  ;;  %4132 = vmatprep.subr.bf16.mxu0 %v6238_v46  ;;  %v6253_v58 = vld [vmem:[#allocation2 + $0x890] ss:$8 sps:$4 sm:$0xff]   ;;  %v6254_v46 = vld [vmem:[#allocation2 + $0x304] ss:$8 sps:$4 sm:$0xff]  }
 0x259   :  { %4656 = vmatprep.subr.bf16.mxu1 %v6239_v3  ;;  %v6255_v3 = vld [vmem:[#allocation2 + $0x8a4] ss:$8 sps:$4 sm:$0xff]  }
 0x25b   :  { %4133 = vmatpush1.bf16.msra.mxu0 %v6240_v47  ;;  %v6256_v47 = vld [vmem:[#allocation2 + $0x300] ss:$8 sps:$4 sm:$0xff]  }
 0x25c   :  { %4657 = vmatpush1.bf16.msra.mxu1 %v6241_v56  ;;  %4134 = vmatprep.subr.bf16.mxu0 %v6242_v35  ;;  %v6257_v56 = vld [vmem:[#allocation2 + $0x8a0] ss:$8 sps:$4 sm:$0xff]   ;;  %v6258_v35 = vld [vmem:[#allocation2 + $0x314] ss:$8 sps:$4 sm:$0xff]  }
 0x25d   :  { %4658 = vmatprep.subr.bf16.mxu1 %v6243_v48  ;;  %v6259_v48 = vld [vmem:[#allocation2 + $0x8b4] ss:$8 sps:$4 sm:$0xff]  }
 0x25f   :  { %4135 = vmatpush1.bf16.msra.mxu0 %v6244_v42  ;;  %v6260_v42 = vld [vmem:[#allocation2 + $0x310] ss:$8 sps:$4 sm:$0xff]  }
 0x260   :  { %4659 = vmatpush1.bf16.msra.mxu1 %v6245_v49  ;;  %4136 = vmatprep.subr.bf16.mxu0 %v6246_v9  ;;  %v6261_v49 = vld [vmem:[#allocation2 + $0x8b0] ss:$8 sps:$4 sm:$0xff]   ;;  %v6262_v9 = vld [vmem:[#allocation2 + $0x324] ss:$8 sps:$4 sm:$0xff]  }
 0x261   :  { %4660 = vmatprep.subr.bf16.mxu1 %v6247_v1  ;;  %v6263_v1 = vld [vmem:[#allocation2 + $0x8c4] ss:$8 sps:$4 sm:$0xff]  }
 0x263   :  { %4137 = vmatpush1.bf16.msra.mxu0 %v6248_v59  ;;  %v6264_v59 = vld [vmem:[#allocation2 + $0x320] ss:$8 sps:$4 sm:$0xff]  }
 0x264   :  { %4661 = vmatpush1.bf16.msra.mxu1 %v6249_v45  ;;  %4138 = vmatprep.subr.bf16.mxu0 %v6250_v15  ;;  %v6265_v45 = vld [vmem:[#allocation2 + $0x8c0] ss:$8 sps:$4 sm:$0xff]   ;;  %v6266_v15 = vld [vmem:[#allocation2 + $0x334] ss:$8 sps:$4 sm:$0xff]  }
 0x265   :  { %4662 = vmatprep.subr.bf16.mxu1 %v6251_v4  ;;  %v6267_v4 = vld [vmem:[#allocation2 + $0x8d4] ss:$8 sps:$4 sm:$0xff]  }
 0x267   :  { %4139 = vmatpush1.bf16.msra.mxu0 %v6252_v8 }
 0x268   :  { %4663 = vmatpush1.bf16.msra.mxu1 %v6253_v58  ;;  %4140 = vmatprep.subr.bf16.mxu0 %v6254_v46  ;;  %v6279_v46 = vld [vmem:[#allocation2 + $0x904] ss:$8 sps:$4 sm:$0xff]  }
 0x269   :  { %4664 = vmatprep.subr.bf16.mxu1 %v6255_v3 }
 0x26b   :  { %4141 = vmatpush1.bf16.msra.mxu0 %v6256_v47 }
 0x26c   :  { %4665 = vmatpush1.bf16.msra.mxu1 %v6257_v56  ;;  %4142 = vmatprep.subr.bf16.mxu0 %v6258_v35  ;;  %v6268_v56 = vld [vmem:[#allocation2 + $0x330] ss:$8 sps:$4 sm:$0xff]  }
 0x26d   :  { %4666 = vmatprep.subr.bf16.mxu1 %v6259_v48  ;;  %v6269_v35 = vld [vmem:[#allocation2 + $0x8d0] ss:$8 sps:$4 sm:$0xff]  }
 0x26e   :  { %v6277_v48 = vld [vmem:[#allocation2 + $0x8f0] ss:$8 sps:$4 sm:$0xff]  }
 0x26f   :  { %4143 = vmatpush1.bf16.msra.mxu0 %v6260_v42 }
 0x270   :  { %4667 = vmatpush1.bf16.msra.mxu1 %v6261_v49  ;;  %4144 = vmatprep.subr.bf16.mxu0 %v6262_v9  ;;  %v6274_v9 = vld [vmem:[#allocation2 + $0x354] ss:$8 sps:$4 sm:$0xff]  }
 0x271   :  { %4668 = vmatprep.subr.bf16.mxu1 %v6263_v1  ;;  %v6270_v1 = vld [vmem:[#allocation2 + $0x344] ss:$8 sps:$4 sm:$0xff]  }
 0x273   :  { %4145 = vmatpush1.bf16.msra.mxu0 %v6264_v59 }
 0x274   :  { %4669 = vmatpush1.bf16.msra.mxu1 %v6265_v45  ;;  %4146 = vmatprep.subr.bf16.mxu0 %v6266_v15  ;;  %v6271_v15 = vld [vmem:[#allocation2 + $0x8e4] ss:$8 sps:$4 sm:$0xff]  }
 0x275   :  { %4670 = vmatprep.subr.bf16.mxu1 %v6267_v4  ;;  %v6980_v8 = vpop.f32.mrb[0].mxu0  ;;  %v6278_v4 = vld [vmem:[#allocation2 + $0x364] ss:$8 sps:$4 sm:$0xff]  }
 0x276   :  { %7197 = vst [vmem:[#allocation21_spill] sm:$0xff] %v6980_v8  ;;  %v6982_v58 = vpop.f32.mrb[0].mxu1  ;;  %v6986_v3 = vpop.f32.mrb[1].mxu0 }
 0x277   :  { %7198 = vst [vmem:[#allocation22_spill] sm:$0xff] %v6982_v58  ;;  %7199 = vst [vmem:[#allocation23_spill] sm:$0xff] %v6986_v3  ;;  %v6988_v47 = vpop.f32.mrb[1].mxu1  ;;  %4147 = vmatpush1.bf16.msra.mxu0 %v6268_v56  ;;  %v6992_v42 = vpop.f32.mrb[2].mxu0  ;;  %v6272_v56 = vld [vmem:[#allocation2 + $0x340] ss:$8 sps:$4 sm:$0xff]  }
 0x278   :  { %7200 = vst [vmem:[#allocation24_spill] sm:$0xff] %v6988_v47  ;;  %4671 = vmatpush1.bf16.msra.mxu1 %v6269_v35  ;;  %7201 = vst [vmem:[#allocation25_spill] sm:$0xff] %v6992_v42  ;;  %v6994_v49 = vpop.f32.mrb[2].mxu1  ;;  %4159 = vmatprep.subr.bf16.mxu0 %v6270_v1  ;;  %v6998_v59 = vpop.f32.mrb[3].mxu0  ;;  %v6273_v35 = vld [vmem:[#allocation2 + $0x8e0] ss:$8 sps:$4 sm:$0xff]  }
 0x279   :  { %7202 = vst [vmem:[#allocation26_spill] sm:$0xff] %v6994_v49  ;;  %7203 = vst [vmem:[#allocation27_spill] sm:$0xff] %v6998_v59  ;;  %v7000_v45 = vpop.f32.mrb[3].mxu1  ;;  %4683 = vmatprep.subr.bf16.mxu1 %v6271_v15  ;;  %v6275_v1 = vld [vmem:[#allocation2 + $0x8f4] ss:$8 sps:$4 sm:$0xff]  }
 0x27a   :  { %7204 = vst [vmem:[#allocation28_spill] sm:$0xff] %v7000_v45  ;;  %4149 = vmatmul.mubr.bf16.vlgmr.msra.gmra.mrb[4].mxu0 %v6762_v33  ;;  %v6276_v15 = vld [vmem:[#allocation2 + $0x350] ss:$8 sps:$4 sm:$0xff]   ;;  %v6323_v45 = vld [vmem:[#allocation2 + $0x9b4] ss:$8 sps:$4 sm:$0xff]  }
 0x27b   :  { %4673 = vmatmul.mubr.bf16.vlgmr.msra.gmra.mrb[4].mxu1 %v6762_v33  ;;  %4160 = vmatpush1.bf16.msra.mxu0 %v6272_v56  ;;  %v6280_v33 = vld [vmem:[#allocation2 + $0x360] ss:$8 sps:$4 sm:$0xff]   ;;  %v6282_v56 = vld [vmem:[#allocation2 + $0x374] ss:$8 sps:$4 sm:$0xff]   ;;  %v6327_v59 = vld [vmem:[#allocation2 + $0x9c4] ss:$8 sps:$4 sm:$0xff]  }
 0x27c   :  { %4684 = vmatpush1.bf16.msra.mxu1 %v6273_v35  ;;  %4161 = vmatprep.subr.bf16.mxu0 %v6274_v9  ;;  %v6281_v9 = vld [vmem:[#allocation2 + $0x900] ss:$8 sps:$4 sm:$0xff]   ;;  %v6283_v35 = vld [vmem:[#allocation2 + $0x914] ss:$8 sps:$4 sm:$0xff]  }
 0x27d   :  { %4685 = vmatprep.subr.bf16.mxu1 %v6275_v1  ;;  %4191 = vmatprep.mubr.bf16.mxu0 %v7196_v40  ;;  %v6287_v1 = vld [vmem:[#allocation2 + $0x924] ss:$8 sps:$4 sm:$0xff]   ;;  %v6328_v3 = vld [vmem:[#allocation2 + $0x420] ss:$8 sps:$4 sm:$0xff]  }
 0x27e   :  { %4715 = vmatprep.mubr.bf16.mxu1 %v7196_v40 }
 0x27f   :  { %4162 = vmatpush1.bf16.msra.mxu0 %v6276_v15  ;;  %v6289_v15 = vld [vmem:[#allocation2 + $0x920] ss:$8 sps:$4 sm:$0xff]  }
 0x280   :  { %4686 = vmatpush1.bf16.msra.mxu1 %v6277_v48  ;;  %4206 = vmatprep.subr.bf16.mxu0 %v6278_v4  ;;  %v6284_v48 = vld [vmem:[#allocation2 + $0x370] ss:$8 sps:$4 sm:$0xff]   ;;  %v6286_v4 = vld [vmem:[#allocation2 + $0x384] ss:$8 sps:$4 sm:$0xff]  }
 0x281   :  { %4730 = vmatprep.subr.bf16.mxu1 %v6279_v46  ;;  %v6285_v46 = vld [vmem:[#allocation2 + $0x910] ss:$8 sps:$4 sm:$0xff]  }
 0x286   :  { %5360 = vmatmul.mubr.msk.bf16.vlgmr.msra.gmra.mrb[4].mxu0 %vm824_vm0, %v6786_v10 }
 0x287   :  { %5369 = vmatmul.mubr.msk.bf16.vlgmr.msra.gmra.mrb[4].mxu1 %vm824_vm0, %v6786_v10  ;;  %4207 = vmatpush1.bf16.msra.mxu0 %v6280_v33  ;;  %v6288_v10 = vld [vmem:[#allocation2 + $0x380] ss:$8 sps:$4 sm:$0xff]   ;;  %v6290_v33 = vld [vmem:[#allocation2 + $0x394] ss:$8 sps:$4 sm:$0xff]  }
 0x288   :  { %4731 = vmatpush1.bf16.msra.mxu1 %v6281_v9  ;;  %4208 = vmatprep.subr.bf16.mxu0 %v6282_v56  ;;  %v6291_v9 = vld [vmem:[#allocation2 + $0x934] ss:$8 sps:$4 sm:$0xff]   ;;  %v6292_v56 = vld [vmem:[#allocation2 + $0x390] ss:$8 sps:$4 sm:$0xff]  }
 0x289   :  { %4732 = vmatprep.subr.bf16.mxu1 %v6283_v35  ;;  %4238 = vmatprep.mubr.bf16.mxu0 %v6788_v20  ;;  %v6293_v35 = vld [vmem:[#allocation2 + $0x930] ss:$8 sps:$4 sm:$0xff]  }
 0x28a   :  { %4762 = vmatprep.mubr.bf16.mxu1 %v6788_v20  ;;  %v6294_v20 = vld [vmem:[#allocation2 + $0x3a4] ss:$8 sps:$4 sm:$0xff]  }
 0x28b   :  { %4209 = vmatpush1.bf16.msra.mxu0 %v6284_v48  ;;  %v6295_v48 = vld [vmem:[#allocation2 + $0x944] ss:$8 sps:$4 sm:$0xff]  }
 0x28c   :  { %4733 = vmatpush1.bf16.msra.mxu1 %v6285_v46  ;;  %4210 = vmatprep.subr.bf16.mxu0 %v6286_v4  ;;  %v6296_v46 = vld [vmem:[#allocation2 + $0x3a0] ss:$8 sps:$4 sm:$0xff]  }
 0x28d   :  { %4734 = vmatprep.subr.bf16.mxu1 %v6287_v1  ;;  %v6297_v4 = vld [vmem:[#allocation2 + $0x940] ss:$8 sps:$4 sm:$0xff]   ;;  %v6298_v1 = vld [vmem:[#allocation2 + $0x3b4] ss:$8 sps:$4 sm:$0xff]  }
 0x28f   :  { %4211 = vmatpush1.bf16.msra.mxu0 %v6288_v10  ;;  %v6299_v10 = vld [vmem:[#allocation2 + $0x954] ss:$8 sps:$4 sm:$0xff]  }
 0x290   :  { %4735 = vmatpush1.bf16.msra.mxu1 %v6289_v15  ;;  %4212 = vmatprep.subr.bf16.mxu0 %v6290_v33  ;;  %v6300_v15 = vld [vmem:[#allocation2 + $0x3b0] ss:$8 sps:$4 sm:$0xff]  }
 0x291   :  { %4736 = vmatprep.subr.bf16.mxu1 %v6291_v9  ;;  %v6301_v33 = vld [vmem:[#allocation2 + $0x950] ss:$8 sps:$4 sm:$0xff]   ;;  %v6302_v9 = vld [vmem:[#allocation2 + $0x3c4] ss:$8 sps:$4 sm:$0xff]  }
 0x293   :  { %4213 = vmatpush1.bf16.msra.mxu0 %v6292_v56  ;;  %v6303_v56 = vld [vmem:[#allocation2 + $0x964] ss:$8 sps:$4 sm:$0xff]  }
 0x294   :  { %4737 = vmatpush1.bf16.msra.mxu1 %v6293_v35  ;;  %4214 = vmatprep.subr.bf16.mxu0 %v6294_v20  ;;  %v6304_v35 = vld [vmem:[#allocation2 + $0x3c0] ss:$8 sps:$4 sm:$0xff]  }
 0x295   :  { %4738 = vmatprep.subr.bf16.mxu1 %v6295_v48  ;;  %v6305_v20 = vld [vmem:[#allocation2 + $0x960] ss:$8 sps:$4 sm:$0xff]   ;;  %v6306_v48 = vld [vmem:[#allocation2 + $0x3d4] ss:$8 sps:$4 sm:$0xff]  }
 0x297   :  { %4215 = vmatpush1.bf16.msra.mxu0 %v6296_v46  ;;  %v6307_v46 = vld [vmem:[#allocation2 + $0x974] ss:$8 sps:$4 sm:$0xff]  }
 0x298   :  { %4739 = vmatpush1.bf16.msra.mxu1 %v6297_v4  ;;  %4216 = vmatprep.subr.bf16.mxu0 %v6298_v1  ;;  %v6308_v4 = vld [vmem:[#allocation2 + $0x3d0] ss:$8 sps:$4 sm:$0xff]  }
 0x299   :  { %4740 = vmatprep.subr.bf16.mxu1 %v6299_v10  ;;  %v6309_v1 = vld [vmem:[#allocation2 + $0x970] ss:$8 sps:$4 sm:$0xff]   ;;  %v6310_v10 = vld [vmem:[#allocation2 + $0x3e4] ss:$8 sps:$4 sm:$0xff]  }
 0x29b   :  { %4217 = vmatpush1.bf16.msra.mxu0 %v6300_v15  ;;  %v6311_v15 = vld [vmem:[#allocation2 + $0x984] ss:$8 sps:$4 sm:$0xff]  }
 0x29c   :  { %4741 = vmatpush1.bf16.msra.mxu1 %v6301_v33  ;;  %4218 = vmatprep.subr.bf16.mxu0 %v6302_v9  ;;  %v6312_v33 = vld [vmem:[#allocation2 + $0x3e0] ss:$8 sps:$4 sm:$0xff]  }
 0x29d   :  { %4742 = vmatprep.subr.bf16.mxu1 %v6303_v56  ;;  %v6313_v9 = vld [vmem:[#allocation2 + $0x980] ss:$8 sps:$4 sm:$0xff]   ;;  %v6314_v56 = vld [vmem:[#allocation2 + $0x3f4] ss:$8 sps:$4 sm:$0xff]  }
 0x29f   :  { %4219 = vmatpush1.bf16.msra.mxu0 %v6304_v35  ;;  %v6315_v35 = vld [vmem:[#allocation2 + $0x994] ss:$8 sps:$4 sm:$0xff]  }
 0x2a0   :  { %4743 = vmatpush1.bf16.msra.mxu1 %v6305_v20  ;;  %4220 = vmatprep.subr.bf16.mxu0 %v6306_v48  ;;  %v4966_v20 = vld.sshfl [vmem:[%s7155_s1 + $0x18] sm:$0xfa pattern:$0x75316420] }
 0x2a1   :  { %4744 = vmatprep.subr.bf16.mxu1 %v6307_v46  ;;  %v4967_v48 = vld.sshfl [vmem:[%s7155_s1 + $0x20] sm:$0x32 pattern:$0x75316420] }
 0x2a2   :  { %v6316_v46 = vld [vmem:[#allocation2 + $0x3f0] ss:$8 sps:$4 sm:$0xff]  }
 0x2a3   :  { %4221 = vmatpush1.bf16.msra.mxu0 %v6308_v4  ;;  %v6317_v4 = vld [vmem:[#allocation2 + $0x990] ss:$8 sps:$4 sm:$0xff]  }
 0x2a4   :  { %4745 = vmatpush1.bf16.msra.mxu1 %v6309_v1  ;;  %4222 = vmatprep.subr.bf16.mxu0 %v6310_v10  ;;  %v6318_v1 = vld [vmem:[#allocation2 + $0x404] ss:$8 sps:$4 sm:$0xff]  }
 0x2a5   :  { %4746 = vmatprep.subr.bf16.mxu1 %v6311_v15  ;;  %v6319_v10 = vld [vmem:[#allocation2 + $0x9a4] ss:$8 sps:$4 sm:$0xff]   ;;  %v442_v15 = vcombine.low %v4966_v20, %v4967_v48 }
 0x2a7   :  { %4223 = vmatpush1.bf16.msra.mxu0 %v6312_v33  ;;  %v6320_v33 = vld [vmem:[#allocation2 + $0x400] ss:$8 sps:$4 sm:$0xff]  }
 0x2a8   :  { %4747 = vmatpush1.bf16.msra.mxu1 %v6313_v9  ;;  %4224 = vmatprep.subr.bf16.mxu0 %v6314_v56  ;;  %v6321_v9 = vld [vmem:[#allocation2 + $0x9a0] ss:$8 sps:$4 sm:$0xff]   ;;  %v4962_v56 = vld.sshfl [vmem:[%s7155_s1] sm:$0xfa pattern:$0x75316420] }
 0x2a9   :  { %4748 = vmatprep.subr.bf16.mxu1 %v6315_v35  ;;  %v6322_v35 = vld [vmem:[#allocation2 + $0x414] ss:$8 sps:$4 sm:$0xff]  }
 0x2ab   :  { %4225 = vmatpush1.bf16.msra.mxu0 %v6316_v46  ;;  %v4963_v46 = vld.sshfl [vmem:[%s7155_s1 + $0x8] sm:$0x32 pattern:$0x75316420] }
 0x2ac   :  { %4749 = vmatpush1.bf16.msra.mxu1 %v6317_v4  ;;  %4226 = vmatprep.subr.bf16.mxu0 %v6318_v1  ;;  %v443_v4 = vcombine.high %v4966_v20, %v4967_v48  ;;  %v4964_v1 = vld.sshfl [vmem:[%s7155_s1 + $0xc] sm:$0x5 pattern:$0x75316420]  ;;  %v388_v49 = vcombine.low %v4962_v56, %v4963_v46 }
 0x2ad   :  { %4750 = vmatprep.subr.bf16.mxu1 %v6319_v10  ;;  %v450_v10 = vrot.slane %v442_v15, %v6480_v54  ;;  %v4968_v48 = vld.sshfl [vmem:[%s7155_s1 + $0x24] sm:$0x5 pattern:$0x75316420]  ;;  %v389_v15 = vcombine.high %v4962_v56, %v4963_v46 }
 0x2ae   :  { %v457_v20 = vrot.slane %v443_v4, %v6480_v54  ;;  %v396_v4 = vrot.slane %v388_v49, %v6480_v54 }
 0x2af   :  { %4227 = vmatpush1.bf16.msra.mxu0 %v6320_v33  ;;  %v4965_v33 = vld.sshfl [vmem:[%s7155_s1 + $0x14] sm:$0x1 pattern:$0x75316420]  ;;  %v458_v47 = vcombine.high %v450_v10, %v450_v10  ;;  %v403_v56 = vrot.slane %v389_v15, %v6480_v54 }
 0x2b0   :  { %4751 = vmatpush1.bf16.msra.mxu1 %v6321_v9  ;;  %4228 = vmatprep.subr.bf16.mxu0 %v6322_v35  ;;  %v6324_v9 = vld [vmem:[#allocation2 + $0x410] ss:$8 sps:$4 sm:$0xff]   ;;  %v420_v42 = vcombine.low %v4964_v1, %v4965_v33  ;;  %v459_v58 = vcombine.high %v457_v20, %v457_v20  ;;  %v490_v8 = vunpack.i.h.s16 %v457_v20 }
 0x2b1   :  { %4752 = vmatprep.subr.bf16.mxu1 %v6323_v45  ;;  %v6325_v35 = vld [vmem:[#allocation2 + $0x9b0] ss:$8 sps:$4 sm:$0xff]   ;;  %v6326_v45 = vld [vmem:[#allocation2 + $0x424] ss:$8 sps:$4 sm:$0xff]   ;;  %v492_v10 = vunpack.i.h.s16 %v458_v47  ;;  %v405_v49 = vcombine.high %v403_v56, %v403_v56 }
 0x2b2   :  { %v427_v46 = vrot.slane %v420_v42, %v6480_v54  ;;  %v6332_v33 = vld [vmem:[#allocation2 + $0x430] ss:$8 sps:$4 sm:$0xff]   ;;  %v5363_v55 = vpack.i.b16 %v458_v47, %v490_v8  ;;  %v6337_v42 = vld [vmem:[#allocation2 + $0x9e0] ss:$8 sps:$4 sm:$0xff]   ;;  %v6342_v47 = vld [vmem:[#allocation2 + $0x464] ss:$8 sps:$4 sm:$0xff]  }
 0x2b3   :  { %4229 = vmatpush1.bf16.msra.mxu0 %v6324_v9  ;;  %v4969_v9 = vld.sshfl [vmem:[%s7155_s1 + $0x2c] sm:$0x1 pattern:$0x75316420]  ;;  %v5364_v15 = vpack.i.b16 %v459_v58, %v492_v10  ;;  %v6341_v8 = vld [vmem:[#allocation2 + $0x9f0] ss:$8 sps:$4 sm:$0xff]  }
 0x2b4   :  { %4753 = vmatpush1.bf16.msra.mxu1 %v6325_v35  ;;  %4230 = vmatprep.subr.bf16.mxu0 %v6326_v45  ;;  %v6329_v35 = vld [vmem:[#allocation2 + $0x9c0] ss:$8 sps:$4 sm:$0xff]   ;;  %v6330_v45 = vld [vmem:[#allocation2 + $0x434] ss:$8 sps:$4 sm:$0xff]   ;;  %v474_v1 = vcombine.low %v4968_v48, %v4969_v9  ;;  %v5362_v30 = vpack.i.b16 %v457_v20, %v427_v46  ;;  %v6343_v20 = vld [vmem:[#allocation2 + $0xa04] ss:$8 sps:$4 sm:$0xff]  }
 0x2b5   :  { %4754 = vmatprep.subr.bf16.mxu1 %v6327_v59  ;;  %v6331_v59 = vld [vmem:[#allocation2 + $0x9d4] ss:$8 sps:$4 sm:$0xff]  }
 0x2b6   :  { %v481_v53 = vrot.slane %v474_v1, %v6480_v54  ;;  %v6338_v48 = vld [vmem:[#allocation2 + $0x454] ss:$8 sps:$4 sm:$0xff]  }
 0x2b7   :  { %4231 = vmatpush1.bf16.msra.mxu0 %v6328_v3  ;;  %v6334_v3 = vld [vmem:[#allocation2 + $0x444] ss:$8 sps:$4 sm:$0xff]   ;;  %v6339_v9 = vld [vmem:[#allocation2 + $0x9f4] ss:$8 sps:$4 sm:$0xff]  }
 0x2b8   :  { %4755 = vmatpush1.bf16.msra.mxu1 %v6329_v35  ;;  %4232 = vmatprep.subr.bf16.mxu0 %v6330_v45  ;;  %v6335_v35 = vld [vmem:[#allocation2 + $0x9e4] ss:$8 sps:$4 sm:$0xff]   ;;  %v404_v45 = vcombine.high %v396_v4, %v396_v4  ;;  %v6340_v4 = vld [vmem:[#allocation2 + $0x450] ss:$8 sps:$4 sm:$0xff]   ;;  %v6347_v1 = vld [vmem:[#allocation2 + $0xa14] ss:$8 sps:$4 sm:$0xff]  }
 0x2b9   :  { %4756 = vmatprep.subr.bf16.mxu1 %v6331_v59  ;;  %v494_v59 = vunpack.i.h.s16 %v459_v58 }
 0x2bb   :  { %4233 = vmatpush1.bf16.msra.mxu0 %v6332_v33  ;;  %v4303_v33 = vcombine.low %v403_v56, %v404_v45  ;;  %v6346_v56 = vld [vmem:[#allocation2 + $0x474] ss:$8 sps:$4 sm:$0xff]  }
 0x2bc   :  { %4757 = vmatpush1.bf16.msra.mxu1 %v6333_v31  ;;  %4234 = vmatprep.subr.bf16.mxu0 %v6334_v3  ;;  %v5365_v31 = vpack.i.b16 %v481_v53, %v494_v59  ;;  %v4304_v3 = vcombine.low %v405_v49, %v5362_v30  ;;  %v6344_v53 = vld [vmem:[#allocation2 + $0x460] ss:$8 sps:$4 sm:$0xff]   ;;  %v6348_v59 = vld [vmem:[#allocation2 + $0x470] ss:$8 sps:$4 sm:$0xff]   ;;  %v6350_v49 = vld [vmem:[#allocation2 + $0x484] ss:$8 sps:$4 sm:$0xff]  }
 0x2bd   :  { %4758 = vmatprep.subr.bf16.mxu1 %v6335_v35  ;;  %v4305_v35 = vcombine.low %v5363_v55, %v5364_v15  ;;  %v6345_v55 = vld [vmem:[#allocation2 + $0xa00] ss:$8 sps:$4 sm:$0xff]   ;;  %v6351_v15 = vld [vmem:[#allocation2 + $0xa24] ss:$8 sps:$4 sm:$0xff]  }
 0x2be   :  { %v7048_v58 = vrot.slane %v4304_v3, %v6480_v54  ;;  %v7054_v30 = vrot.slane %v5365_v31, %v6480_v54  ;;  %v6352_v31 = vld [vmem:[#allocation2 + $0x480] ss:$8 sps:$4 sm:$0xff]   ;;  %v6354_v3 = vld [vmem:[#allocation2 + $0x494] ss:$8 sps:$4 sm:$0xff]  }
 0x2bf   :  { %4235 = vmatpush1.bf16.msra.mxu0 %v6336_v29  ;;  %v7045_v29 = vrot.slane %v4303_v33, %v6480_v54  ;;  %v7051_v46 = vrot.slane %v4305_v35, %v6480_v54  ;;  %v6353_v33 = vld [vmem:[#allocation2 + $0xa20] ss:$8 sps:$4 sm:$0xff]   ;;  %v6355_v35 = vld [vmem:[#allocation2 + $0xa34] ss:$8 sps:$4 sm:$0xff]  }
 0x2c0   :  { %4759 = vmatpush1.bf16.msra.mxu1 %v6337_v42  ;;  %4236 = vmatprep.subr.bf16.mxu0 %v6338_v48 }
 0x2c1   :  { %4760 = vmatprep.subr.bf16.mxu1 %v6339_v9  ;;  %v4335_v10 = vcombine.high %v7045_v29, %v7048_v58  ;;  %v4337_v45 = vcombine.high %v7051_v46, %v7054_v30 }
 0x2c3   :  { %4237 = vmatpush1.bf16.msra.mxu0 %v6340_v4  ;;  %v4351_v42 = vrot.slane %v4335_v10, %v6480_v54  ;;  %v4365_v48 = vrot.slane %v4337_v45, %v6480_v54  ;;  %v6356_v4 = vld [vmem:[#allocation2 + $0x490] ss:$8 sps:$4 sm:$0xff]   ;;  %v6366_v45 = vld [vmem:[#allocation2 + $0x4c4] ss:$8 sps:$4 sm:$0xff]  }
 0x2c4   :  { %4761 = vmatpush1.bf16.msra.mxu1 %v6341_v8  ;;  %4249 = vmatprep.subr.bf16.mxu0 %v6342_v47  ;;  %v6357_v8 = vld [vmem:[#allocation2 + $0xa30] ss:$8 sps:$4 sm:$0xff]   ;;  %v6358_v47 = vld [vmem:[#allocation2 + $0x4a4] ss:$8 sps:$4 sm:$0xff]  }
 0x2c5   :  { %4773 = vmatprep.subr.bf16.mxu1 %v6343_v20  ;;  %v4368_v9 = vcombine.low %v4351_v42, %v4365_v48  ;;  %v6359_v20 = vld [vmem:[#allocation2 + $0xa44] ss:$8 sps:$4 sm:$0xff]   ;;  %v6365_v10 = vld [vmem:[#allocation2 + $0xa50] ss:$8 sps:$4 sm:$0xff]   ;;  %v6371_v42 = vld [vmem:[#allocation2 + $0xa74] ss:$8 sps:$4 sm:$0xff]  }
 0x2c6   :  { %4239 = vmatmul.mubr.bf16.vlgmr.msra.gmra.mrb[4].mxu0 %v6924_v25  ;;  %v6372_v48 = vld [vmem:[#allocation2 + $0x4d0] ss:$8 sps:$4 sm:$0xff]  }
 0x2c7   :  { %4763 = vmatmul.mubr.bf16.vlgmr.msra.gmra.mrb[4].mxu1 %v6924_v25  ;;  %4250 = vmatpush1.bf16.msra.mxu0 %v6344_v53  ;;  %v6349_v25 = vld [vmem:[#allocation2 + $0xa10] ss:$8 sps:$4 sm:$0xff]   ;;  %v6360_v53 = vld [vmem:[#allocation2 + $0x4a0] ss:$8 sps:$4 sm:$0xff]  }
 0x2c8   :  { %4774 = vmatpush1.bf16.msra.mxu1 %v6345_v55  ;;  %4251 = vmatprep.subr.bf16.mxu0 %v6346_v56  ;;  %v6362_v55 = vld [vmem:[#allocation2 + $0x4b4] ss:$8 sps:$4 sm:$0xff]  }
 0x2c9   :  { %4775 = vmatprep.subr.bf16.mxu1 %v6347_v1  ;;  %4281 = vmatprep.mubr.bf16.mxu0 %v7196_v40  ;;  %v6363_v56 = vld [vmem:[#allocation2 + $0xa54] ss:$8 sps:$4 sm:$0xff]   ;;  %v6364_v1 = vld [vmem:[#allocation2 + $0x4b0] ss:$8 sps:$4 sm:$0xff]  }
 0x2ca   :  { %4805 = vmatprep.mubr.bf16.mxu1 %v7196_v40 }
 0x2cb   :  { %4252 = vmatpush1.bf16.msra.mxu0 %v6348_v59  ;;  %v6367_v59 = vld [vmem:[#allocation2 + $0xa64] ss:$8 sps:$4 sm:$0xff]  }
 0x2cc   :  { %4776 = vmatpush1.bf16.msra.mxu1 %v6349_v25  ;;  %4374 = vmatprep.subr.bf16.mxu0 %v6350_v49  ;;  %v6368_v25 = vld [vmem:[#allocation2 + $0x4c0] ss:$8 sps:$4 sm:$0xff]  }
 0x2cd   :  { %4820 = vmatprep.subr.bf16.mxu1 %v6351_v15  ;;  %v6369_v49 = vld [vmem:[#allocation2 + $0xa60] ss:$8 sps:$4 sm:$0xff]   ;;  %v6370_v15 = vld [vmem:[#allocation2 + $0x4d4] ss:$8 sps:$4 sm:$0xff]  }
 0x2d2   :  { %5361 = vmatmul.mubr.msk.bf16.vlgmr.msra.gmra.mrb[4].mxu0 %vm824_vm0, %v6952_v38 }
 0x2d3   :  { %5370 = vmatmul.mubr.msk.bf16.vlgmr.msra.gmra.mrb[4].mxu1 %vm824_vm0, %v6952_v38  ;;  %4375 = vmatpush1.bf16.msra.mxu0 %v6352_v31  ;;  %v6361_v38 = vld [vmem:[#allocation2 + $0xa40] ss:$8 sps:$4 sm:$0xff]  }
 0x2d4   :  { %4821 = vmatpush1.bf16.msra.mxu1 %v6353_v33  ;;  %4376 = vmatprep.subr.bf16.mxu0 %v6354_v3 }
 0x2d5   :  { %4822 = vmatprep.subr.bf16.mxu1 %v6355_v35  ;;  %4406 = vmatprep.mubr.bf16.mxu0 %v4368_v9 }
 0x2d6   :  { %4852 = vmatprep.mubr.bf16.mxu1 %v4368_v9  ;;  %v6373_v9 = vld [vmem:[#allocation2 + $0xa70] ss:$8 sps:$4 sm:$0xff]  }
 0x2d7   :  { %4377 = vmatpush1.bf16.msra.mxu0 %v6356_v4  ;;  %v7227_v4 = vld [vmem:[#allocation27_spill] sm:$0xff] }
 0x2d8   :  { %4823 = vmatpush1.bf16.msra.mxu1 %v6357_v8  ;;  %4378 = vmatprep.subr.bf16.mxu0 %v6358_v47  ;;  %v7228_v8 = vld [vmem:[#allocation28_spill] sm:$0xff] }
 0x2d9   :  { %4824 = vmatprep.subr.bf16.mxu1 %v6359_v20  ;;  %v7229_v47 = vmax.f32 %v7227_v4, %v7228_v8 }
 0x2db   :  { %4379 = vmatpush1.bf16.msra.mxu0 %v6360_v53 }
 0x2dc   :  { %4825 = vmatpush1.bf16.msra.mxu1 %v6361_v38  ;;  %4380 = vmatprep.subr.bf16.mxu0 %v6362_v55 }
 0x2dd   :  { %4826 = vmatprep.subr.bf16.mxu1 %v6363_v56 }
 0x2df   :  { %4381 = vmatpush1.bf16.msra.mxu0 %v6364_v1 }
 0x2e0   :  { %4827 = vmatpush1.bf16.msra.mxu1 %v6365_v10  ;;  %4382 = vmatprep.subr.bf16.mxu0 %v6366_v45 }
 0x2e1   :  { %4828 = vmatprep.subr.bf16.mxu1 %v6367_v59 }
 0x2e3   :  { %4383 = vmatpush1.bf16.msra.mxu0 %v6368_v25 }
 0x2e4   :  { %4829 = vmatpush1.bf16.msra.mxu1 %v6369_v49  ;;  %4384 = vmatprep.subr.bf16.mxu0 %v6370_v15 }
 0x2e5   :  { %4830 = vmatprep.subr.bf16.mxu1 %v6371_v42 }
 0x2e7   :  { %4385 = vmatpush1.bf16.msra.mxu0 %v6372_v48 }
 0x2e8   :  { %4831 = vmatpush1.bf16.msra.mxu1 %v6373_v9  ;;  %4386 = vmatprep.subr.bf16.mxu0 %v6796_v13  ;;  %v4334_v13 = vcombine.low %v7045_v29, %v7048_v58  ;;  %v7224_v58 = vld [vmem:[#allocation25_spill] sm:$0xff] }
 0x2e9   :  { %4832 = vmatprep.subr.bf16.mxu1 %v6798_v26  ;;  %v4336_v26 = vcombine.low %v7051_v46, %v7054_v30  ;;  %v7225_v46 = vld [vmem:[#allocation26_spill] sm:$0xff] }
 0x2ea   :  { %v7226_v30 = vmax.f32 %v7224_v58, %v7225_v46 }
 0x2eb   :  { %4387 = vmatpush1.bf16.msra.mxu0 %v6800_v43  ;;  %v4344_v43 = vrot.slane %v4334_v13, %v6480_v54 }
 0x2ec   :  { %4833 = vmatpush1.bf16.msra.mxu1 %v6802_v44  ;;  %4388 = vmatprep.subr.bf16.mxu0 %v6806_v39  ;;  %v4358_v44 = vrot.slane %v4336_v26, %v6480_v54  ;;  %v7205_v39 = vld [vmem:[#allocation9_spill] sm:$0xff]  ;;  %v7211_v54 = vld [vmem:[#allocation15_spill] sm:$0xff] }
 0x2ed   :  { %4834 = vmatprep.subr.bf16.mxu1 %v6808_v52  ;;  %v7206_v52 = vld [vmem:[#allocation10_spill] sm:$0xff] }
 0x2ef   :  { %4389 = vmatpush1.bf16.msra.mxu0 %v6812_v5  ;;  %v4366_v5 = vcombine.low %v4344_v43, %v4358_v44 }
 0x2f0   :  { %4835 = vmatpush1.bf16.msra.mxu1 %v6814_v11  ;;  %4390 = vmatprep.subr.bf16.mxu0 %v6818_v27  ;;  %v7207_v11 = vld [vmem:[#allocation11_spill] sm:$0xff]  ;;  %v7208_v27 = vld [vmem:[#allocation12_spill] sm:$0xff] }
 0x2f1   :  { %4836 = vmatprep.subr.bf16.mxu1 %v6820_v28  ;;  %v7209_v28 = vld [vmem:[#allocation13_spill] sm:$0xff] }
 0x2f3   :  { %4391 = vmatpush1.bf16.msra.mxu0 %v6824_v50  ;;  %v7210_v50 = vld [vmem:[#allocation14_spill] sm:$0xff] }
 0x2f4   :  { %4837 = vmatpush1.bf16.msra.mxu1 %v6826_v12  ;;  %4392 = vmatprep.subr.bf16.mxu0 %v6830_v32  ;;  %v7212_v12 = vld [vmem:[#allocation16_spill] sm:$0xff]  ;;  %v7213_v32 = vld [vmem:[#allocation17_spill] sm:$0xff] }
 0x2f5   :  { %4838 = vmatprep.subr.bf16.mxu1 %v6832_v34  ;;  %v7214_v34 = vld [vmem:[#allocation18_spill] sm:$0xff] }
 0x2f7   :  { %4393 = vmatpush1.bf16.msra.mxu0 %v6836_v51  ;;  %v7215_v51 = vld [vmem:[#allocation19_spill] sm:$0xff] }
 0x2f8   :  { %4839 = vmatpush1.bf16.msra.mxu1 %v6838_v36  ;;  %4394 = vmatprep.subr.bf16.mxu0 %v6842_v41  ;;  %v7216_v36 = vld [vmem:[#allocation20_spill] sm:$0xff]  ;;  %v4367_v41 = vcombine.high %v4344_v43, %v4358_v44 }
 0x2f9   :  { %4840 = vmatprep.subr.bf16.mxu1 %v6844_v57  ;;  %v7217_v57 = vld [vmem:[#allocation8_spill] sm:$0xff] }
 0x2fb   :  { %4395 = vmatpush1.bf16.msra.mxu0 %v6848_v60  ;;  %v4918_v60 = vsub.s32 0, %v7217_v57 }
 0x2fc   :  { %4841 = vmatpush1.bf16.msra.mxu1 %v6850_v61  ;;  %4396 = vmatprep.subr.bf16.mxu0 %v6854_v62  ;;  %v4914_v61 = vld [vmem:[#allocation4] sm:$0x3]  ;;  %v4922_v62 = vsub.s32 1, %v7217_v57 }
 0x2fd   :  { %4842 = vmatprep.subr.bf16.mxu1 %v6856_v63 }
 0x2ff   :  { %4397 = vmatpush1.bf16.msra.mxu0 %v6860_v2 }
 0x300   :  { %4843 = vmatpush1.bf16.msra.mxu1 %v6862_v6  ;;  %4398 = vmatprep.subr.bf16.mxu0 %v6866_v7  ;;  %v7218_v6 = vld [vmem:[#allocation21_spill] sm:$0xff]  ;;  %v7219_v7 = vld [vmem:[#allocation22_spill] sm:$0xff] }
 0x301   :  { %4844 = vmatprep.subr.bf16.mxu1 %v6868_v14  ;;  %v7220_v14 = vmax.f32 %v7218_v6, %v7219_v7 }
 0x303   :  { %4399 = vmatpush1.bf16.msra.mxu0 %v6872_v18 }
 0x304   :  { %4845 = vmatpush1.bf16.msra.mxu1 %v6874_v19  ;;  %4400 = vmatprep.subr.bf16.mxu0 %v6878_v37  ;;  %v4919_v19 = vrot.slane %v4914_v61, %v4918_v60 }
 0x305   :  { %4846 = vmatprep.subr.bf16.mxu1 %v6880_v21 }
 0x307   :  { %4401 = vmatpush1.bf16.msra.mxu0 %v6884_v22  ;;  %v7221_v22 = vld [vmem:[#allocation23_spill] sm:$0xff] }
 0x308   :  { %4847 = vmatpush1.bf16.msra.mxu1 %v6886_v23  ;;  %4402 = vmatprep.subr.bf16.mxu0 %v6890_v0  ;;  %v7222_v23 = vld [vmem:[#allocation24_spill] sm:$0xff] }
 0x309   :  { %4848 = vmatprep.subr.bf16.mxu1 %v6892_v24  ;;  %v7223_v0 = vmax.f32 %v7221_v22, %v7222_v23 }
 0x30b   :  { %4403 = vmatpush1.bf16.msra.mxu0 %v6900_v16  ;;  %v4923_v16 = vrot.slane %v4914_v61, %v4922_v62 }
 0x30c   :  { %4849 = vmatpush1.bf16.msra.mxu1 %v6902_v17  ;;  %4404 = vmatprep.subr.bf16.mxu0 %v7205_v39 }
 0x30d   :  { %4850 = vmatprep.subr.bf16.mxu1 %v7206_v52 }
 0x30f   :  { %4405 = vmatpush1.bf16.msra.mxu0 %v7207_v11 }
 0x310   :  { %4851 = vmatpush1.bf16.msra.mxu1 %v7208_v27  ;;  %4417 = vmatprep.subr.bf16.mxu0 %v7209_v28 }
 0x311   :  { %4863 = vmatprep.subr.bf16.mxu1 %v7210_v50 }
 0x312   :  { %4407 = vmatmul.mubr.bf16.vlgmr.msra.gmra.mrb[4].mxu0 %v4366_v5 }
 0x313   :  { %4853 = vmatmul.mubr.bf16.vlgmr.msra.gmra.mrb[4].mxu1 %v4366_v5  ;;  %4418 = vmatpush1.bf16.msra.mxu0 %v7211_v54 }
 0x314   :  { %4864 = vmatpush1.bf16.msra.mxu1 %v7212_v12  ;;  %4419 = vmatprep.subr.bf16.mxu0 %v7213_v32 }
 0x315   :  { %4865 = vmatprep.subr.bf16.mxu1 %v7214_v34  ;;  %4449 = vmatprep.mubr.bf16.mxu0 %v7196_v40 }
 0x316   :  { %4895 = vmatprep.mubr.bf16.mxu1 %v7196_v40 }
 0x317   :  { %4420 = vmatpush1.bf16.msra.mxu0 %v7215_v51 }
 0x318   :  { %4866 = vmatpush1.bf16.msra.mxu1 %v7216_v36 }
 0x31e   :  { %5366 = vmatmul.mubr.msk.bf16.vlgmr.msra.gmra.mrb[4].mxu0 %vm824_vm0, %v4367_v41 }
 0x31f   :  { %5371 = vmatmul.mubr.msk.bf16.vlgmr.msra.gmra.mrb[4].mxu1 %vm824_vm0, %v4367_v41 }
 0x3f1   :  { %v4451_v63 = vpop.f32.mrb[4].mxu0 }
 0x3f2   :  { %v4897_v2 = vpop.f32.mrb[4].mxu1  ;;  %v4464_v18 = vmax.f32 %v7220_v14, %v4451_v63  ;;  %v4453_v37 = vpop.f32.mrb[5].mxu0 }
 0x3f3   :  { %v4899_v21 = vpop.f32.mrb[5].mxu1  ;;  %v4465_v24 = vmax.f32 %v7223_v0, %v4453_v37  ;;  %v4455_v17 = vpop.f32.mrb[6].mxu0 }
 0x3f4   :  { %v4901_v40 = vpop.f32.mrb[6].mxu1  ;;  %v4910_v29 = vmax.f32 %v4464_v18, %v4897_v2  ;;  %v4466_v31 = vmax.f32 %v7226_v30, %v4455_v17  ;;  %v4457_v33 = vpop.f32.mrb[7].mxu0 }
 0x3f5   :  { %v4903_v3 = vpop.f32.mrb[7].mxu1  ;;  %v4911_v35 = vmax.f32 %v4465_v24, %v4899_v21  ;;  %v4467_v20 = vmax.f32 %v7229_v47, %v4457_v33 }
 0x3f6   :  { %v4926_v53 = vadd.f32 %v4919_v19, %v4910_v29  ;;  %v4912_v38 = vmax.f32 %v4466_v31, %v4901_v40 }
 0x3f7   :  { %v4927_v55 = vadd.f32 %v4923_v16, %v4911_v35  ;;  %v4913_v56 = vmax.f32 %v4467_v20, %v4903_v3 }
 0x3f8   :  { %v4930_v1 = vmax.f32 %v4926_v53, 0.0  ;;  %v4928_v10 = vadd.f32 %v4919_v19, %v4912_v38 }
 0x3f9   :  { %v4931_v45 = vmax.f32 %v4927_v55, 0.0  ;;  %v4929_v59 = vadd.f32 %v4923_v16, %v4913_v56 }
 0x3fa   :  { %4934 = vst [vmem:[%s7158_s4] sm:$0xff] %v4930_v1  ;;  %v4932_v25 = vmax.f32 %v4928_v10, 0.0 }
 0x3fb   :  { %4936 = vst.msk [vmem:[%s7158_s4 + $0x8] sm:$0xff] %vm4935_vm1, %v4931_v45  ;;  %v4933_v49 = vmax.f32 %v4929_v59, 0.0 }
 0x3fc   :  { %4937 = vst [vmem:[%s7158_s4 + $0x10] sm:$0x3f] %v4932_v25 }
 0x3fd   :  { %4939 = vst.msk [vmem:[%s7158_s4 + $0x18] sm:$0x3f] %vm4938_vm2, %v4933_v49 }
 0x3fe   :  { %4944 = vsyncpa [#allocation3], 1 }
 0x3ff   :  { %4945 = vsyncpa [#allocation5], 1 }

</bundles_post_ra>
